<compile_context>
chip_gen: v7x
topology: tpu7x:2x2x1
jax: 0.10.0
libtpu: 0.0.40
codegen_flags: <defaults>
</compile_context>

<pallas_src>
import jax
import jax.numpy as jnp
from jax.experimental import pallas as pl
from jax.experimental.pallas import tpu as pltpu

NEG_SLOPE = 0.01
BN_EPS = 1e-5
VMEM_LIMIT = 32 * 1024 * 1024   # explicit; safe on v5e/v6e (128 MiB) and v7x (64 MiB)


def _leaky(x):
    return jnp.where(x >= 0, x, NEG_SLOPE * x)


# --------------------------------------------------------------------------- #
# Pass 1: conv path + partial BN statistics (grid over images, "parallel").
# --------------------------------------------------------------------------- #
def _pass1_kernel(x_ref, w1_ref, b1_ref, w2_ref, b2_ref, w3_ref, b3_ref,
                  y_ref, stats_ref, pad_ref):
    HW, _ = x_ref.shape
    Cm = w1_ref.shape[1]
    Hp2, Wp2, _ = pad_ref.shape
    H, W = Hp2 - 2, Wp2 - 2

    x = x_ref[...]                                              # (HW, C)

    # --- CBR1: 1x1 conv + bias + LeakyReLU (one MXU matmul) --------------- #
    h1 = _leaky(jnp.dot(x, w1_ref[...],
                        preferred_element_type=jnp.float32) + b1_ref[...])

    # --- CBR2: 3x3 conv (pad=1) as a single im2col matmul ------------------ #
    # Zero only the 1-pixel border frame (O(perimeter), not O(area)); the
    # interior is overwritten every grid step.
    pad_ref[0:1, :, :] = jnp.zeros((1, Wp2, Cm), jnp.float32)
    pad_ref[H + 1:H + 2, :, :] = jnp.zeros((1, Wp2, Cm), jnp.float32)
    pad_ref[:, 0:1, :] = jnp.zeros((Hp2, 1, Cm), jnp.float32)
    pad_ref[:, W + 1:W + 2, :] = jnp.zeros((Hp2, 1, Cm), jnp.float32)
    pad_ref[1:H + 1, 1:W + 1, :] = h1.reshape(H, W, Cm)

    # (HW, 9*Cm) slab -> one matmul with K = 9*Cm (9x fewer MXU pushes than
    # nine separate K=Cm dots).
    cols = jnp.concatenate(
        [pad_ref[dy:dy + H, dx:dx + W, :].reshape(HW, Cm)
         for dy in range(3) for dx in range(3)], axis=1)
    h2 = _leaky(jnp.dot(cols, w2_ref[...],
                        preferred_element_type=jnp.float32) + b2_ref[...])

    # --- conv3: 1x1 conv + bias (pre-BatchNorm activations) ---------------- #
    y = jnp.dot(h2, w3_ref[...],
                preferred_element_type=jnp.float32) + b3_ref[...]
    y_ref[...] = y

    # Per-image partial BN statistics: row 0 = sum, row 1 = sum of squares.
    s1 = jnp.sum(y, axis=0, keepdims=True)
    s2 = jnp.sum(y * y, axis=0, keepdims=True)
    stats_ref[...] = jnp.concatenate([s1, s2], axis=0)


# --------------------------------------------------------------------------- #
# Pass 2: lane-dense BN scale/shift + residual + LeakyReLU (elementwise grid).
# --------------------------------------------------------------------------- #
def _pass2_kernel(y_ref, x_ref, scale_ref, shift_ref, out_ref):
    out_ref[...] = _leaky(x_ref[...] + y_ref[...] * scale_ref[...]
                          + shift_ref[...])


@jax.jit
def bottleneck_forward(x_nchw, params):
    w1, b1, w2, b2, w3, b3, gamma, beta = params
    N, C, H, W = x_nchw.shape
    Cm = w1.shape[0]
    HW = H * W
    M = N * HW

    x_nhwc = jnp.transpose(x_nchw, (0, 2, 3, 1)).astype(jnp.float32)
    x_rows = x_nhwc.reshape(N, HW, C)

    # torch conv weights (O, I, kh, kw) -> matmul-friendly layouts.
    w1_mat = jnp.transpose(w1[:, :, 0, 0], (1, 0))                 # (C, Cm)
    w3_mat = jnp.transpose(w3[:, :, 0, 0], (1, 0))                 # (Cm, C)
    w2_mat = jnp.transpose(w2, (2, 3, 1, 0)).reshape(9 * Cm, Cm)   # (9*Cm, Cm)

    wbytes = 4 * (w1_mat.size + w2_mat.size + w3_mat.size + 2 * Cm + 2 * C)
    cost1 = pl.CostEstimate(
        flops=2 * M * (C * Cm + 9 * Cm * Cm + Cm * C),
        transcendentals=0,
        bytes_accessed=4 * (2 * M * C + 2 * N * C) + wbytes)

    y_rows, stats = pl.pallas_call(
        _pass1_kernel,
        out_shape=(jax.ShapeDtypeStruct((N, HW, C), jnp.float32),
                   jax.ShapeDtypeStruct((N, 2, C), jnp.float32)),
        grid_spec=pltpu.PrefetchScalarGridSpec(
            num_scalar_prefetch=0,
            grid=(N,),
            in_specs=[
                pl.BlockSpec((None, HW, C), lambda n: (n, 0, 0)),
                pl.BlockSpec((C, Cm), lambda n: (0, 0)),
                pl.BlockSpec((1, Cm), lambda n: (0, 0)),
                pl.BlockSpec((9 * Cm, Cm), lambda n: (0, 0)),
                pl.BlockSpec((1, Cm), lambda n: (0, 0)),
                pl.BlockSpec((Cm, C), lambda n: (0, 0)),
                pl.BlockSpec((1, C), lambda n: (0, 0)),
            ],
            out_specs=[
                pl.BlockSpec((None, HW, C), lambda n: (n, 0, 0)),
                pl.BlockSpec((None, 2, C), lambda n: (n, 0, 0)),
            ],
            scratch_shapes=[pltpu.VMEM((H + 2, W + 2, Cm), jnp.float32)]),
        compiler_params=pltpu.CompilerParams(
            dimension_semantics=("parallel",),
            vmem_limit_bytes=VMEM_LIMIT),
        cost_estimate=cost1,
    )(x_rows, w1_mat, b1.reshape(1, Cm), w2_mat, b2.reshape(1, Cm),
      w3_mat, b3.reshape(1, C))

    # Global BN statistics (training mode: biased variance, eps=1e-5),
    # var = E[y^2] - E[y]^2, then folded into one per-channel scale/shift.
    total = jnp.sum(stats, axis=0)                       # (2, C)
    mean = total[0] / M
    var = jnp.maximum(total[1] / M - mean * mean, 0.0)   # guard cancellation
    scale = gamma * jax.lax.rsqrt(var + BN_EPS)          # (C,)
    shift = beta - mean * scale                          # (C,)

    # Lane-dense slabs: (N*H, W*C) is a free row-major reshape of NHWC.
    NH, WC = N * H, W * C
    x_slab = x_nhwc.reshape(NH, WC)
    y_slab = y_rows.reshape(NH, WC)
    scale_slab = jnp.tile(scale, W).reshape(1, WC)
    shift_slab = jnp.tile(shift, W).reshape(1, WC)

    TR = NH if NH <= 256 else 256
    cost2 = pl.CostEstimate(flops=4 * M * C, transcendentals=0,
                            bytes_accessed=4 * (3 * M * C + 2 * WC))

    out_slab = pl.pallas_call(
        _pass2_kernel,
        out_shape=jax.ShapeDtypeStruct((NH, WC), jnp.float32),
        grid_spec=pltpu.PrefetchScalarGridSpec(
            num_scalar_prefetch=0,
            grid=(pl.cdiv(NH, TR),),
            in_specs=[
                pl.BlockSpec((TR, WC), lambda i: (i, 0)),
                pl.BlockSpec((TR, WC), lambda i: (i, 0)),
                pl.BlockSpec((1, WC), lambda i: (0, 0)),
                pl.BlockSpec((1, WC), lambda i: (0, 0)),
            ],
            out_specs=pl.BlockSpec((TR, WC), lambda i: (i, 0))),
        compiler_params=pltpu.CompilerParams(
            dimension_semantics=("parallel",),
            vmem_limit_bytes=VMEM_LIMIT),
        cost_estimate=cost2,
        input_output_aliases={0: 0},   # output reuses y's HBM buffer
    )(y_slab, x_slab, scale_slab, shift_slab)

    out_nhwc = out_slab.reshape(N, H, W, C)
    return jnp.transpose(out_nhwc, (0, 3, 1, 2))           # NHWC -> NCHW


def ref_forward(x_nchw, params):
    """Pure-JAX reference (lax.conv) with identical semantics."""
    w1, b1, w2, b2, w3, b3, gamma, beta = params
    x = jnp.transpose(x_nchw, (0, 2, 3, 1)).astype(jnp.float32)

    def conv(h, w, b, pad):
        y = jax.lax.conv_general_dilated(
            h, jnp.transpose(w, (2, 3, 1, 0)), (1, 1),
            [(pad, pad), (pad, pad)],
            dimension_numbers=('NHWC', 'HWIO', 'NHWC'))
        return y + b.reshape(1, 1, 1, -1)

    h = _leaky(conv(x, w1, b1, 0))
    h = _leaky(conv(h, w2, b2, 1))
    y = conv(h, w3, b3, 0)
    mean = jnp.mean(y, axis=(0, 1, 2), keepdims=True)
    var = jnp.mean((y - mean) ** 2, axis=(0, 1, 2), keepdims=True)
    y_bn = ((y - mean) * jax.lax.rsqrt(var + BN_EPS)
            * gamma.reshape(1, 1, 1, -1) + beta.reshape(1, 1, 1, -1))
    return jnp.transpose(_leaky(x + y_bn), (0, 3, 1, 2))


if __name__ == "__main__":
    N, C, H, W = 2, 32, 16, 16        # in_channels=32 -> mid channels 8
    Cm = C // 4
    key = jax.random.PRNGKey(0)
    ks = jax.random.split(key, 7)

    w1 = 0.1 * jax.random.normal(ks[0], (Cm, C, 1, 1), jnp.float32)
    b1 = 0.1 * jax.random.normal(ks[1], (Cm,), jnp.float32)
    w2 = 0.1 * jax.random.normal(ks[2], (Cm, Cm, 3, 3), jnp.float32)
    b2 = 0.1 * jax.random.normal(ks[3], (Cm,), jnp.float32)
    w3 = 0.1 * jax.random.normal(ks[4], (C, Cm, 1, 1), jnp.float32)
    b3 = 0.1 * jax.random.normal(ks[5], (C,), jnp.float32)
    gamma = jnp.ones((C,), jnp.float32)    # BatchNorm2d default weight
    beta = jnp.zeros((C,), jnp.float32)    # BatchNorm2d default bias
    params = (w1, b1, w2, b2, w3, b3, gamma, beta)

    x = jax.random.normal(ks[6], (N, C, H, W), jnp.float32)

    out = jax.block_until_ready(bottleneck_forward(x, params))
    ref = ref_forward(x, params)
    assert out.shape == (N, C, H, W)
    max_err = float(jnp.max(jnp.abs(out - ref)))
    if not jnp.allclose(out, ref, atol=2e-4, rtol=2e-4):
        raise AssertionError(f"mismatch vs reference: max abs diff = {max_err:e}")
    print("KERNEL_OK")
</pallas_src>

<mosaic_0001>
module attributes {stable_mosaic.version = 11 : i64} {
  func.func @_pass1_kernel(%arg0: i32, %arg1: memref<1x256x32xf32, #tpu.memory_space<vmem>>, %arg2: memref<32x8xf32, #tpu.memory_space<vmem>>, %arg3: memref<1x8xf32, #tpu.memory_space<vmem>>, %arg4: memref<72x8xf32, #tpu.memory_space<vmem>>, %arg5: memref<1x8xf32, #tpu.memory_space<vmem>>, %arg6: memref<8x32xf32, #tpu.memory_space<vmem>>, %arg7: memref<1x32xf32, #tpu.memory_space<vmem>>, %arg8: memref<1x256x32xf32, #tpu.memory_space<vmem>>, %arg9: memref<1x2x32xf32, #tpu.memory_space<vmem>>, %arg10: memref<18x18x8xf32, #tpu.memory_space<vmem>>) attributes {dimension_semantics = [#tpu.dimension_semantics<parallel>], iteration_bounds = array<i64: 2>, scalar_prefetch = 0 : i64, scratch_operands = 1 : i64, tpu.core_type = #tpu.core_type<tc>, window_params = [{transform_indices = @transform_0, window_bounds = array<i64: 1, 256, 32>}, {pipeline_mode = #tpu.pipeline_mode<synchronous>, transform_indices = @transform_1, window_bounds = array<i64: 32, 8>}, {pipeline_mode = #tpu.pipeline_mode<synchronous>, transform_indices = @transform_2, window_bounds = array<i64: 1, 8>}, {pipeline_mode = #tpu.pipeline_mode<synchronous>, transform_indices = @transform_3, window_bounds = array<i64: 72, 8>}, {pipeline_mode = #tpu.pipeline_mode<synchronous>, transform_indices = @transform_4, window_bounds = array<i64: 1, 8>}, {pipeline_mode = #tpu.pipeline_mode<synchronous>, transform_indices = @transform_5, window_bounds = array<i64: 8, 32>}, {pipeline_mode = #tpu.pipeline_mode<synchronous>, transform_indices = @transform_6, window_bounds = array<i64: 1, 32>}, {transform_indices = @transform_7, window_bounds = array<i64: 1, 256, 32>}, {transform_indices = @transform_8, window_bounds = array<i64: 1, 2, 32>}]} {
    %c0 = arith.constant 0 : index
    %c0_0 = arith.constant 0 : index
    %c0_1 = arith.constant 0 : index
    %0 = vector.load %arg1[%c0, %c0_0, %c0_1] : memref<1x256x32xf32, #tpu.memory_space<vmem>>, vector<1x256x32xf32>
    %1 = vector.shape_cast %0 : vector<1x256x32xf32> to vector<256x32xf32>
    %c0_2 = arith.constant 0 : index
    %c0_3 = arith.constant 0 : index
    %2 = vector.load %arg2[%c0_2, %c0_3] : memref<32x8xf32, #tpu.memory_space<vmem>>, vector<32x8xf32>
    %cst = arith.constant dense<0.000000e+00> : vector<256x8xf32>
    %3 = tpu.matmul %1, %2, %cst {dimension_numbers = #tpu.dot_dimension_numbers<[1], [0], [0], [1], [0, 0, 1, 1], [], []>} : vector<256x32xf32>, vector<32x8xf32>, vector<256x8xf32> -> vector<256x8xf32>
    %c0_4 = arith.constant 0 : index
    %c0_5 = arith.constant 0 : index
    %4 = vector.load %arg3[%c0_4, %c0_5] : memref<1x8xf32, #tpu.memory_space<vmem>>, vector<1x8xf32>
    %5 = vector.broadcast %4 : vector<1x8xf32> to vector<256x8xf32>
    %6 = arith.addf %3, %5 : vector<256x8xf32>
    %cst_6 = arith.constant 0.000000e+00 : f32
    %7 = vector.broadcast %cst_6 : f32 to vector<256x8xf32>
    %8 = arith.cmpf oge, %6, %7 : vector<256x8xf32>
    %cst_7 = arith.constant 0.00999999977 : f32
    %9 = vector.broadcast %cst_7 : f32 to vector<256x8xf32>
    %10 = arith.mulf %9, %6 : vector<256x8xf32>
    %11 = arith.select %8, %6, %10 : vector<256x8xi1>, vector<256x8xf32>
    %cst_8 = arith.constant 0.000000e+00 : f32
    %12 = vector.broadcast %cst_8 : f32 to vector<1x18x8xf32>
    %c0_9 = arith.constant 0 : index
    %c0_10 = arith.constant 0 : index
    %c0_11 = arith.constant 0 : index
    %13 = vector.load %arg10[%c0_9, %c0_10, %c0_11] : memref<18x18x8xf32, #tpu.memory_space<vmem>>, vector<1x18x8xf32>
    tpu.vector_store %arg10[%c0_9, %c0_10, %c0_11], %12 {strides = array<i32>} : memref<18x18x8xf32, #tpu.memory_space<vmem>>, vector<1x18x8xf32>,
    %cst_12 = arith.constant 0.000000e+00 : f32
    %14 = vector.broadcast %cst_12 : f32 to vector<1x18x8xf32>
    %c17 = arith.constant 17 : index
    %c0_13 = arith.constant 0 : index
    %c0_14 = arith.constant 0 : index
    %15 = vector.load %arg10[%c17, %c0_13, %c0_14] : memref<18x18x8xf32, #tpu.memory_space<vmem>>, vector<1x18x8xf32>
    tpu.vector_store %arg10[%c17, %c0_13, %c0_14], %14 {strides = array<i32>} : memref<18x18x8xf32, #tpu.memory_space<vmem>>, vector<1x18x8xf32>,
    %cst_15 = arith.constant 0.000000e+00 : f32
    %16 = vector.broadcast %cst_15 : f32 to vector<18x1x8xf32>
    %c0_16 = arith.constant 0 : index
    %c0_17 = arith.constant 0 : index
    %c0_18 = arith.constant 0 : index
    %17 = vector.load %arg10[%c0_16, %c0_17, %c0_18] : memref<18x18x8xf32, #tpu.memory_space<vmem>>, vector<18x1x8xf32>
    tpu.vector_store %arg10[%c0_16, %c0_17, %c0_18], %16 {strides = array<i32>} : memref<18x18x8xf32, #tpu.memory_space<vmem>>, vector<18x1x8xf32>,
    %cst_19 = arith.constant 0.000000e+00 : f32
    %18 = vector.broadcast %cst_19 : f32 to vector<18x1x8xf32>
    %c0_20 = arith.constant 0 : index
    %c17_21 = arith.constant 17 : index
    %c0_22 = arith.constant 0 : index
    %19 = vector.load %arg10[%c0_20, %c17_21, %c0_22] : memref<18x18x8xf32, #tpu.memory_space<vmem>>, vector<18x1x8xf32>
    tpu.vector_store %arg10[%c0_20, %c17_21, %c0_22], %18 {strides = array<i32>} : memref<18x18x8xf32, #tpu.memory_space<vmem>>, vector<18x1x8xf32>,
    %20 = vector.shape_cast %11 : vector<256x8xf32> to vector<16x16x8xf32>
    %c1 = arith.constant 1 : index
    %c1_23 = arith.constant 1 : index
    %c0_24 = arith.constant 0 : index
    %21 = vector.load %arg10[%c1, %c1_23, %c0_24] : memref<18x18x8xf32, #tpu.memory_space<vmem>>, vector<16x16x8xf32>
    tpu.vector_store %arg10[%c1, %c1_23, %c0_24], %20 {strides = array<i32>} : memref<18x18x8xf32, #tpu.memory_space<vmem>>, vector<16x16x8xf32>,
    %c0_25 = arith.constant 0 : index
    %c0_26 = arith.constant 0 : index
    %c0_27 = arith.constant 0 : index
    %22 = vector.load %arg10[%c0_25, %c0_26, %c0_27] : memref<18x18x8xf32, #tpu.memory_space<vmem>>, vector<16x16x8xf32>
    %23 = vector.shape_cast %22 : vector<16x16x8xf32> to vector<256x8xf32>
    %c0_28 = arith.constant 0 : index
    %c1_29 = arith.constant 1 : index
    %c0_30 = arith.constant 0 : index
    %24 = vector.load %arg10[%c0_28, %c1_29, %c0_30] : memref<18x18x8xf32, #tpu.memory_space<vmem>>, vector<16x16x8xf32>
    %25 = vector.shape_cast %24 : vector<16x16x8xf32> to vector<256x8xf32>
    %c0_31 = arith.constant 0 : index
    %c2 = arith.constant 2 : index
    %c0_32 = arith.constant 0 : index
    %26 = vector.load %arg10[%c0_31, %c2, %c0_32] : memref<18x18x8xf32, #tpu.memory_space<vmem>>, vector<16x16x8xf32>
    %27 = vector.shape_cast %26 : vector<16x16x8xf32> to vector<256x8xf32>
    %c1_33 = arith.constant 1 : index
    %c0_34 = arith.constant 0 : index
    %c0_35 = arith.constant 0 : index
    %28 = vector.load %arg10[%c1_33, %c0_34, %c0_35] : memref<18x18x8xf32, #tpu.memory_space<vmem>>, vector<16x16x8xf32>
    %29 = vector.shape_cast %28 : vector<16x16x8xf32> to vector<256x8xf32>
    %c1_36 = arith.constant 1 : index
    %c1_37 = arith.constant 1 : index
    %c0_38 = arith.constant 0 : index
    %30 = vector.load %arg10[%c1_36, %c1_37, %c0_38] : memref<18x18x8xf32, #tpu.memory_space<vmem>>, vector<16x16x8xf32>
    %31 = vector.shape_cast %30 : vector<16x16x8xf32> to vector<256x8xf32>
    %c1_39 = arith.constant 1 : index
    %c2_40 = arith.constant 2 : index
    %c0_41 = arith.constant 0 : index
    %32 = vector.load %arg10[%c1_39, %c2_40, %c0_41] : memref<18x18x8xf32, #tpu.memory_space<vmem>>, vector<16x16x8xf32>
    %33 = vector.shape_cast %32 : vector<16x16x8xf32> to vector<256x8xf32>
    %c2_42 = arith.constant 2 : index
    %c0_43 = arith.constant 0 : index
    %c0_44 = arith.constant 0 : index
    %34 = vector.load %arg10[%c2_42, %c0_43, %c0_44] : memref<18x18x8xf32, #tpu.memory_space<vmem>>, vector<16x16x8xf32>
    %35 = vector.shape_cast %34 : vector<16x16x8xf32> to vector<256x8xf32>
    %c2_45 = arith.constant 2 : index
    %c1_46 = arith.constant 1 : index
    %c0_47 = arith.constant 0 : index
    %36 = vector.load %arg10[%c2_45, %c1_46, %c0_47] : memref<18x18x8xf32, #tpu.memory_space<vmem>>, vector<16x16x8xf32>
    %37 = vector.shape_cast %36 : vector<16x16x8xf32> to vector<256x8xf32>
    %c2_48 = arith.constant 2 : index
    %c2_49 = arith.constant 2 : index
    %c0_50 = arith.constant 0 : index
    %38 = vector.load %arg10[%c2_48, %c2_49, %c0_50] : memref<18x18x8xf32, #tpu.memory_space<vmem>>, vector<16x16x8xf32>
    %39 = vector.shape_cast %38 : vector<16x16x8xf32> to vector<256x8xf32>
    %40 = tpu.concatenate %23, %25, %27, %29, %31, %33, %35, %37, %39 in 1 : vector<256x8xf32>, vector<256x8xf32>, vector<256x8xf32>, vector<256x8xf32>, vector<256x8xf32>, vector<256x8xf32>, vector<256x8xf32>, vector<256x8xf32>, vector<256x8xf32> -> vector<256x72xf32>
    %c0_51 = arith.constant 0 : index
    %c0_52 = arith.constant 0 : index
    %41 = vector.load %arg4[%c0_51, %c0_52] : memref<72x8xf32, #tpu.memory_space<vmem>>, vector<72x8xf32>
    %cst_53 = arith.constant dense<0.000000e+00> : vector<256x8xf32>
    %42 = tpu.matmul %40, %41, %cst_53 {dimension_numbers = #tpu.dot_dimension_numbers<[1], [0], [0], [1], [0, 0, 1, 1], [], []>} : vector<256x72xf32>, vector<72x8xf32>, vector<256x8xf32> -> vector<256x8xf32>
    %c0_54 = arith.constant 0 : index
    %c0_55 = arith.constant 0 : index
    %43 = vector.load %arg5[%c0_54, %c0_55] : memref<1x8xf32, #tpu.memory_space<vmem>>, vector<1x8xf32>
    %44 = vector.broadcast %43 : vector<1x8xf32> to vector<256x8xf32>
    %45 = arith.addf %42, %44 : vector<256x8xf32>
    %cst_56 = arith.constant 0.000000e+00 : f32
    %46 = vector.broadcast %cst_56 : f32 to vector<256x8xf32>
    %47 = arith.cmpf oge, %45, %46 : vector<256x8xf32>
    %cst_57 = arith.constant 0.00999999977 : f32
    %48 = vector.broadcast %cst_57 : f32 to vector<256x8xf32>
    %49 = arith.mulf %48, %45 : vector<256x8xf32>
    %50 = arith.select %47, %45, %49 : vector<256x8xi1>, vector<256x8xf32>
    %c0_58 = arith.constant 0 : index
    %c0_59 = arith.constant 0 : index
    %51 = vector.load %arg6[%c0_58, %c0_59] : memref<8x32xf32, #tpu.memory_space<vmem>>, vector<8x32xf32>
    %cst_60 = arith.constant dense<0.000000e+00> : vector<256x32xf32>
    %52 = tpu.matmul %50, %51, %cst_60 {dimension_numbers = #tpu.dot_dimension_numbers<[1], [0], [0], [1], [0, 0, 1, 1], [], []>} : vector<256x8xf32>, vector<8x32xf32>, vector<256x32xf32> -> vector<256x32xf32>
    %c0_61 = arith.constant 0 : index
    %c0_62 = arith.constant 0 : index
    %53 = vector.load %arg7[%c0_61, %c0_62] : memref<1x32xf32, #tpu.memory_space<vmem>>, vector<1x32xf32>
    %54 = vector.broadcast %53 : vector<1x32xf32> to vector<256x32xf32>
    %55 = arith.addf %52, %54 : vector<256x32xf32>
    %c0_63 = arith.constant 0 : index
    %c0_64 = arith.constant 0 : index
    %c0_65 = arith.constant 0 : index
    %56 = vector.load %arg8[%c0_63, %c0_64, %c0_65] : memref<1x256x32xf32, #tpu.memory_space<vmem>>, vector<1x256x32xf32>
    %57 = vector.shape_cast %56 : vector<1x256x32xf32> to vector<256x32xf32>
    %58 = vector.shape_cast %55 : vector<256x32xf32> to vector<1x256x32xf32>
    tpu.vector_store %arg8[%c0_63, %c0_64, %c0_65], %58 {strides = array<i32>} : memref<1x256x32xf32, #tpu.memory_space<vmem>>, vector<1x256x32xf32>,
    %cst_66 = arith.constant dense<0.000000e+00> : vector<32xf32>
    %59 = vector.multi_reduction <add>, %55, %cst_66 [0] : vector<256x32xf32> to vector<32xf32>
    %60 = vector.shape_cast %59 : vector<32xf32> to vector<1x32xf32>
    %61 = arith.mulf %55, %55 : vector<256x32xf32>
    %cst_67 = arith.constant dense<0.000000e+00> : vector<32xf32>
    %62 = vector.multi_reduction <add>, %61, %cst_67 [0] : vector<256x32xf32> to vector<32xf32>
    %63 = vector.shape_cast %62 : vector<32xf32> to vector<1x32xf32>
    %64 = tpu.concatenate %60, %63 in 0 : vector<1x32xf32>, vector<1x32xf32> -> vector<2x32xf32>
    %c0_68 = arith.constant 0 : index
    %c0_69 = arith.constant 0 : index
    %c0_70 = arith.constant 0 : index
    %65 = vector.load %arg9[%c0_68, %c0_69, %c0_70] : memref<1x2x32xf32, #tpu.memory_space<vmem>>, vector<1x2x32xf32>
    %66 = vector.shape_cast %65 : vector<1x2x32xf32> to vector<2x32xf32>
    %67 = vector.shape_cast %64 : vector<2x32xf32> to vector<1x2x32xf32>
    tpu.vector_store %arg9[%c0_68, %c0_69, %c0_70], %67 {strides = array<i32>} : memref<1x2x32xf32, #tpu.memory_space<vmem>>, vector<1x2x32xf32>,
    return
  }
  func.func @transform_0(%arg0: i32) -> (i32, i32, i32) {
    %c0_i32 = arith.constant 0 : i32
    %c0_i32_0 = arith.constant 0 : i32
    %c0_i32_1 = arith.constant 0 : i32
    return %arg0, %c0_i32, %c0_i32_0 : i32, i32, i32
  }
  func.func @transform_1(%arg0: i32) -> (i32, i32) {
    %c0_i32 = arith.constant 0 : i32
    %c0_i32_0 = arith.constant 0 : i32
    %c0_i32_1 = arith.constant 0 : i32
    return %c0_i32, %c0_i32_0 : i32, i32
  }
  func.func @transform_2(%arg0: i32) -> (i32, i32) {
    %c0_i32 = arith.constant 0 : i32
    %c0_i32_0 = arith.constant 0 : i32
    %c0_i32_1 = arith.constant 0 : i32
    return %c0_i32, %c0_i32_0 : i32, i32
  }
  func.func @transform_3(%arg0: i32) -> (i32, i32) {
    %c0_i32 = arith.constant 0 : i32
    %c0_i32_0 = arith.constant 0 : i32
    %c0_i32_1 = arith.constant 0 : i32
    return %c0_i32, %c0_i32_0 : i32, i32
  }
  func.func @transform_4(%arg0: i32) -> (i32, i32) {
    %c0_i32 = arith.constant 0 : i32
    %c0_i32_0 = arith.constant 0 : i32
    %c0_i32_1 = arith.constant 0 : i32
    return %c0_i32, %c0_i32_0 : i32, i32
  }
  func.func @transform_5(%arg0: i32) -> (i32, i32) {
    %c0_i32 = arith.constant 0 : i32
    %c0_i32_0 = arith.constant 0 : i32
    %c0_i32_1 = arith.constant 0 : i32
    return %c0_i32, %c0_i32_0 : i32, i32
  }
  func.func @transform_6(%arg0: i32) -> (i32, i32) {
    %c0_i32 = arith.constant 0 : i32
    %c0_i32_0 = arith.constant 0 : i32
    %c0_i32_1 = arith.constant 0 : i32
    return %c0_i32, %c0_i32_0 : i32, i32
  }
  func.func @transform_7(%arg0: i32) -> (i32, i32, i32) {
    %c0_i32 = arith.constant 0 : i32
    %c0_i32_0 = arith.constant 0 : i32
    %c0_i32_1 = arith.constant 0 : i32
    return %arg0, %c0_i32, %c0_i32_0 : i32, i32, i32
  }
  func.func @transform_8(%arg0: i32) -> (i32, i32, i32) {
    %c0_i32 = arith.constant 0 : i32
    %c0_i32_0 = arith.constant 0 : i32
    %c0_i32_1 = arith.constant 0 : i32
    return %arg0, %c0_i32, %c0_i32_0 : i32, i32, i32
  }
}

module attributes {stable_mosaic.version = 11 : i64} {
  func.func @_pass2_kernel(%arg0: i32, %arg1: memref<32x512xf32, #tpu.memory_space<vmem>>, %arg2: memref<32x512xf32, #tpu.memory_space<vmem>>, %arg3: memref<1x512xf32, #tpu.memory_space<vmem>>, %arg4: memref<1x512xf32, #tpu.memory_space<vmem>>, %arg5: memref<32x512xf32, #tpu.memory_space<vmem>>) attributes {dimension_semantics = [#tpu.dimension_semantics<parallel>], iteration_bounds = array<i64: 1>, scalar_prefetch = 0 : i64, scratch_operands = 0 : i64, tpu.core_type = #tpu.core_type<tc>, window_params = [{transform_indices = @transform_0, window_bounds = array<i64: 32, 512>}, {transform_indices = @transform_1, window_bounds = array<i64: 32, 512>}, {pipeline_mode = #tpu.pipeline_mode<synchronous>, transform_indices = @transform_2, window_bounds = array<i64: 1, 512>}, {pipeline_mode = #tpu.pipeline_mode<synchronous>, transform_indices = @transform_3, window_bounds = array<i64: 1, 512>}, {transform_indices = @transform_4, window_bounds = array<i64: 32, 512>}]} {
    %c0 = arith.constant 0 : index
    %c0_0 = arith.constant 0 : index
    %0 = vector.load %arg2[%c0, %c0_0] : memref<32x512xf32, #tpu.memory_space<vmem>>, vector<32x512xf32>
    %c0_1 = arith.constant 0 : index
    %c0_2 = arith.constant 0 : index
    %1 = vector.load %arg1[%c0_1, %c0_2] : memref<32x512xf32, #tpu.memory_space<vmem>>, vector<32x512xf32>
    %c0_3 = arith.constant 0 : index
    %c0_4 = arith.constant 0 : index
    %2 = vector.load %arg3[%c0_3, %c0_4] : memref<1x512xf32, #tpu.memory_space<vmem>>, vector<1x512xf32>
    %3 = vector.broadcast %2 : vector<1x512xf32> to vector<32x512xf32>
    %4 = arith.mulf %1, %3 : vector<32x512xf32>
    %5 = arith.addf %0, %4 : vector<32x512xf32>
    %c0_5 = arith.constant 0 : index
    %c0_6 = arith.constant 0 : index
    %6 = vector.load %arg4[%c0_5, %c0_6] : memref<1x512xf32, #tpu.memory_space<vmem>>, vector<1x512xf32>
    %7 = vector.broadcast %6 : vector<1x512xf32> to vector<32x512xf32>
    %8 = arith.addf %5, %7 : vector<32x512xf32>
    %cst = arith.constant 0.000000e+00 : f32
    %9 = vector.broadcast %cst : f32 to vector<32x512xf32>
    %10 = arith.cmpf oge, %8, %9 : vector<32x512xf32>
    %cst_7 = arith.constant 0.00999999977 : f32
    %11 = vector.broadcast %cst_7 : f32 to vector<32x512xf32>
    %12 = arith.mulf %11, %8 : vector<32x512xf32>
    %13 = arith.select %10, %8, %12 : vector<32x512xi1>, vector<32x512xf32>
    %c0_8 = arith.constant 0 : index
    %c0_9 = arith.constant 0 : index
    %14 = vector.load %arg5[%c0_8, %c0_9] : memref<32x512xf32, #tpu.memory_space<vmem>>, vector<32x512xf32>
    tpu.vector_store %arg5[%c0_8, %c0_9], %13 {strides = array<i32>} : memref<32x512xf32, #tpu.memory_space<vmem>>, vector<32x512xf32>,
    return
  }
  func.func @transform_0(%arg0: i32) -> (i32, i32) {
    %c0_i32 = arith.constant 0 : i32
    %c0_i32_0 = arith.constant 0 : i32
    return %arg0, %c0_i32 : i32, i32
  }
  func.func @transform_1(%arg0: i32) -> (i32, i32) {
    %c0_i32 = arith.constant 0 : i32
    %c0_i32_0 = arith.constant 0 : i32
    return %arg0, %c0_i32 : i32, i32
  }
  func.func @transform_2(%arg0: i32) -> (i32, i32) {
    %c0_i32 = arith.constant 0 : i32
    %c0_i32_0 = arith.constant 0 : i32
    %c0_i32_1 = arith.constant 0 : i32
    return %c0_i32, %c0_i32_0 : i32, i32
  }
  func.func @transform_3(%arg0: i32) -> (i32, i32) {
    %c0_i32 = arith.constant 0 : i32
    %c0_i32_0 = arith.constant 0 : i32
    %c0_i32_1 = arith.constant 0 : i32
    return %c0_i32, %c0_i32_0 : i32, i32
  }
  func.func @transform_4(%arg0: i32) -> (i32, i32) {
    %c0_i32 = arith.constant 0 : i32
    %c0_i32_0 = arith.constant 0 : i32
    return %arg0, %c0_i32 : i32, i32
  }
}

</mosaic_0001>

<bundles_post_ra>
// kernel: tile.13
= control target key start
LH: loop header
LB: loop body
LE: loop exit
PB: predicated region body
PF: predicated region fallthrough
CT: control target
= control target key end

     0   :  { %s28_s0 = inlined_call_operand.vmem [shape: f32[32], index: 0, kind: input, shape index: {}]   ;;  %s29_s1 = inlined_call_operand.vmem [shape: f32[16,32], index: 1, kind: output, shape index: {}]  }
   0x1   :  { %v4_v0 = vld [vmem:[%s28_s0] ss:$0 sm:$0xff] }
   0x2   :  { %5 = vst [vmem:[%s29_s1] sm:$0xff] %v4_v0  ;;  %8 = vst [vmem:[%s29_s1 + $0x8] sm:$0xff] %v4_v0 }

// kernel: tile.14
= control target key start
LH: loop header
LB: loop body
LE: loop exit
PB: predicated region body
PF: predicated region fallthrough
CT: control target
= control target key end

     0   :  { %s57_s8 = smov 96   ;;  %vm3_vm0 = vcmask 261120   ;;  %s59_s15 = smov 64   ;;  %vm9_vm1 = vcmask 1048320   ;;  %vm15_vm2 = vcmask 785920   ;;  %vm21_vm3 = vcmask 523520   ;;  %s94_s0 = inlined_call_operand.vmem [shape: f32[16,32], index: 0, kind: input, shape index: {}]   ;;  %s95_s1 = inlined_call_operand.vmem [shape: f32[1,512], index: 1, kind: output, shape index: {}]  }
   0x1   :  { %v48_v0 = vld [vmem:[%s94_s0 + $0x3] ss:$4 sm:$0xf]   ;;  %v49_v1 = vld [vmem:[%s94_s0 + $0x2] ss:$4 sm:$0xf]  }
   0x2   :  { %7 = vrot.lane.b32.xlu0 %v48_v0, %s57_s8  ;;  %v50_v2 = vld [vmem:[%s94_s0 + $0x1] ss:$4 sm:$0xf]   ;;  %v2_v3 = vld [vmem:[%s94_s0] ss:$4 sm:$0xf]  }
   0x3   :  { %s58_s0 = smov 32   ;;  %4 = vst.msk [vmem:[#allocation0] ss:$8 sm:$0xf] %vm3_vm0, %v2_v3  }
   0x4   :  { %19 = vrot.lane.b32.xlu1 %v50_v2, %s58_s0 }
   0x6   :  { %13 = vrot.lane.b32.xlu0 %v49_v1, %s59_s15 }
  0x74   :  { %v8_v4 = vpop.permute.xlu0 %7  }
  0x75   :  { %10 = vst.msk [vmem:[#allocation0] ss:$8 sm:$0xf] %vm9_vm1, %v8_v4  }
  0x76   :  { %v20_v5 = vpop.permute.xlu1 %19  }
  0x78   :  { %v14_v6 = vpop.permute.xlu0 %13  }
  0x79   :  { %16 = vst.msk [vmem:[#allocation0] ss:$8 sm:$0xf] %vm15_vm2, %v14_v6  }
  0x7a   :  { %22 = vst.msk [vmem:[#allocation0] ss:$8 sm:$0xf] %vm21_vm3, %v20_v5  }
  0x81   :  { %v26_v7 = vld [vmem:[#allocation0] sm:$0x1]  ;;  %v30_v8 = vld [vmem:[#allocation0 + $0x8] sm:$0x1]  ;;  %v35_v9 = vld [vmem:[#allocation0 + $0x10] sm:$0x1] }
  0x82   :  { %28 = vst [vmem:[%s95_s1] sm:$0x1] %v26_v7  ;;  %51 = vst [vmem:[%s95_s1 + $0x1] sm:$0x1] %v30_v8  ;;  %v41_v10 = vld [vmem:[#allocation0 + $0x18] sm:$0x1] }
  0x83   :  { %52 = vst [vmem:[%s95_s1 + $0x2] sm:$0x1] %v35_v9  ;;  %53 = vst [vmem:[%s95_s1 + $0x3] sm:$0x1] %v41_v10 }

// kernel: bottleneck_forward.3
= control target key start
LH: loop header
LB: loop body
LE: loop exit
PB: predicated region body
PF: predicated region fallthrough
CT: control target
= control target key end

     0   :  { %v51_v0 = vlaneseq  ;;  %s434_s2 = inlined_call_operand.vmem [shape: f32[1,512], index: 2, kind: input, shape index: {}]   ;;  %s435_s3 = inlined_call_operand.vmem [shape: f32[1,512], index: 3, kind: input, shape index: {}]   ;;  %s436_s0 = inlined_call_operand.vmem [shape: f32[32,512], index: 0, kind: input, shape index: {}, may-alias: {0,4}]   ;;  %s437_s1 = inlined_call_operand.vmem [shape: f32[32,512], index: 1, kind: input, shape index: {}]   ;;  %s438_s4 = inlined_call_operand.vmem [shape: f32[32,512], index: 4, kind: output, shape index: {}, may-alias: {0,4}]  }
   0x1   :  { %v49_v2 = vld [vmem:[%s434_s2] sm:$0xf]  ;;  %v18_v10 = vld [vmem:[%s437_s1 + $0x8] sm:$0xff]  ;;  %v19_v18 = vld [vmem:[%s437_s1 + $0x10] sm:$0xff] }
   0x2   :  { %v52_v1 = vshrl.u32 %v51_v0, 7  ;;  %v103_v3 = vld [vmem:[%s435_s3] sm:$0xf]  ;;  %v34_v11 = vld [vmem:[%s436_s0 + $0x8] sm:$0xff]  ;;  %v35_v19 = vld [vmem:[%s436_s0 + $0x10] sm:$0xff] }
   0x3   :  { %v33_v4 = vld [vmem:[%s436_s0] sm:$0xff]  ;;  %v38_v13 = vld [vmem:[%s436_s0 + $0x28] sm:$0xff]  ;;  %v36_v20 = vld [vmem:[%s436_s0 + $0x18] sm:$0xff] }
   0x4   :  { %v53_v5 = vsub.s32 0, %v52_v1  ;;  %v57_v6 = vsub.s32 1, %v52_v1  ;;  %v61_v7 = vsub.s32 2, %v52_v1  ;;  %v65_v8 = vsub.s32 3, %v52_v1  ;;  %v17_v9 = vld [vmem:[%s437_s1] sm:$0xff]  ;;  %v39_v21 = vld [vmem:[%s436_s0 + $0x30] sm:$0xff] }
   0x5   :  { %v37_v12 = vld [vmem:[%s436_s0 + $0x20] sm:$0xff]  ;;  %v22_v27 = vld [vmem:[%s437_s1 + $0x28] sm:$0xff]  ;;  %v40_v28 = vld [vmem:[%s436_s0 + $0x38] sm:$0xff] }
   0x6   :  { %v258_v14 = vrot.slane %v49_v2, %v53_v5  ;;  %v260_v15 = vrot.slane %v103_v3, %v53_v5  ;;  %v262_v16 = vrot.slane %v49_v2, %v57_v6  ;;  %v264_v17 = vrot.slane %v103_v3, %v57_v6  ;;  %v21_v26 = vld [vmem:[%s437_s1 + $0x20] sm:$0xff]  ;;  %v20_v31 = vld [vmem:[%s437_s1 + $0x18] sm:$0xff]  ;;  %v23_v34 = vld [vmem:[%s437_s1 + $0x30] sm:$0xff] }
   0x7   :  { %v278_v22 = vrot.slane %v49_v2, %v61_v7  ;;  %v280_v23 = vrot.slane %v103_v3, %v61_v7  ;;  %v282_v24 = vrot.slane %v49_v2, %v65_v8  ;;  %v284_v25 = vrot.slane %v103_v3, %v65_v8  ;;  %v24_v35 = vld [vmem:[%s437_s1 + $0x38] sm:$0xff]  ;;  %v25_v63 = vld [vmem:[%s437_s1 + $0x40] sm:$0xff]  ;;  %v26_v1 = vld [vmem:[%s437_s1 + $0x48] sm:$0xff] }
   0x8   :  { %v71_v29 = vmul.f32 %v258_v14, %v33_v4  ;;  %v72_v30 = vmul.f32 %v262_v16, %v34_v11  ;;  %v75_v32 = vmul.f32 %v258_v14, %v37_v12  ;;  %v76_v33 = vmul.f32 %v262_v16, %v38_v13  ;;  %v41_v0 = vld [vmem:[%s436_s0 + $0x40] sm:$0xff]  ;;  %v42_v2 = vld [vmem:[%s436_s0 + $0x48] sm:$0xff]  ;;  %v27_v11 = vld [vmem:[%s437_s1 + $0x50] sm:$0xff] }
   0x9   :  { %v73_v36 = vmul.f32 %v278_v22, %v35_v19  ;;  %v74_v37 = vmul.f32 %v282_v24, %v36_v20  ;;  %v77_v38 = vmul.f32 %v278_v22, %v39_v21  ;;  %v78_v39 = vmul.f32 %v282_v24, %v40_v28  ;;  %v28_v21 = vld [vmem:[%s437_s1 + $0x58] sm:$0xff] }
   0xa   :  { %v87_v40 = vadd.f32 %v71_v29, %v17_v9  ;;  %v88_v41 = vadd.f32 %v72_v30, %v18_v10  ;;  %v91_v42 = vadd.f32 %v75_v32, %v21_v26  ;;  %v92_v43 = vadd.f32 %v76_v33, %v22_v27  ;;  %v29_v26 = vld [vmem:[%s437_s1 + $0x60] sm:$0xff]  ;;  %v30_v32 = vld [vmem:[%s437_s1 + $0x68] sm:$0xff] }
   0xb   :  { %v89_v44 = vadd.f32 %v73_v36, %v19_v18  ;;  %v90_v45 = vadd.f32 %v74_v37, %v20_v31  ;;  %v93_v46 = vadd.f32 %v77_v38, %v23_v34  ;;  %v94_v47 = vadd.f32 %v78_v39, %v24_v35 }
   0xc   :  { %v125_v48 = vadd.f32 %v260_v15, %v87_v40  ;;  %v126_v49 = vadd.f32 %v264_v17, %v88_v41  ;;  %v129_v50 = vadd.f32 %v260_v15, %v91_v42  ;;  %v130_v51 = vadd.f32 %v264_v17, %v92_v43 }
   0xd   :  { %v127_v52 = vadd.f32 %v280_v23, %v89_v44  ;;  %v128_v53 = vadd.f32 %v284_v25, %v90_v45  ;;  %v131_v54 = vadd.f32 %v280_v23, %v93_v46  ;;  %v132_v55 = vadd.f32 %v284_v25, %v94_v47 }
   0xe   :  { %vm141_vm0 = vcmp.ge.f32.partialorder %v125_v48, 0.0  ;;  %v157_v56 = vmul.f32 0.01, %v125_v48  ;;  %vm142_vm1 = vcmp.ge.f32.partialorder %v126_v49, 0.0  ;;  %v158_v57 = vmul.f32 0.01, %v126_v49 }
   0xf   :  { %vm143_vm2 = vcmp.ge.f32.partialorder %v127_v52, 0.0  ;;  %v159_v58 = vmul.f32 0.01, %v127_v52  ;;  %vm144_vm3 = vcmp.ge.f32.partialorder %v128_v53, 0.0  ;;  %v160_v59 = vmul.f32 0.01, %v128_v53 }
  0x10   :  { %v173_v60 = vsel %vm141_vm0, %v125_v48, %v157_v56  ;;  %v174_v61 = vsel %vm142_vm1, %v126_v49, %v158_v57  ;;  %vm145_vm4 = vcmp.ge.f32.partialorder %v129_v50, 0.0  ;;  %v161_v62 = vmul.f32 0.01, %v129_v50  ;;  %v32_v49 = vld [vmem:[%s437_s1 + $0x78] sm:$0xff] }
  0x11   :  { %189 = vst [vmem:[%s438_s4] sm:$0xff] %v173_v60  ;;  %190 = vst [vmem:[%s438_s4 + $0x8] sm:$0xff] %v174_v61  ;;  %v175_v3 = vsel %vm143_vm2, %v127_v52, %v159_v58  ;;  %v176_v4 = vsel %vm144_vm3, %v128_v53, %v160_v59  ;;  %vm146_vm5 = vcmp.ge.f32.partialorder %v130_v51, 0.0  ;;  %v162_v5 = vmul.f32 0.01, %v130_v51 }
  0x12   :  { %v177_v9 = vsel %vm145_vm4, %v129_v50, %v161_v62  ;;  %vm147_vm6 = vcmp.ge.f32.partialorder %v131_v54, 0.0  ;;  %v163_v10 = vmul.f32 0.01, %v131_v54  ;;  %vm148_vm7 = vcmp.ge.f32.partialorder %v132_v55, 0.0 }
  0x13   :  { %v178_v13 = vsel %vm146_vm5, %v130_v51, %v162_v5  ;;  %v164_v18 = vmul.f32 0.01, %v132_v55  ;;  %v79_v19 = vmul.f32 %v258_v14, %v41_v0  ;;  %v80_v20 = vmul.f32 %v262_v16, %v42_v2 }
  0x14   :  { %v179_v28 = vsel %vm147_vm6, %v131_v54, %v163_v10 }
  0x15   :  { %v180_v34 = vsel %vm148_vm7, %v132_v55, %v164_v18  ;;  %v95_v35 = vadd.f32 %v79_v19, %v25_v63  ;;  %v96_v36 = vadd.f32 %v80_v20, %v26_v1 }
  0x17   :  { %v133_v42 = vadd.f32 %v260_v15, %v95_v35  ;;  %v134_v43 = vadd.f32 %v264_v17, %v96_v36 }
  0x18   :  { %v43_v6 = vld [vmem:[%s436_s0 + $0x50] sm:$0xff]  ;;  %v44_v7 = vld [vmem:[%s436_s0 + $0x58] sm:$0xff]  ;;  %v45_v8 = vld [vmem:[%s436_s0 + $0x60] sm:$0xff] }
  0x19   :  { %191 = vst [vmem:[%s438_s4 + $0x10] sm:$0xff] %v175_v3  ;;  %192 = vst [vmem:[%s438_s4 + $0x18] sm:$0xff] %v176_v4  ;;  %v81_v29 = vmul.f32 %v278_v22, %v43_v6  ;;  %v82_v30 = vmul.f32 %v282_v24, %v44_v7  ;;  %v83_v31 = vmul.f32 %v258_v14, %v45_v8  ;;  %v31_v14 = vld [vmem:[%s437_s1 + $0x70] sm:$0xff]  ;;  %vm149_vm8 = vcmp.ge.f32.partialorder %v133_v42, 0.0 }
  0x1a   :  { %vm150_vm9 = vcmp.ge.f32.partialorder %v134_v43, 0.0  ;;  %v166_v50 = vmul.f32 0.01, %v134_v43 }
  0x1b   :  { %v97_v38 = vadd.f32 %v81_v29, %v27_v11  ;;  %v98_v39 = vadd.f32 %v82_v30, %v28_v21  ;;  %v99_v40 = vadd.f32 %v83_v31, %v29_v26 }
  0x1c   :  { %v182_v53 = vsel %vm150_vm9, %v134_v43, %v166_v50 }
  0x1d   :  { %v135_v45 = vadd.f32 %v280_v23, %v97_v38  ;;  %v136_v46 = vadd.f32 %v284_v25, %v98_v39  ;;  %v137_v47 = vadd.f32 %v260_v15, %v99_v40 }
  0x1f   :  { %vm151_vm10 = vcmp.ge.f32.partialorder %v135_v45, 0.0  ;;  %v167_v51 = vmul.f32 0.01, %v135_v45  ;;  %vm152_vm11 = vcmp.ge.f32.partialorder %v136_v46, 0.0  ;;  %v168_v52 = vmul.f32 0.01, %v136_v46 }
  0x20   :  { %v46_v12 = vld [vmem:[%s436_s0 + $0x68] sm:$0xff]  ;;  %vm153_vm12 = vcmp.ge.f32.partialorder %v137_v47, 0.0  ;;  %v169_v54 = vmul.f32 0.01, %v137_v47 }
  0x21   :  { %193 = vst [vmem:[%s438_s4 + $0x20] sm:$0xff] %v177_v9  ;;  %v84_v37 = vmul.f32 %v262_v16, %v46_v12  ;;  %v183_v15 = vsel %vm151_vm10, %v135_v45, %v167_v51  ;;  %v184_v55 = vsel %vm152_vm11, %v136_v46, %v168_v52 }
  0x22   :  { %v185_v58 = vsel %vm153_vm12, %v137_v47, %v169_v54 }
  0x23   :  { %v100_v44 = vadd.f32 %v84_v37, %v30_v32 }
  0x25   :  { %v138_v56 = vadd.f32 %v264_v17, %v100_v44 }
  0x27   :  { %vm154_vm13 = vcmp.ge.f32.partialorder %v138_v56, 0.0  ;;  %v170_v60 = vmul.f32 0.01, %v138_v56 }
  0x28   :  { %v47_v27 = vld [vmem:[%s436_s0 + $0x70] sm:$0xff] }
  0x29   :  { %194 = vst [vmem:[%s438_s4 + $0x28] sm:$0xff] %v178_v13  ;;  %v85_v41 = vmul.f32 %v278_v22, %v47_v27  ;;  %v165_v22 = vmul.f32 0.01, %v133_v42  ;;  %v186_v61 = vsel %vm154_vm13, %v138_v56, %v170_v60 }
  0x2b   :  { %v101_v48 = vadd.f32 %v85_v41, %v31_v14 }
  0x2d   :  { %v139_v57 = vadd.f32 %v280_v23, %v101_v48 }
  0x2f   :  { %vm155_vm14 = vcmp.ge.f32.partialorder %v139_v57, 0.0  ;;  %v171_v17 = vmul.f32 0.01, %v139_v57 }
  0x30   :  { %v48_v33 = vld [vmem:[%s436_s0 + $0x78] sm:$0xff] }
  0x31   :  { %195 = vst [vmem:[%s438_s4 + $0x30] sm:$0xff] %v179_v28  ;;  %196 = vst [vmem:[%s438_s4 + $0x38] sm:$0xff] %v180_v34  ;;  %v86_v16 = vmul.f32 %v282_v24, %v48_v33  ;;  %v181_v24 = vsel %vm149_vm8, %v133_v42, %v165_v22  ;;  %v187_v62 = vsel %vm155_vm14, %v139_v57, %v171_v17 }
  0x32   :  { %197 = vst [vmem:[%s438_s4 + $0x40] sm:$0xff] %v181_v24  ;;  %198 = vst [vmem:[%s438_s4 + $0x48] sm:$0xff] %v182_v53 }
  0x33   :  { %199 = vst [vmem:[%s438_s4 + $0x50] sm:$0xff] %v183_v15  ;;  %200 = vst [vmem:[%s438_s4 + $0x58] sm:$0xff] %v184_v55  ;;  %v102_v59 = vadd.f32 %v86_v16, %v32_v49 }
  0x34   :  { %201 = vst [vmem:[%s438_s4 + $0x60] sm:$0xff] %v185_v58  ;;  %202 = vst [vmem:[%s438_s4 + $0x68] sm:$0xff] %v186_v61 }
  0x35   :  { %v140_v23 = vadd.f32 %v284_v25, %v102_v59  ;;  %203 = vst [vmem:[%s438_s4 + $0x70] sm:$0xff] %v187_v62 }
  0x37   :  { %vm156_vm15 = vcmp.ge.f32.partialorder %v140_v23, 0.0  ;;  %v172_v63 = vmul.f32 0.01, %v140_v23 }
  0x39   :  { %v188_v0 = vsel %vm156_vm15, %v140_v23, %v172_v63 }
  0x3a   :  { %204 = vst [vmem:[%s438_s4 + $0x78] sm:$0xff] %v188_v0 }

// kernel: bottleneck_forward.2
= control target key start
LH: loop header
LB: loop body
LE: loop exit
PB: predicated region body
PF: predicated region fallthrough
CT: control target
= control target key end

     0   :  { %14 = vsyncpa [#allocation4], 0  ;;  %s5725_s0 = inlined_call_operand.hbm [shape: f32[2,256,32], index: 0, kind: input, shape index: {}]   ;;  %s5726_s1 = inlined_call_operand.vmem [shape: f32[32,8], index: 1, kind: input, shape index: {}]   ;;  %s5727_s2 = inlined_call_operand.vmem [shape: f32[1,8], index: 2, kind: input, shape index: {}]   ;;  %s5728_s3 = inlined_call_operand.vmem [shape: f32[72,8], index: 3, kind: input, shape index: {}]   ;;  %s5729_s4 = inlined_call_operand.vmem [shape: f32[1,8], index: 4, kind: input, shape index: {}]   ;;  %s5730_s5 = inlined_call_operand.vmem [shape: f32[8,32], index: 5, kind: input, shape index: {}]   ;;  %s5731_s6 = inlined_call_operand.vmem [shape: f32[1,32], index: 6, kind: input, shape index: {}]   ;;  %s5732_s7 = inlined_call_operand.vmem [shape: f32[2,256,32], index: 7, kind: output, shape index: {0}]   ;;  %s5733_s8 = inlined_call_operand.vmem [shape: f32[2,2,32], index: 8, kind: output, shape index: {1}]  }
   0x1   :  { %16 = vsyncpa [#allocation4 + $0x1], 0  ;;  %s4119_s27 = smov 0   ;;  %s4121_s28 = smov 0  }
   0x2   :  { %s4123_s29 = smov 0   ;;  %s4125_s30 = smov 0  }
   0x3 LB: > { %s4138_s9 = sadd.s32 4294967295, %s4060_s30   ;;  %s4141_s10 = sadd.s32 1, %s4060_s30   ;;  %s4060_s30 = sphi %s4125_s30, %s5740_s30   ;;  %s4056_s29 = sphi %s4123_s29, %s5739_s29   ;;  %s4052_s28 = sphi %s4121_s28, %s5738_s28   ;;  %s4048_s27 = sphi %s4119_s27, %s5737_s27  }
   0x4   : > { %s26_s11 = ssub.s32 %s4060_s30, %s4141_s10  ;;  %s29_s12 = sadd.s32 1, %s4056_s29 }
   0x5   : > { %p27_p0 = scmp.eq.s32.totalorder %s26_s11, 0  ;;  %p36_p1 = scmp.ne.s32.totalorder %s4056_s29, %s4052_s28 }
   0x6   : > { %p37_p2 = scmp.eq.s32.totalorder %s4060_s30, 0  ;;  %p42_p3 = scmp.ne.s32.totalorder %s4052_s28, %s4048_s27 }
   0x7   : > { %s4151_s13 = scalar_select %p27_p0, %s4056_s29, %s29_s12  }
   0x8   : > { %p38_p4 = por %p37_p2, %p36_p1  ;;  %p43_p5 = scmp.eq.s32.totalorder %s4138_s9, 0 }
   0x9   : > { %p3949_p6 = scmp.lt.s32.totalorder %s4060_s30, 2  ;;  %s262_s15 = sand.u32 1, %s4056_s29  }
   0xa   : > { %p4155_p7 = por %p43_p5, %p42_p3  ;;  %s3522_s16 = sshll.u32 %s262_s15, 8 }
   0xb   : > { %s3631_s17 = sshll.u32 %s4060_s30, 12  ;;  %s266_s21 = scalar_lea.vmem [#allocation3], %s3522_s16 }
   0xc   : > { %s4164_s20 = scalar_lea.hbm %s5725_s0, %s3631_s17  ;;  %s273_s22 = sshll.u32 %s266_s21, 4  ;;  %s4166_s22 = int_to_ptr.vmem [resolvable:$true] %s273_s22 }
   0xd   : > { %p4168_p8 = pnand %p3949_p6, %p38_p4  ;;  %s4173_s24 = scalar_lea.sflag [#allocation4], %s262_s15 }
   0xe   : > { %s3996_s25 = scalar_lea.hbm %s4164_s20, 4096  ;;  %s4001_s11 = scalar_lea.hbm %s5725_s0, 8192 }
   0xf   : > { %p3997_p10 = scmp.ne.s32.totalorder %s4164_s20, %s3996_s25  ;;  %p3998_p11 = pneg %p4168_p8 }
  0x10   : > { %p4002_p0 = scmp.lt.u32.totalorder %s4164_s20, %s5725_s0  ;;  %p4003_p1 = scmp.lt.u32.totalorder %s4001_s11, %s3996_s25 }
  0x11   : > { %p3999_p12 = pnand %p3998_p11, %p3997_p10  ;;  %p4005_p3 = scmp.lt.u32.totalorder %s3996_s25, %s4164_s20 }
  0x12   : > { %p4004_p2 = por %p4003_p1, %p4002_p0 }
  0x13   : > { %p4000_p13 = pneg %p3999_p12 }
  0x14   : > { %p4006_p4 = por %p4005_p3, %p4004_p2 }
  0x16   : > { %p4007_p5 = pnand %p4006_p4, %p4000_p13 }
  0x18   : > { %4010 = shalt.err (!%p4007_p5)
}
  0x19   : > { %s4011_s15 = scalar_lea.vmem %s4166_s22, 4096  ;;  %s4062_s17 = smov [#allocation3]  }
  0x1a   : > { %p4012_p6 = scmp.ne.s32.totalorder %s4166_s22, %s4011_s15  ;;  %s4016_s18 = sshll.u32 %s4062_s17, 4  ;;  %s4017_s18 = int_to_ptr.vmem [resolvable:$false] %s4016_s18 }
  0x1b   : > { %s4018_s19 = scalar_lea.vmem %s4017_s18, 8192  ;;  %p4019_p9 = scmp.lt.s32.totalorder %s4166_s22, %s4017_s18 }
  0x1c   : > { %p4014_p10 = pnand %p4012_p6, %p3998_p11  ;;  %p4020_p0 = scmp.lt.s32.totalorder %s4018_s19, %s4011_s15 }
  0x1e   : > { %p4015_p12 = pneg %p4014_p10  ;;  %p4021_p1 = por %p4020_p0, %p4019_p9 }
  0x20   : > { %p4022_p2 = pnand %p4021_p1, %p4015_p12 }
  0x22   : > { %4025 = shalt.err (!%p4022_p2)
}
  0x23   : > { %s4063_s21 = smov 128   ;;  %s4064_s25 = smov 8  }
  0x24   : > { %3948 = dma.hbm_to_vmem [thread:$0]  (!%p4168_p8), %s4164_s20, 4096, %s4166_s22, %s4173_s24, %s4063_s21, %s4063_s21, %s4064_s25  }
  0x25   : > { %p281_p11 = scmp.lt.s32.totalorder %s4060_s30, 3  ;;  %p5736_p13 = scmp.ge.s32.totalorder %s4060_s30, 1 }
  0x27   : > { %p282_p3 = pnand %p5736_p13, %p281_p11 }
  0x28   : > { %s287_s26 = sand.u32 (!%p282_p3), 1, %s4052_s28  }
  0x29   : > { %285 = sbr.rel (%p282_p3) target bundleno = 1359 (0x54f), region = 48  ;;  %s3526_s27 = sshll.u32 (!%p282_p3), %s287_s26, 8 }
  0x2a   : > { %s288_s11 = scalar_lea.sflag (!%p282_p3), [#allocation4], %s287_s26  ;;  %s4205_s12 = scalar_lea.vmem (!%p282_p3), [#allocation3], %s3526_s27 }
  0x30   : > { %4043 = dma.done.wait (%p4155_p7), %s288_s11, 4096  }
  0x31   : > { %4045 = vsyncadd (%p4155_p7), %s288_s11, 4294963200  ;;  %vm380_vm0 = vcmask 261120   ;;  %v369_v0 = vld [vmem:[%s5726_s1] sm:$0xff]  ;;  %v370_v1 = vld [vmem:[%s5726_s1 + $0x8] sm:$0xff]  ;;  %vm798_vm1 = vcmask 64512   ;;  %v4065_v22 = vmov 0.0  }
  0x32   : > { %v371_v2 = vld [vmem:[%s5726_s1 + $0x10] sm:$0xff]  ;;  %v3915_v3 = vpack.c.bf16 %v370_v1, %v369_v0  ;;  %v372_v4 = vld [vmem:[%s5726_s1 + $0x18] sm:$0xff]  ;;  %v339_v10 = vld [vmem:[%s4205_s12 + $0x10] sm:$0xff]  ;;  %799 = vst.msk [vmem:[#allocation2] sm:$0xff] %vm798_vm1, %v4065_v22  ;;  %vm801_vm2 = vcmask 58368   ;;  %vm807_vm3 = vcmask 57344  }
  0x33   : > { %v337_v5 = vld [vmem:[%s4205_s12] sm:$0xff]  ;;  %v3919_v7 = vpack.c.bf16 %v372_v4, %v371_v2  ;;  %v338_v8 = vld [vmem:[%s4205_s12 + $0x8] sm:$0xff]  ;;  %v340_v11 = vld [vmem:[%s4205_s12 + $0x18] sm:$0xff]  ;;  %800 = vst.msk [vmem:[#allocation2 + $0x8] sm:$0xff] %vm798_vm1, %v4065_v22  ;;  %s4066_s17 = smov 16   ;;  %s4067_s18 = smov 8  }
  0x34   : > { %v353_v6 = vld [vmem:[%s4205_s12 + $0x80] sm:$0xff]  ;;  %3751 = vmatprep.mubr.msk.f32.mxu0 %vm380_vm0, %v337_v5  ;;  %3916 = vmatprep.subr.bf16.mxu0 %v3915_v3  ;;  %v354_v9 = vld [vmem:[%s4205_s12 + $0x88] sm:$0xff]  ;;  %v343_v14 = vld [vmem:[%s4205_s12 + $0x30] sm:$0xff]  ;;  %804 = vst.msk [vmem:[#allocation2 + $0x198] sm:$0xff] %vm798_vm1, %v4065_v22  ;;  %s4068_s25 = smov 32   ;;  %s4069_s26 = smov 64  }
  0x35   : > { %3775 = vmatprep.mubr.msk.f32.mxu1 %vm380_vm0, %v353_v6  ;;  %3939 = vmatprep.subr.bf16.mxu1 %v3915_v3  ;;  %v341_v12 = vld [vmem:[%s4205_s12 + $0x20] sm:$0xff]  ;;  %v342_v13 = vld [vmem:[%s4205_s12 + $0x28] sm:$0xff]  ;;  %v344_v15 = vld [vmem:[%s4205_s12 + $0x38] sm:$0xff]  ;;  %805 = vst.msk [vmem:[#allocation2 + $0x1a0] sm:$0xff] %vm798_vm1, %v4065_v22  ;;  %s4070_s27 = smov 40   ;;  %s4071_s11 = smov 24  }
  0x36   : > { %3918 = vmatpush3.bf16.msra.mxu0 %v3915_v3  ;;  %3941 = vmatpush3.bf16.msra.mxu1 %v3915_v3  ;;  %v345_v16 = vld [vmem:[%s4205_s12 + $0x40] sm:$0xff]  ;;  %v346_v17 = vld [vmem:[%s4205_s12 + $0x48] sm:$0xff]  ;;  %v347_v18 = vld [vmem:[%s4205_s12 + $0x50] sm:$0xff]  ;;  %802 = vst.msk [vmem:[#allocation2 + $0x10] sm:$0x3] %vm801_vm2, %v4065_v22  ;;  %s4072_s20 = smov 56  }
  0x37   : > { %3920 = vmatprep.subr.bf16.mxu0 %v3919_v7  ;;  %3940 = vmatprep.subr.bf16.mxu1 %v3919_v7  ;;  %v348_v19 = vld [vmem:[%s4205_s12 + $0x58] sm:$0xff]  ;;  %v349_v20 = vld [vmem:[%s4205_s12 + $0x60] sm:$0xff]  ;;  %v350_v21 = vld [vmem:[%s4205_s12 + $0x68] sm:$0xff]  ;;  %806 = vst.msk [vmem:[#allocation2 + $0x1a8] sm:$0x3] %vm801_vm2, %v4065_v22  ;;  %s4073_s22 = smov 48  }
  0x38   : > { %826 = vst.msk [vmem:[#allocation2 + $0x11] sm:$0x1] %vm807_vm3, %v4065_v22  ;;  %808 = vst.msk [vmem:[#allocation2] sm:$0x1] %vm807_vm3, %v4065_v22  ;;  %v351_v27 = vld [vmem:[%s4205_s12 + $0x70] sm:$0xff]  ;;  %v352_v28 = vld [vmem:[%s4205_s12 + $0x78] sm:$0xff] }
  0x39   : > { %809 = vst.msk [vmem:[#allocation2 + $0x18] sm:$0x1] %vm807_vm3, %v4065_v22  ;;  %810 = vst.msk [vmem:[#allocation2 + $0x30] sm:$0x1] %vm807_vm3, %v4065_v22  ;;  %v355_v29 = vld [vmem:[%s4205_s12 + $0x90] sm:$0xff]  ;;  %v356_v30 = vld [vmem:[%s4205_s12 + $0x98] sm:$0xff] }
  0x3a   : > { %3922 = vmatpush3.bf16.msra.mxu0 %v3919_v7  ;;  %3942 = vmatpush3.bf16.msra.mxu1 %v3919_v7  ;;  %811 = vst.msk [vmem:[#allocation2 + $0x48] sm:$0x1] %vm807_vm3, %v4065_v22  ;;  %812 = vst.msk [vmem:[#allocation2 + $0x60] sm:$0x1] %vm807_vm3, %v4065_v22  ;;  %v941_v23 = vld [vmem:[#allocation2 + $0x2] sm:$0xff]  ;;  %v357_v31 = vld [vmem:[%s4205_s12 + $0xa0] sm:$0xff] }
  0x3b   : > { %813 = vst.msk [vmem:[#allocation2 + $0x78] sm:$0x1] %vm807_vm3, %v4065_v22  ;;  %814 = vst.msk [vmem:[#allocation2 + $0x90] sm:$0x1] %vm807_vm3, %v4065_v22  ;;  %v909_v24 = vld [vmem:[#allocation2 + $0x1] sm:$0xff]  ;;  %1326 = vrot.lane.b32.xlu1 %v941_v23, %s4066_s17  ;;  %v358_v32 = vld [vmem:[%s4205_s12 + $0xa8] sm:$0xff] }
  0x3c   : > { %815 = vst.msk [vmem:[#allocation2 + $0xa8] sm:$0x1] %vm807_vm3, %v4065_v22  ;;  %816 = vst.msk [vmem:[#allocation2 + $0xc0] sm:$0x1] %vm807_vm3, %v4065_v22  ;;  %1198 = vrot.lane.b32.xlu0 %v909_v24, %s4067_s18  ;;  %v359_v33 = vld [vmem:[%s4205_s12 + $0xb0] sm:$0xff]  ;;  %v360_v34 = vld [vmem:[%s4205_s12 + $0xb8] sm:$0xff] }
  0x3d   : > { %3752 = vmatmul.mubr.msk.f32.vlgmr.msra.gmra.mrb[0].mxu0 %vm380_vm0, %v338_v8  ;;  %3776 = vmatmul.mubr.msk.f32.vlgmr.msra.gmra.mrb[0].mxu1 %vm380_vm0, %v354_v9  ;;  %817 = vst.msk [vmem:[#allocation2 + $0xd8] sm:$0x1] %vm807_vm3, %v4065_v22  ;;  %818 = vst.msk [vmem:[#allocation2 + $0xf0] sm:$0x1] %vm807_vm3, %v4065_v22  ;;  %v910_v25 = vld [vmem:[#allocation2 + $0x9] sm:$0xff]  ;;  %p328_p7 = scmp.lt.s32.totalorder %s4138_s9, 1 }
  0x3e   : > { %3754 = vmatprep.mubr.msk.f32.mxu0 %vm380_vm0, %v339_v10  ;;  %819 = vst.msk [vmem:[#allocation2 + $0x108] sm:$0x1] %vm807_vm3, %v4065_v22  ;;  %820 = vst.msk [vmem:[#allocation2 + $0x120] sm:$0x1] %vm807_vm3, %v4065_v22  ;;  %3778 = vmatprep.mubr.msk.f32.mxu1 %vm380_vm0, %v355_v29  ;;  %v4318_v35 = vld [vmem:[%s5727_s2] ss:$0 sm:$0xff] }
  0x3f   : > { %821 = vst.msk [vmem:[#allocation2 + $0x138] sm:$0x1] %vm807_vm3, %v4065_v22  ;;  %822 = vst.msk [vmem:[#allocation2 + $0x150] sm:$0x1] %vm807_vm3, %v4065_v22  ;;  %v942_v26 = vld [vmem:[#allocation2 + $0xa] sm:$0xff]  ;;  %s5742_s9 = smov (!%p328_p7, %s4138_s9), 1 }
  0x40   : > { %823 = vst.msk [vmem:[#allocation2 + $0x168] sm:$0x1] %vm807_vm3, %v4065_v22  ;;  %824 = vst.msk [vmem:[#allocation2 + $0x180] sm:$0x1] %vm807_vm3, %v4065_v22  ;;  %1328 = vrot.lane.b32.xlu1 %v942_v26, %s4066_s17  ;;  %1200 = vrot.lane.b32.xlu0 %v910_v25, %s4067_s18  ;;  %v361_v26 = vld [vmem:[%s4205_s12 + $0xc0] sm:$0xff]  ;;  %s3529_s21 = sshll.u32 %s5742_s9, 1 }
  0x41   : > { %3755 = vmatmul.mubr.msk.f32.gmra.mrb[2].mxu0 %vm380_vm0, %v340_v11  ;;  %825 = vst.msk [vmem:[#allocation2 + $0x198] sm:$0x1] %vm807_vm3, %v4065_v22  ;;  %827 = vst.msk [vmem:[#allocation2 + $0x29] sm:$0x1] %vm807_vm3, %v4065_v22  ;;  %3779 = vmatmul.mubr.msk.f32.gmra.mrb[2].mxu1 %vm380_vm0, %v356_v30 }
  0x42   : > { %3757 = vmatprep.mubr.msk.f32.mxu0 %vm380_vm0, %v341_v12  ;;  %828 = vst.msk [vmem:[#allocation2 + $0x41] sm:$0x1] %vm807_vm3, %v4065_v22  ;;  %829 = vst.msk [vmem:[#allocation2 + $0x59] sm:$0x1] %vm807_vm3, %v4065_v22  ;;  %3781 = vmatprep.mubr.msk.f32.mxu1 %vm380_vm0, %v357_v31 }
  0x43   : > { %830 = vst.msk [vmem:[#allocation2 + $0x71] sm:$0x1] %vm807_vm3, %v4065_v22  ;;  %831 = vst.msk [vmem:[#allocation2 + $0x89] sm:$0x1] %vm807_vm3, %v4065_v22 }
  0x44   : > { %832 = vst.msk [vmem:[#allocation2 + $0xa1] sm:$0x1] %vm807_vm3, %v4065_v22  ;;  %833 = vst.msk [vmem:[#allocation2 + $0xb9] sm:$0x1] %vm807_vm3, %v4065_v22 }
  0x45   : > { %3758 = vmatmul.mubr.msk.f32.gmra.mrb[4].mxu0 %vm380_vm0, %v342_v13  ;;  %834 = vst.msk [vmem:[#allocation2 + $0xd1] sm:$0x1] %vm807_vm3, %v4065_v22  ;;  %835 = vst.msk [vmem:[#allocation2 + $0xe9] sm:$0x1] %vm807_vm3, %v4065_v22  ;;  %3782 = vmatmul.mubr.msk.f32.gmra.mrb[4].mxu1 %vm380_vm0, %v358_v32 }
  0x46   : > { %3760 = vmatprep.mubr.msk.f32.mxu0 %vm380_vm0, %v343_v14  ;;  %836 = vst.msk [vmem:[#allocation2 + $0x101] sm:$0x1] %vm807_vm3, %v4065_v22  ;;  %837 = vst.msk [vmem:[#allocation2 + $0x119] sm:$0x1] %vm807_vm3, %v4065_v22  ;;  %3784 = vmatprep.mubr.msk.f32.mxu1 %vm380_vm0, %v359_v33 }
  0x47   : > { %838 = vst.msk [vmem:[#allocation2 + $0x131] sm:$0x1] %vm807_vm3, %v4065_v22  ;;  %839 = vst.msk [vmem:[#allocation2 + $0x149] sm:$0x1] %vm807_vm3, %v4065_v22 }
  0x48   : > { %840 = vst.msk [vmem:[#allocation2 + $0x161] sm:$0x1] %vm807_vm3, %v4065_v22  ;;  %841 = vst.msk [vmem:[#allocation2 + $0x179] sm:$0x1] %vm807_vm3, %v4065_v22 }
  0x49   : > { %3761 = vmatmul.mubr.msk.f32.gmra.mrb[6].mxu0 %vm380_vm0, %v344_v15  ;;  %842 = vst.msk [vmem:[#allocation2 + $0x191] sm:$0x1] %vm807_vm3, %v4065_v22  ;;  %843 = vst.msk [vmem:[#allocation2 + $0x1a9] sm:$0x1] %vm807_vm3, %v4065_v22  ;;  %3785 = vmatmul.mubr.msk.f32.gmra.mrb[6].mxu1 %vm380_vm0, %v360_v34 }
  0x4a   : > { %3763 = vmatprep.mubr.msk.f32.mxu0 %vm380_vm0, %v345_v16  ;;  %3787 = vmatprep.mubr.msk.f32.mxu1 %vm380_vm0, %v361_v26 }
  0x4d   : > { %3764 = vmatmul.mubr.msk.f32.gmra.mrb[8].mxu0 %vm380_vm0, %v346_v17 }
  0x4e   : > { %3766 = vmatprep.mubr.msk.f32.mxu0 %vm380_vm0, %v347_v18 }
  0x51   : > { %3767 = vmatmul.mubr.msk.f32.gmra.mrb[10].mxu0 %vm380_vm0, %v348_v19 }
  0x52   : > { %3769 = vmatprep.mubr.msk.f32.mxu0 %vm380_vm0, %v349_v20 }
  0x55   : > { %3770 = vmatmul.mubr.msk.f32.gmra.mrb[12].mxu0 %vm380_vm0, %v350_v21 }
  0x56   : > { %3772 = vmatprep.mubr.msk.f32.mxu0 %vm380_vm0, %v351_v27  ;;  %v362_v27 = vld [vmem:[%s4205_s12 + $0xc8] sm:$0xff] }
  0x57   : > { %3788 = vmatmul.mubr.msk.f32.gmra.mrb[8].mxu1 %vm380_vm0, %v362_v27 }
  0x59   : > { %3773 = vmatmul.mubr.msk.f32.gmra.mrb[14].mxu0 %vm380_vm0, %v352_v28 }
  0xad   : > { %v4473_v27 = vpop.permute.xlu1 %1326 }
 0x110   : > { %v3753_v36 = vpop.f32.mrb[0].mxu0  ;;  %v3777_v37 = vpop.f32.mrb[0].mxu1 }
 0x111   : > { %v549_v38 = vadd.f32 %v3753_v36, %v4318_v35  ;;  %v629_v39 = vadd.f32 %v3777_v37, %v4318_v35  ;;  %v543_v40 = vpop.f32.mrb[1].mxu0  ;;  %v623_v41 = vpop.f32.mrb[1].mxu1 }
 0x112   : > { %v544_v42 = vadd.f32 %v4318_v35, %v543_v40  ;;  %v624_v43 = vadd.f32 %v4318_v35, %v623_v41 }
 0x113   : > { %vm703_vm4 = vcmp.ge.f32.partialorder %v549_v38, 0.0  ;;  %v735_v44 = vmul.f32 0.01, %v549_v38  ;;  %vm719_vm5 = vcmp.ge.f32.partialorder %v629_v39, 0.0  ;;  %v751_v45 = vmul.f32 0.01, %v629_v39 }
 0x114   : > { %vm702_vm6 = vcmp.ge.f32.partialorder %v544_v42, 0.0  ;;  %v734_v46 = vmul.f32 0.01, %v544_v42  ;;  %vm718_vm7 = vcmp.ge.f32.partialorder %v624_v43, 0.0  ;;  %v750_v47 = vmul.f32 0.01, %v624_v43 }
 0x115   : > { %v767_v48 = vsel %vm703_vm4, %v549_v38, %v735_v44  ;;  %v783_v49 = vsel %vm719_vm5, %v629_v39, %v751_v45  ;;  %v3756_v50 = vpop.f32.mrb[2].mxu0 }
 0x116   : > { %846 = vst.msk [vmem:[#allocation2 + $0x21] sm:$0xff] %vm798_vm1, %v767_v48  ;;  %862 = vst.msk [vmem:[#allocation2 + $0xe1] sm:$0xff] %vm798_vm1, %v783_v49  ;;  %v766_v51 = vsel %vm702_vm6, %v544_v42, %v734_v46  ;;  %v782_v52 = vsel %vm718_vm7, %v624_v43, %v750_v47  ;;  %v559_v53 = vadd.f32 %v3756_v50, %v4318_v35  ;;  %v553_v54 = vpop.f32.mrb[3].mxu0  ;;  %v2452_v42 = vld [vmem:[%s5728_s3] sm:$0xff]  ;;  %v2453_v43 = vld [vmem:[%s5728_s3 + $0x8] sm:$0xff] }
 0x117   : > { %845 = vst.msk [vmem:[#allocation2 + $0x19] sm:$0xff] %vm798_vm1, %v766_v51  ;;  %861 = vst.msk [vmem:[#allocation2 + $0xd9] sm:$0xff] %vm798_vm1, %v782_v52  ;;  %v554_v55 = vadd.f32 %v4318_v35, %v553_v54  ;;  %v3923_v45 = vpack.c.bf16 %v2453_v43, %v2452_v42  ;;  %v2454_v46 = vld [vmem:[%s5728_s3 + $0x10] sm:$0xff]  ;;  %v2455_v47 = vld [vmem:[%s5728_s3 + $0x18] sm:$0xff] }
 0x118   : > { %vm705_vm8 = vcmp.ge.f32.partialorder %v559_v53, 0.0  ;;  %v737_v56 = vmul.f32 0.01, %v559_v53  ;;  %v3759_v57 = vpop.f32.mrb[4].mxu0  ;;  %v363_v49 = vld [vmem:[%s4205_s12 + $0xd0] sm:$0xff]  ;;  %v3927_v50 = vpack.c.bf16 %v2455_v47, %v2454_v46  ;;  %v364_v51 = vld [vmem:[%s4205_s12 + $0xd8] sm:$0xff] }
 0x119   : > { %vm704_vm9 = vcmp.ge.f32.partialorder %v554_v55, 0.0  ;;  %v736_v58 = vmul.f32 0.01, %v554_v55  ;;  %v569_v59 = vadd.f32 %v3759_v57, %v4318_v35  ;;  %v563_v60 = vpop.f32.mrb[5].mxu0  ;;  %3924 = vmatprep.subr.bf16.mxu1 %v3923_v45  ;;  %3790 = vmatprep.mubr.msk.f32.mxu1 %vm380_vm0, %v363_v49  ;;  %v2456_v52 = vld [vmem:[%s5728_s3 + $0x20] sm:$0xff]  ;;  %v366_v57 = vld [vmem:[%s4205_s12 + $0xe8] sm:$0xff] }
 0x11a   : > { %v769_v61 = vsel %vm705_vm8, %v559_v53, %v737_v56  ;;  %v564_v62 = vadd.f32 %v4318_v35, %v563_v60  ;;  %3926 = vmatpush3.bf16.msra.mxu1 %v3923_v45  ;;  %v2457_v53 = vld [vmem:[%s5728_s3 + $0x28] sm:$0xff]  ;;  %v365_v56 = vld [vmem:[%s4205_s12 + $0xe0] sm:$0xff]  ;;  %v3780_v46 = vpop.f32.mrb[2].mxu1 }
 0x11b   : > { %848 = vst.msk [vmem:[#allocation2 + $0x39] sm:$0xff] %vm798_vm1, %v769_v61  ;;  %v768_v63 = vsel %vm704_vm9, %v554_v55, %v736_v58  ;;  %vm707_vm10 = vcmp.ge.f32.partialorder %v569_v59, 0.0  ;;  %v739_v0 = vmul.f32 0.01, %v569_v59  ;;  %3928 = vmatprep.subr.bf16.mxu1 %v3927_v50  ;;  %3791 = vmatmul.mubr.msk.f32.gmra.mrb[10].mxu1 %vm380_vm0, %v364_v51  ;;  %v3931_v55 = vpack.c.bf16 %v2457_v53, %v2456_v52  ;;  %v2458_v58 = vld [vmem:[%s5728_s3 + $0x30] sm:$0xff] }
 0x11c   : > { %847 = vst.msk [vmem:[#allocation2 + $0x31] sm:$0xff] %vm798_vm1, %v768_v63  ;;  %vm706_vm11 = vcmp.ge.f32.partialorder %v564_v62, 0.0  ;;  %v738_v1 = vmul.f32 0.01, %v564_v62  ;;  %v3762_v2 = vpop.f32.mrb[6].mxu0  ;;  %3793 = vmatprep.mubr.msk.f32.mxu1 %vm380_vm0, %v365_v56  ;;  %v368_v63 = vld [vmem:[%s4205_s12 + $0xf8] sm:$0xff]  ;;  %v639_v47 = vadd.f32 %v3780_v46, %v4318_v35 }
 0x11d   : > { %v1022_v3 = vld [vmem:[#allocation2 + $0xe1] sm:$0xff]  ;;  %v771_v5 = vsel %vm707_vm10, %v569_v59, %v739_v0  ;;  %v579_v6 = vadd.f32 %v3762_v2, %v4318_v35  ;;  %v573_v7 = vpop.f32.mrb[7].mxu0  ;;  %v2459_v59 = vld [vmem:[%s5728_s3 + $0x38] sm:$0xff] }
 0x11e   : > { %v1006_v4 = vld [vmem:[#allocation2 + $0x21] sm:$0xff]  ;;  %1616 = vrot.lane.b32.xlu1 %v1022_v3, %s4068_s25  ;;  %850 = vst.msk [vmem:[#allocation2 + $0x51] sm:$0xff] %vm798_vm1, %v771_v5  ;;  %v770_v8 = vsel %vm706_vm11, %v564_v62, %v738_v1  ;;  %v574_v9 = vadd.f32 %v4318_v35, %v573_v7  ;;  %v911_v25 = vld [vmem:[#allocation2 + $0x19] sm:$0xff]  ;;  %3930 = vmatpush3.bf16.msra.mxu1 %v3927_v50  ;;  %vm721_vm8 = vcmp.ge.f32.partialorder %v639_v47, 0.0  ;;  %v753_v52 = vmul.f32 0.01, %v639_v47 }
 0x11f   : > { %1584 = vrot.lane.b32.xlu0 %v1006_v4, %s4068_s25  ;;  %849 = vst.msk [vmem:[#allocation2 + $0x49] sm:$0xff] %vm798_vm1, %v770_v8  ;;  %vm709_vm12 = vcmp.ge.f32.partialorder %v579_v6, 0.0  ;;  %v741_v10 = vmul.f32 0.01, %v579_v6  ;;  %v1149_v12 = vld [vmem:[#allocation2 + $0xe2] sm:$0xff]  ;;  %v1037_v28 = vld [vmem:[#allocation2 + $0x1a] sm:$0xff]  ;;  %3932 = vmatprep.subr.bf16.mxu1 %v3931_v55  ;;  %v3935_v61 = vpack.c.bf16 %v2459_v59, %v2458_v58 }
 0x120   : > { %vm708_vm13 = vcmp.ge.f32.partialorder %v574_v9, 0.0  ;;  %v740_v11 = vmul.f32 0.01, %v574_v9  ;;  %v3765_v14 = vpop.f32.mrb[8].mxu0  ;;  %v1038_v20 = vld [vmem:[#allocation2 + $0x22] sm:$0xff]  ;;  %v4361_v29 = vld [vmem:[#allocation2 + $0x18] sm:$0xff]  ;;  %3794 = vmatmul.mubr.msk.f32.gmra.mrb[12].mxu1 %vm380_vm0, %v366_v57 }
 0x121   : > { %v773_v13 = vsel %vm709_vm12, %v579_v6, %v741_v10  ;;  %v589_v16 = vadd.f32 %v3765_v14, %v4318_v35  ;;  %v583_v17 = vpop.f32.mrb[9].mxu0  ;;  %v4346_v21 = vld [vmem:[#allocation2 + $0x20] sm:$0xff]  ;;  %v1084_v30 = vld [vmem:[#allocation2 + $0xd8] sm:$0xff]  ;;  %vm2255_vm12 = vcmask 195584  }
 0x122   : > { %2124 = vrot.lane.b32.xlu1 %v1149_v12, %s4069_s26  ;;  %852 = vst.msk [vmem:[#allocation2 + $0x69] sm:$0xff] %vm798_vm1, %v773_v13  ;;  %v772_v15 = vsel %vm708_vm13, %v574_v9, %v740_v11  ;;  %v584_v18 = vadd.f32 %v4318_v35, %v583_v17  ;;  %v1085_v32 = vld [vmem:[#allocation2 + $0xe0] sm:$0xff]  ;;  %3934 = vmatpush3.bf16.msra.mxu1 %v3931_v55  ;;  %vm2222_vm13 = vcmask 130048  }
 0x123   : > { %1204 = vrot.lane.b32.xlu0 %v1006_v4, %s4067_s18  ;;  %851 = vst.msk [vmem:[#allocation2 + $0x61] sm:$0xff] %vm798_vm1, %v772_v15  ;;  %vm711_vm14 = vcmp.ge.f32.partialorder %v589_v16, 0.0  ;;  %v743_v19 = vmul.f32 0.01, %v589_v16  ;;  %v1116_v39 = vld [vmem:[#allocation2 + $0xd9] sm:$0xff]  ;;  %v4415_v60 = vld [vmem:[#allocation2 + $0x30] sm:$0xff]  ;;  %3936 = vmatprep.subr.bf16.mxu1 %v3935_v61  ;;  %v785_v55 = vsel %vm721_vm8, %v639_v47, %v753_v52 }
 0x124   : > { %vm710_vm15 = vcmp.ge.f32.partialorder %v584_v18, 0.0  ;;  %v742_v22 = vmul.f32 0.01, %v584_v18  ;;  %v3768_v31 = vpop.f32.mrb[10].mxu0  ;;  %v1053_v44 = vld [vmem:[#allocation2 + $0xda] sm:$0xff]  ;;  %v1102_v2 = vld [vmem:[#allocation2 + $0x31] sm:$0xff] }
 0x125   : > { %v775_v23 = vsel %vm711_vm14, %v589_v16, %v743_v19  ;;  %v599_v33 = vadd.f32 %v3768_v31, %v4318_v35  ;;  %v593_v34 = vpop.f32.mrb[11].mxu0  ;;  %v1103_v48 = vld [vmem:[#allocation2 + $0x39] sm:$0xff]  ;;  %v1105_v12 = vld [vmem:[#allocation2 + $0x51] sm:$0xff]  ;;  %v4481_v31 = vpop.permute.xlu1 %1328  ;;  %864 = vst.msk [vmem:[#allocation2 + $0xf9] sm:$0xff] %vm798_vm1, %v785_v55  ;;  %vm2320_vm14 = vcmask 326656  }
 0x126   : > { %1456 = vrot.lane.b32.xlu1 %v4346_v21, %s4071_s11  ;;  %854 = vst.msk [vmem:[#allocation2 + $0x81] sm:$0xff] %vm798_vm1, %v775_v23  ;;  %v774_v24 = vsel %vm710_vm15, %v584_v18, %v742_v22  ;;  %v594_v36 = vadd.f32 %v4318_v35, %v593_v34  ;;  %v1135_v54 = vld [vmem:[#allocation2 + $0x3a] sm:$0xff]  ;;  %3938 = vmatpush3.bf16.msra.mxu1 %v3935_v61  ;;  %v1134_v11 = vld [vmem:[#allocation2 + $0x32] sm:$0xff]  ;;  %v4451_v14 = vld [vmem:[#allocation2 + $0x48] sm:$0xff]  ;;  %vm2353_vm15 = vcmask 392192  }
 0x127   : > { %1712 = vrot.lane.b32.xlu0 %v1038_v20, %s4070_s27  ;;  %853 = vst.msk [vmem:[#allocation2 + $0x79] sm:$0xff] %vm798_vm1, %v774_v24  ;;  %vm713_vm2 = vcmp.ge.f32.partialorder %v599_v33, 0.0  ;;  %v745_v37 = vmul.f32 0.01, %v599_v33  ;;  %v367_v62 = vld [vmem:[%s4205_s12 + $0xf0] sm:$0xff]  ;;  %v4431_v1 = vld [vmem:[#allocation2 + $0x38] sm:$0xff]  ;;  %s336_s12 = scalar_lea.vmem %s5733_s8, %s3529_s21 }
 0x128   : > { %vm712_vm3 = vcmp.ge.f32.partialorder %v594_v36, 0.0  ;;  %v744_v38 = vmul.f32 0.01, %v594_v36  ;;  %3796 = vmatprep.mubr.msk.f32.mxu1 %vm380_vm0, %v367_v62  ;;  %v2460_v0 = vld [vmem:[%s5728_s3 + $0x40] sm:$0xff]  ;;  %v1137_v13 = vld [vmem:[#allocation2 + $0x52] sm:$0xff]  ;;  %v1104_v16 = vld [vmem:[#allocation2 + $0x49] sm:$0xff] }
 0x129   : > { %v777_v40 = vsel %vm713_vm2, %v599_v33, %v745_v37  ;;  %3797 = vmatmul.mubr.msk.f32.gmra.mrb[14].mxu1 %vm380_vm0, %v368_v63  ;;  %3815 = vmatprep.subr.mxu1 %v2460_v0  ;;  %v4459_v15 = vld [vmem:[#allocation2 + $0x50] sm:$0xff]  ;;  %vm2386_vm2 = vcmask 457728  }
 0x12a   : > { %1202 = vrot.lane.b32.xlu1 %v911_v25, %s4067_s18  ;;  %856 = vst.msk [vmem:[#allocation2 + $0x99] sm:$0xff] %vm798_vm1, %v777_v40  ;;  %v776_v41 = vsel %vm712_vm3, %v594_v36, %v744_v38  ;;  %3816 = vmatpush3.msra.mxu1 %v2460_v0  ;;  %v1136_v26 = vld [vmem:[#allocation2 + $0x4a] sm:$0xff]  ;;  %v4491_v37 = vld [vmem:[#allocation2 + $0x60] sm:$0xff]  ;;  %vm2419_vm3 = vcmask 523264  }
 0x12b   : > { %1332 = vrot.lane.b32.xlu0 %v1038_v20, %s4066_s17  ;;  %855 = vst.msk [vmem:[#allocation2 + $0x91] sm:$0xff] %vm798_vm1, %v776_v41  ;;  %v1139_v33 = vld [vmem:[#allocation2 + $0x6a] sm:$0xff]  ;;  %v1106_v43 = vld [vmem:[#allocation2 + $0x61] sm:$0xff] }
 0x12c   : > { %v4507_v42 = vld [vmem:[#allocation2 + $0x68] sm:$0xff] }
 0x12d   : > { %v1138_v53 = vld [vmem:[#allocation2 + $0x62] sm:$0xff] }
 0x12e   : > { %1710 = vrot.lane.b32.xlu1 %v1037_v28, %s4070_s27  ;;  %v1109_v62 = vld [vmem:[#allocation2 + $0x81] sm:$0xff] }
 0x12f   : > { %1996 = vrot.lane.b32.xlu0 %v1022_v3, %s4072_s20  ;;  %v3771_v3 = vpop.f32.mrb[12].mxu0 }
 0x130   : > { %v609_v4 = vadd.f32 %v3771_v3, %v4318_v35  ;;  %v603_v5 = vpop.f32.mrb[13].mxu0 }
 0x131   : > { %v604_v6 = vadd.f32 %v4318_v35, %v603_v5  ;;  %v3774_v17 = vpop.f32.mrb[14].mxu0  ;;  %v4551_v5 = vld [vmem:[#allocation2 + $0x78] sm:$0xff] }
 0x132   : > { %1330 = vrot.lane.b32.xlu1 %v1037_v28, %s4066_s17  ;;  %vm715_vm4 = vcmp.ge.f32.partialorder %v609_v4, 0.0  ;;  %v747_v7 = vmul.f32 0.01, %v609_v4  ;;  %v619_v18 = vadd.f32 %v3774_v17, %v4318_v35  ;;  %v613_v19 = vpop.f32.mrb[15].mxu0  ;;  %v4475_v28 = vpop.permute.xlu0 %1198 }
 0x133   : > { %1454 = vrot.lane.b32.xlu0 %v4361_v29, %s4071_s11  ;;  %vm714_vm5 = vcmp.ge.f32.partialorder %v604_v6, 0.0  ;;  %v746_v8 = vmul.f32 0.01, %v604_v6  ;;  %v614_v20 = vadd.f32 %v4318_v35, %v613_v19 }
 0x134   : > { %v779_v9 = vsel %vm715_vm4, %v609_v4, %v747_v7  ;;  %vm717_vm6 = vcmp.ge.f32.partialorder %v619_v18, 0.0  ;;  %v749_v22 = vmul.f32 0.01, %v619_v18  ;;  %vm2468_vm4 = vcmask 588800  }
 0x135   : > { %858 = vst.msk [vmem:[#allocation2 + $0xb1] sm:$0xff] %vm798_vm1, %v779_v9  ;;  %v778_v10 = vsel %vm714_vm5, %v604_v6, %v746_v8  ;;  %vm716_vm7 = vcmp.ge.f32.partialorder %v614_v20, 0.0  ;;  %v748_v23 = vmul.f32 0.01, %v614_v20 }
 0x136   : > { %1866 = vrot.lane.b32.xlu1 %v1084_v30, %s4073_s22  ;;  %857 = vst.msk [vmem:[#allocation2 + $0xa9] sm:$0xff] %vm798_vm1, %v778_v10  ;;  %v781_v24 = vsel %vm717_vm6, %v619_v18, %v749_v22  ;;  %v4567_v10 = vld [vmem:[#allocation2 + $0x80] sm:$0xff] }
 0x137   : > { %1582 = vrot.lane.b32.xlu0 %v911_v25, %s4068_s25  ;;  %860 = vst.msk [vmem:[#allocation2 + $0xc9] sm:$0xff] %vm798_vm1, %v781_v24  ;;  %v780_v25 = vsel %vm716_vm7, %v614_v20, %v748_v23  ;;  %v1140_v24 = vld [vmem:[#allocation2 + $0x7a] sm:$0xff] }
 0x138   : > { %859 = vst.msk [vmem:[#allocation2 + $0xc1] sm:$0xff] %vm798_vm1, %v780_v25 }
 0x13a   : > { %1486 = vrot.lane.b32.xlu1 %v1084_v30, %s4071_s11  ;;  %v1107_v30 = vld [vmem:[#allocation2 + $0x69] sm:$0xff] }
 0x13b   : > { %1868 = vrot.lane.b32.xlu0 %v1085_v32, %s4073_s22 }
 0x13e   : > { %1994 = vrot.lane.b32.xlu1 %v1116_v39, %s4072_s20 }
 0x13f   : > { %1488 = vrot.lane.b32.xlu0 %v1085_v32, %s4071_s11  ;;  %v4483_v32 = vpop.permute.xlu0 %1200 }
 0x142   : > { %1614 = vrot.lane.b32.xlu1 %v1116_v39, %s4068_s25 }
 0x143   : > { %1234 = vrot.lane.b32.xlu0 %v1116_v39, %s4067_s18 }
 0x146   : > { %2122 = vrot.lane.b32.xlu1 %v1053_v44, %s4069_s26 }
 0x147   : > { %1742 = vrot.lane.b32.xlu0 %v1053_v44, %s4070_s27 }
 0x14a   : > { %1588 = vrot.lane.b32.xlu1 %v1103_v48, %s4068_s25 }
 0x14b   : > { %1968 = vrot.lane.b32.xlu0 %v1103_v48, %s4072_s20 }
 0x14e   : > { %2096 = vrot.lane.b32.xlu1 %v1135_v54, %s4069_s26 }
 0x14f   : > { %1208 = vrot.lane.b32.xlu0 %v1103_v48, %s4067_s18  ;;  %v633_v48 = vpop.f32.mrb[3].mxu1 }
 0x150   : > { %v634_v49 = vadd.f32 %v4318_v35, %v633_v48  ;;  %v877_v48 = vld [vmem:[#allocation2] sm:$0xff] }
 0x151   : > { %v2190_v55 = vsel %vm798_vm1, %v877_v48, %v4475_v28 }
 0x152   : > { %1838 = vrot.lane.b32.xlu1 %v4415_v60, %s4073_s22  ;;  %vm720_vm9 = vcmp.ge.f32.partialorder %v634_v49, 0.0 }
 0x153   : > { %1716 = vrot.lane.b32.xlu0 %v1135_v54, %s4070_s27 }
 0x156   : > { %1458 = vrot.lane.b32.xlu1 %v4415_v60, %s4071_s11 }
 0x157   : > { %1336 = vrot.lane.b32.xlu0 %v1135_v54, %s4066_s17  ;;  %v752_v54 = vmul.f32 0.01, %v634_v49 }
 0x159   : > { %v784_v56 = vsel %vm720_vm9, %v634_v49, %v752_v54  ;;  %v1111_v54 = vld [vmem:[#allocation2 + $0x99] sm:$0xff] }
 0x15a   : > { %1966 = vrot.lane.b32.xlu1 %v1102_v2, %s4072_s20  ;;  %863 = vst.msk [vmem:[#allocation2 + $0xf1] sm:$0xff] %vm798_vm1, %v784_v56 }
 0x15b   : > { %1840 = vrot.lane.b32.xlu0 %v4431_v1, %s4073_s22 }
 0x15e   : > { %1586 = vrot.lane.b32.xlu1 %v1102_v2, %s4068_s25 }
 0x15f   : > { %1460 = vrot.lane.b32.xlu0 %v4431_v1, %s4071_s11 }
 0x162   : > { %2094 = vrot.lane.b32.xlu1 %v1134_v11, %s4069_s26 }
 0x163   : > { %1206 = vrot.lane.b32.xlu0 %v1102_v2, %s4067_s18  ;;  %v1141_v2 = vld [vmem:[#allocation2 + $0x82] sm:$0xff] }
 0x166   : > { %1334 = vrot.lane.b32.xlu1 %v1134_v11, %s4066_s17 }
 0x167   : > { %1714 = vrot.lane.b32.xlu0 %v1134_v11, %s4070_s27  ;;  %v1108_v11 = vld [vmem:[#allocation2 + $0x79] sm:$0xff] }
 0x16a   : > { %1592 = vrot.lane.b32.xlu1 %v1105_v12, %s4068_s25 }
 0x16b   : > { %1972 = vrot.lane.b32.xlu0 %v1105_v12, %s4072_s20 }
 0x16e   : > { %2100 = vrot.lane.b32.xlu1 %v1137_v13, %s4069_s26 }
 0x16f   : > { %1212 = vrot.lane.b32.xlu0 %v1105_v12, %s4067_s18 }
 0x172   : > { %1842 = vrot.lane.b32.xlu1 %v4451_v14, %s4073_s22 }
 0x173   : > { %1720 = vrot.lane.b32.xlu0 %v1137_v13, %s4070_s27 }
 0x176   : > { %1462 = vrot.lane.b32.xlu1 %v4451_v14, %s4071_s11 }
 0x177   : > { %1340 = vrot.lane.b32.xlu0 %v1137_v13, %s4066_s17 }
 0x17a   : > { %1970 = vrot.lane.b32.xlu1 %v1104_v16, %s4072_s20 }
 0x17b   : > { %1844 = vrot.lane.b32.xlu0 %v4459_v15, %s4073_s22 }
 0x17e   : > { %1590 = vrot.lane.b32.xlu1 %v1104_v16, %s4068_s25 }
 0x17f   : > { %1464 = vrot.lane.b32.xlu0 %v4459_v15, %s4071_s11 }
 0x182   : > { %2098 = vrot.lane.b32.xlu1 %v1136_v26, %s4069_s26 }
 0x183   : > { %1210 = vrot.lane.b32.xlu0 %v1104_v16, %s4067_s18  ;;  %v3783_v16 = vpop.f32.mrb[4].mxu1 }
 0x184   : > { %v649_v17 = vadd.f32 %v3783_v16, %v4318_v35  ;;  %v643_v18 = vpop.f32.mrb[5].mxu1 }
 0x185   : > { %v644_v19 = vadd.f32 %v4318_v35, %v643_v18  ;;  %v4618_v18 = vld [vmem:[#allocation2 + $0x90] sm:$0xff]  ;;  %v3786_v48 = vpop.f32.mrb[6].mxu1 }
 0x186   : > { %1338 = vrot.lane.b32.xlu1 %v1136_v26, %s4066_s17  ;;  %vm723_vm10 = vcmp.ge.f32.partialorder %v649_v17, 0.0  ;;  %v755_v23 = vmul.f32 0.01, %v649_v17 }
 0x187   : > { %1718 = vrot.lane.b32.xlu0 %v1136_v26, %s4070_s27  ;;  %vm722_vm11 = vcmp.ge.f32.partialorder %v644_v19, 0.0  ;;  %v754_v25 = vmul.f32 0.01, %v644_v19 }
 0x188   : > { %v787_v26 = vsel %vm723_vm10, %v649_v17, %v755_v23 }
 0x189   : > { %866 = vst.msk [vmem:[#allocation2 + $0x111] sm:$0xff] %vm798_vm1, %v787_v26 }
 0x18a   : > { %1596 = vrot.lane.b32.xlu1 %v1107_v30, %s4068_s25 }
 0x18b   : > { %1976 = vrot.lane.b32.xlu0 %v1107_v30, %s4072_s20 }
 0x18e   : > { %2104 = vrot.lane.b32.xlu1 %v1139_v33, %s4069_s26 }
 0x18f   : > { %1216 = vrot.lane.b32.xlu0 %v1107_v30, %s4067_s18  ;;  %v878_v30 = vld [vmem:[#allocation2 + $0x8] sm:$0xff] }
 0x190   : > { %v4487_v34 = vpop.permute.xlu1 %1616  ;;  %v2191_v47 = vsel %vm798_vm1, %v878_v30, %v4483_v32  ;;  %v4639_v30 = vld [vmem:[#allocation2 + $0x98] sm:$0xff] }
 0x191   : > { %v4489_v36 = vpop.permute.xlu0 %1584 }
 0x192   : > { %1846 = vrot.lane.b32.xlu1 %v4491_v37, %s4073_s22 }
 0x193   : > { %1724 = vrot.lane.b32.xlu0 %v1139_v33, %s4070_s27 }
 0x194   : > { %v4496_v38 = vpop.permute.xlu1 %2124 }
 0x195   : > { %v4498_v39 = vpop.permute.xlu0 %1204 }
 0x196   : > { %1466 = vrot.lane.b32.xlu1 %v4491_v37, %s4071_s11 }
 0x197   : > { %1344 = vrot.lane.b32.xlu0 %v1139_v33, %s4066_s17  ;;  %v786_v33 = vsel %vm722_vm11, %v644_v19, %v754_v25 }
 0x198   : > { %v4505_v41 = vpop.permute.xlu1 %1456  ;;  %865 = vst.msk [vmem:[#allocation2 + $0x109] sm:$0xff] %vm798_vm1, %v786_v33  ;;  %v1110_v33 = vld [vmem:[#allocation2 + $0x91] sm:$0xff] }
 0x199   : > { %v4503_v40 = vpop.permute.xlu0 %1712 }
 0x19a   : > { %1974 = vrot.lane.b32.xlu1 %v1106_v43, %s4072_s20 }
 0x19b   : > { %1848 = vrot.lane.b32.xlu0 %v4507_v42, %s4073_s22 }
 0x19c   : > { %v4514_v45 = vpop.permute.xlu1 %1202 }
 0x19d   : > { %v4512_v44 = vpop.permute.xlu0 %1332 }
 0x19e   : > { %1594 = vrot.lane.b32.xlu1 %v1106_v43, %s4068_s25 }
 0x19f   : > { %1468 = vrot.lane.b32.xlu0 %v4507_v42, %s4071_s11 }
 0x1a0   : > { %v4523_v51 = vpop.permute.xlu1 %1710 }
 0x1a1   : > { %v4521_v50 = vpop.permute.xlu0 %1996 }
 0x1a2   : > { %2102 = vrot.lane.b32.xlu1 %v1138_v53, %s4069_s26 }
 0x1a3   : > { %1214 = vrot.lane.b32.xlu0 %v1106_v43, %s4067_s18 }
 0x1a4   : > { %v4530_v58 = vpop.permute.xlu1 %1330 }
 0x1a5   : > { %v4528_v57 = vpop.permute.xlu0 %1454 }
 0x1a6   : > { %1342 = vrot.lane.b32.xlu1 %v1138_v53, %s4066_s17 }
 0x1a7   : > { %1722 = vrot.lane.b32.xlu0 %v1138_v53, %s4070_s27  ;;  %v2224_v53 = vsel %vm2222_vm13, %v2191_v47, %v4481_v31  ;;  %v1143_v31 = vld [vmem:[#allocation2 + $0x9a] sm:$0xff] }
 0x1a8   : > { %v4537_v61 = vpop.permute.xlu1 %1866  ;;  %v2257_v32 = vsel %vm2255_vm12, %v2224_v53, %v4505_v41  ;;  %v653_v53 = vpop.f32.mrb[7].mxu1 }
 0x1a9   : > { %v4535_v59 = vpop.permute.xlu0 %1582 }
 0x1aa   : > { %1600 = vrot.lane.b32.xlu1 %v1109_v62, %s4068_s25 }
 0x1ab   : > { %1980 = vrot.lane.b32.xlu0 %v1109_v62, %s4072_s20 }
 0x1ac   : > { %v4543_v0 = vpop.permute.xlu1 %1486 }
 0x1ad   : > { %v4541_v63 = vpop.permute.xlu0 %1868 }
 0x1ae   : > { %2108 = vrot.lane.b32.xlu1 %v1141_v2, %s4069_s26 }
 0x1af   : > { %1220 = vrot.lane.b32.xlu0 %v1109_v62, %s4067_s18 }
 0x1b0   : > { %v4549_v4 = vpop.permute.xlu1 %1994 }
 0x1b1   : > { %v4547_v3 = vpop.permute.xlu0 %1488 }
 0x1b2   : > { %1850 = vrot.lane.b32.xlu1 %v4551_v5, %s4073_s22 }
 0x1b3   : > { %1728 = vrot.lane.b32.xlu0 %v1141_v2, %s4070_s27 }
 0x1b4   : > { %v4558_v7 = vpop.permute.xlu1 %1614 }
 0x1b5   : > { %v4556_v6 = vpop.permute.xlu0 %1234 }
 0x1b6   : > { %1470 = vrot.lane.b32.xlu1 %v4551_v5, %s4071_s11 }
 0x1b7   : > { %1348 = vrot.lane.b32.xlu0 %v1141_v2, %s4066_s17  ;;  %v2289_v2 = vsel %vm380_vm0, %v2257_v32, %v4489_v36 }
 0x1b8   : > { %v4565_v9 = vpop.permute.xlu1 %2122  ;;  %v2322_v16 = vsel %vm2320_vm14, %v2289_v2, %v4503_v40 }
 0x1b9   : > { %v4563_v8 = vpop.permute.xlu0 %1742 }
 0x1ba   : > { %1978 = vrot.lane.b32.xlu1 %v1108_v11, %s4072_s20 }
 0x1bb   : > { %1852 = vrot.lane.b32.xlu0 %v4567_v10, %s4073_s22 }
 0x1bc   : > { %v4572_v13 = vpop.permute.xlu1 %1588 }
 0x1bd   : > { %v1969_v12 = vpop.permute.xlu0 %1968 }
 0x1be   : > { %1598 = vrot.lane.b32.xlu1 %v1108_v11, %s4068_s25 }
 0x1bf   : > { %1472 = vrot.lane.b32.xlu0 %v4567_v10, %s4071_s11 }
 0x1c0   : > { %v2097_v22 = vpop.permute.xlu1 %2096 }
 0x1c1   : > { %v4579_v20 = vpop.permute.xlu0 %1208 }
 0x1c2   : > { %2106 = vrot.lane.b32.xlu1 %v1140_v24, %s4069_s26 }
 0x1c3   : > { %1218 = vrot.lane.b32.xlu0 %v1108_v11, %s4067_s18  ;;  %v2223_v11 = vsel %vm2222_vm13, %v2190_v55, %v4473_v27 }
 0x1c4   : > { %v1839_v46 = vpop.permute.xlu1 %1838  ;;  %v2256_v28 = vsel %vm2255_vm12, %v2223_v11, %v4528_v57 }
 0x1c5   : > { %v4584_v43 = vpop.permute.xlu0 %1716  ;;  %v2288_v41 = vsel %vm380_vm0, %v2256_v28, %v4535_v59 }
 0x1c6   : > { %1346 = vrot.lane.b32.xlu1 %v1140_v24, %s4066_s17  ;;  %v2321_v57 = vsel %vm2320_vm14, %v2288_v41, %v4523_v51 }
 0x1c7   : > { %1726 = vrot.lane.b32.xlu0 %v1140_v24, %s4070_s27  ;;  %v2354_v59 = vsel %vm2353_vm15, %v2321_v57, %v1839_v46 }
 0x1c8   : > { %v4593_v52 = vpop.permute.xlu1 %1458 }
 0x1c9   : > { %v4591_v49 = vpop.permute.xlu0 %1336 }
 0x1ca   : > { %1604 = vrot.lane.b32.xlu1 %v1111_v54, %s4068_s25 }
 0x1cb   : > { %1984 = vrot.lane.b32.xlu0 %v1111_v54, %s4072_s20 }
 0x1cc   : > { %v1967_v62 = vpop.permute.xlu1 %1966 }
 0x1cd   : > { %v1841_v56 = vpop.permute.xlu0 %1840  ;;  %v2387_v19 = vsel %vm2386_vm2, %v2354_v59, %v1967_v62  ;;  %v1142_v62 = vld [vmem:[#allocation2 + $0x92] sm:$0xff] }
 0x1ce   : > { %2112 = vrot.lane.b32.xlu1 %v1143_v31, %s4069_s26  ;;  %v2355_v27 = vsel %vm2353_vm15, %v2322_v16, %v1841_v56  ;;  %v2193_v16 = vsel %vm798_vm1, %v4346_v21, %v4498_v39  ;;  %v1145_v21 = vld [vmem:[#allocation2 + $0xb2] sm:$0xff]  ;;  %v2192_v39 = vsel %vm798_vm1, %v4361_v29, %v4514_v45  ;;  %v4691_v45 = vld [vmem:[#allocation2 + $0xa8] sm:$0xff] }
 0x1cf   : > { %1224 = vrot.lane.b32.xlu0 %v1111_v54, %s4067_s18  ;;  %v2388_v40 = vsel %vm2386_vm2, %v2355_v27, %v1969_v12  ;;  %v654_v54 = vadd.f32 %v4318_v35, %v653_v53  ;;  %v2226_v59 = vsel %vm2222_vm13, %v2193_v16, %v4512_v44  ;;  %v2225_v44 = vsel %vm2222_vm13, %v2192_v39, %v4530_v58 }
 0x1d0   : > { %v4615_v17 = vpop.permute.xlu1 %1586  ;;  %v2421_v51 = vsel %vm2419_vm3, %v2388_v40, %v2097_v22  ;;  %v659_v22 = vadd.f32 %v3786_v48, %v4318_v35  ;;  %v1113_v40 = vld [vmem:[#allocation2 + $0xb1] sm:$0xff] }
 0x1d1   : > { %v1461_v36 = vpop.permute.xlu0 %1460  ;;  %vm724_vm6 = vcmp.ge.f32.partialorder %v654_v54, 0.0  ;;  %v756_v2 = vmul.f32 0.01, %v654_v54 }
 0x1d2   : > { %1854 = vrot.lane.b32.xlu1 %v4618_v18, %s4073_s22  ;;  %vm725_vm5 = vcmp.ge.f32.partialorder %v659_v22, 0.0  ;;  %v757_v56 = vmul.f32 0.01, %v659_v22 }
 0x1d3   : > { %1732 = vrot.lane.b32.xlu0 %v1143_v31, %s4070_s27 }
 0x1d4   : > { %v2095_v24 = vpop.permute.xlu1 %2094  ;;  %v789_v11 = vsel %vm725_vm5, %v659_v22, %v757_v56 }
 0x1d5   : > { %v4628_v23 = vpop.permute.xlu0 %1206  ;;  %v2420_v25 = vsel %vm2419_vm3, %v2387_v19, %v2095_v24  ;;  %868 = vst.msk [vmem:[#allocation2 + $0x129] sm:$0xff] %vm798_vm1, %v789_v11  ;;  %v2259_v19 = vsel %vm2255_vm12, %v2226_v59, %v1461_v36  ;;  %v2258_v36 = vsel %vm2255_vm12, %v2225_v44, %v4593_v52  ;;  %v1112_v11 = vld [vmem:[#allocation2 + $0xa9] sm:$0xff] }
 0x1d6   : > { %1474 = vrot.lane.b32.xlu1 %v4618_v18, %s4071_s11  ;;  %3817 = vmatprep.mubr.msk.f32.mxu1 %vm2468_vm4, %v2420_v25  ;;  %v2290_v22 = vsel %vm380_vm0, %v2258_v36, %v4615_v17 }
 0x1d7   : > { %1352 = vrot.lane.b32.xlu0 %v1143_v31, %s4066_s17  ;;  %3818 = vmatmul.mubr.msk.f32.vlgmr.msra.gmra.mrb[16].mxu1 %vm2468_vm4, %v2421_v51  ;;  %v788_v31 = vsel %vm724_vm6, %v654_v54, %v756_v2  ;;  %v2291_v51 = vsel %vm380_vm0, %v2259_v19, %v4572_v13  ;;  %v4711_v2 = vld [vmem:[#allocation2 + $0xb0] sm:$0xff] }
 0x1d8   : > { %v4637_v26 = vpop.permute.xlu1 %1334  ;;  %867 = vst.msk [vmem:[#allocation2 + $0x121] sm:$0xff] %vm798_vm1, %v788_v31  ;;  %v1144_v19 = vld [vmem:[#allocation2 + $0xaa] sm:$0xff] }
 0x1d9   : > { %v1715_v12 = vpop.permute.xlu0 %1714 }
 0x1da   : > { %1982 = vrot.lane.b32.xlu1 %v1110_v33, %s4072_s20  ;;  %v2323_v53 = vsel %vm2320_vm14, %v2290_v22, %v1715_v12  ;;  %v2195_v22 = vsel %vm798_vm1, %v4431_v1, %v4579_v20  ;;  %v1147_v1 = vld [vmem:[#allocation2 + $0xca] sm:$0xff]  ;;  %v2194_v20 = vsel %vm798_vm1, %v4415_v60, %v4628_v23 }
 0x1db   : > { %1856 = vrot.lane.b32.xlu0 %v4639_v30, %s4073_s22 }
 0x1dc   : > { %v4644_v47 = vpop.permute.xlu1 %1592 }
 0x1dd   : > { %v1973_v46 = vpop.permute.xlu0 %1972 }
 0x1de   : > { %1602 = vrot.lane.b32.xlu1 %v1110_v33, %s4068_s25 }
 0x1df   : > { %1476 = vrot.lane.b32.xlu0 %v4639_v30, %s4071_s11 }
 0x1e0   : > { %v2101_v32 = vpop.permute.xlu1 %2100 }
 0x1e1   : > { %v4651_v55 = vpop.permute.xlu0 %1212 }
 0x1e2   : > { %2110 = vrot.lane.b32.xlu1 %v1142_v62, %s4069_s26 }
 0x1e3   : > { %1222 = vrot.lane.b32.xlu0 %v1110_v33, %s4067_s18  ;;  %v2324_v33 = vsel %vm2320_vm14, %v2291_v51, %v4584_v43 }
 0x1e4   : > { %v1843_v41 = vpop.permute.xlu1 %1842 }
 0x1e5   : > { %v4656_v28 = vpop.permute.xlu0 %1720  ;;  %v2356_v58 = vsel %vm2353_vm15, %v2323_v53, %v1843_v41  ;;  %v2228_v53 = vsel %vm2222_vm13, %v2195_v22, %v4591_v49  ;;  %v2227_v49 = vsel %vm2222_vm13, %v2194_v20, %v4637_v26 }
 0x1e6   : > { %1350 = vrot.lane.b32.xlu1 %v1142_v62, %s4066_s17 }
 0x1e7   : > { %1730 = vrot.lane.b32.xlu0 %v1142_v62, %s4070_s27 }
 0x1e8   : > { %v4666_v57 = vpop.permute.xlu1 %1462 }
 0x1e9   : > { %v4664_v27 = vpop.permute.xlu0 %1340 }
 0x1ea   : > { %1608 = vrot.lane.b32.xlu1 %v1113_v40, %s4068_s25 }
 0x1eb   : > { %1988 = vrot.lane.b32.xlu0 %v1113_v40, %s4072_s20 }
 0x1ec   : > { %v1971_v25 = vpop.permute.xlu1 %1970 }
 0x1ed   : > { %v1845_v24 = vpop.permute.xlu0 %1844  ;;  %v2389_v52 = vsel %vm2386_vm2, %v2356_v58, %v1971_v25  ;;  %v1115_v58 = vld [vmem:[#allocation2 + $0xc9] sm:$0xff] }
 0x1ee   : > { %2116 = vrot.lane.b32.xlu1 %v1145_v21, %s4069_s26  ;;  %v2357_v29 = vsel %vm2353_vm15, %v2324_v33, %v1845_v24 }
 0x1ef   : > { %1228 = vrot.lane.b32.xlu0 %v1113_v40, %s4067_s18  ;;  %v2390_v43 = vsel %vm2386_vm2, %v2357_v29, %v1973_v46 }
 0x1f0   : > { %v4686_v13 = vpop.permute.xlu1 %1590  ;;  %v2423_v12 = vsel %vm2419_vm3, %v2390_v43, %v2101_v32  ;;  %v3789_v32 = vpop.f32.mrb[8].mxu1 }
 0x1f1   : > { %v1465_v48 = vpop.permute.xlu0 %1464  ;;  %v669_v40 = vadd.f32 %v3789_v32, %v4318_v35  ;;  %v663_v24 = vpop.f32.mrb[9].mxu1  ;;  %v4765_v32 = vld [vmem:[#allocation2 + $0xc0] sm:$0xff] }
 0x1f2   : > { %1858 = vrot.lane.b32.xlu1 %v4691_v45, %s4073_s22  ;;  %v664_v51 = vadd.f32 %v4318_v35, %v663_v24  ;;  %v2261_v43 = vsel %vm2255_vm12, %v2228_v53, %v1465_v48  ;;  %v2260_v48 = vsel %vm2255_vm12, %v2227_v49, %v4666_v57  ;;  %v3993_v53 = vld [vmem:[%s5727_s2] ss:$0 sm:$0xff] }
 0x1f3   : > { %1736 = vrot.lane.b32.xlu0 %v1145_v21, %s4070_s27  ;;  %vm727_vm7 = vcmp.ge.f32.partialorder %v669_v40, 0.0  ;;  %v759_v25 = vmul.f32 0.01, %v669_v40  ;;  %v2292_v60 = vsel %vm380_vm0, %v2260_v48, %v4686_v13 }
 0x1f4   : > { %v2099_v17 = vpop.permute.xlu1 %2098  ;;  %vm726_vm8 = vcmp.ge.f32.partialorder %v664_v51, 0.0  ;;  %v758_v36 = vmul.f32 0.01, %v664_v51 }
 0x1f5   : > { %v4700_v54 = vpop.permute.xlu0 %1210  ;;  %v2422_v56 = vsel %vm2419_vm3, %v2389_v52, %v2099_v17  ;;  %v791_v44 = vsel %vm727_vm7, %v669_v40, %v759_v25 }
 0x1f6   : > { %1478 = vrot.lane.b32.xlu1 %v4691_v45, %s4071_s11  ;;  %3820 = vmatprep.mubr.msk.f32.mxu1 %vm2468_vm4, %v2422_v56  ;;  %870 = vst.msk [vmem:[#allocation2 + $0x141] sm:$0xff] %vm798_vm1, %v791_v44  ;;  %v790_v33 = vsel %vm726_vm8, %v664_v51, %v758_v36  ;;  %v2293_v56 = vsel %vm380_vm0, %v2261_v43, %v4644_v47  ;;  %v4787_v51 = vld [vmem:[#allocation2 + $0xc8] sm:$0xff] }
 0x1f7   : > { %1356 = vrot.lane.b32.xlu0 %v1145_v21, %s4066_s17  ;;  %3821 = vmatmul.mubr.msk.f32.gmra.mrb[18].mxu1 %vm2468_vm4, %v2423_v12  ;;  %869 = vst.msk [vmem:[#allocation2 + $0x139] sm:$0xff] %vm798_vm1, %v790_v33  ;;  %v2326_v12 = vsel %vm2320_vm14, %v2293_v56, %v4656_v28  ;;  %v1146_v43 = vld [vmem:[#allocation2 + $0xc2] sm:$0xff] }
 0x1f8   : > { %v4709_v46 = vpop.permute.xlu1 %1338 }
 0x1f9   : > { %v1719_v62 = vpop.permute.xlu0 %1718 }
 0x1fa   : > { %1986 = vrot.lane.b32.xlu1 %v1112_v11, %s4072_s20  ;;  %v2325_v40 = vsel %vm2320_vm14, %v2292_v60, %v1719_v62 }
 0x1fb   : > { %1860 = vrot.lane.b32.xlu0 %v4711_v2, %s4073_s22 }
 0x1fc   : > { %v4716_v41 = vpop.permute.xlu1 %1596 }
 0x1fd   : > { %v1977_v31 = vpop.permute.xlu0 %1976 }
 0x1fe   : > { %1606 = vrot.lane.b32.xlu1 %v1112_v11, %s4068_s25 }
 0x1ff   : > { %1480 = vrot.lane.b32.xlu0 %v4711_v2, %s4071_s11 }
 0x200   : > { %v2105_v59 = vpop.permute.xlu1 %2104 }
 0x201   : > { %v4721_v16 = vpop.permute.xlu0 %1216 }
 0x202   : > { %2114 = vrot.lane.b32.xlu1 %v1144_v19, %s4069_s26 }
 0x203   : > { %1226 = vrot.lane.b32.xlu0 %v1112_v11, %s4067_s18 }
 0x204   : > { %v1847_v39 = vpop.permute.xlu1 %1846 }
 0x205   : > { %v4727_v21 = vpop.permute.xlu0 %1724  ;;  %v2358_v26 = vsel %vm2353_vm15, %v2325_v40, %v1847_v39  ;;  %v1114_v39 = vld [vmem:[#allocation2 + $0xc1] sm:$0xff] }
 0x206   : > { %1354 = vrot.lane.b32.xlu1 %v1144_v19, %s4066_s17 }
 0x207   : > { %1734 = vrot.lane.b32.xlu0 %v1144_v19, %s4070_s27 }
 0x208   : > { %v4738_v29 = vpop.permute.xlu1 %1466 }
 0x209   : > { %v4736_v35 = vpop.permute.xlu0 %1344 }
 0x20a   : > { %1612 = vrot.lane.b32.xlu1 %v1115_v58, %s4068_s25 }
 0x20b   : > { %1992 = vrot.lane.b32.xlu0 %v1115_v58, %s4072_s20 }
 0x20c   : > { %v1975_v17 = vpop.permute.xlu1 %1974 }
 0x20d   : > { %v1849_v52 = vpop.permute.xlu0 %1848  ;;  %v2391_v57 = vsel %vm2386_vm2, %v2358_v26, %v1975_v17  ;;  %v2197_v26 = vsel %vm798_vm1, %v4459_v15, %v4651_v55 }
 0x20e   : > { %2120 = vrot.lane.b32.xlu1 %v1147_v1, %s4069_s26  ;;  %v2359_v23 = vsel %vm2353_vm15, %v2326_v12, %v1849_v52 }
 0x20f   : > { %1232 = vrot.lane.b32.xlu0 %v1115_v58, %s4067_s18  ;;  %v2392_v28 = vsel %vm2386_vm2, %v2359_v23, %v1977_v31 }
 0x210   : > { %v4760_v47 = vpop.permute.xlu1 %1594  ;;  %v2425_v62 = vsel %vm2419_vm3, %v2392_v28, %v2105_v59  ;;  %v3792_v59 = vpop.f32.mrb[10].mxu1 }
 0x211   : > { %v4758_v11 = vpop.permute.xlu0 %1468  ;;  %v679_v58 = vadd.f32 %v3993_v53, %v3792_v59  ;;  %v673_v52 = vpop.f32.mrb[11].mxu1 }
 0x212   : > { %1862 = vrot.lane.b32.xlu1 %v4765_v32, %s4073_s22  ;;  %v674_v56 = vadd.f32 %v3993_v53, %v673_v52  ;;  %v3795_v60 = vpop.f32.mrb[12].mxu1 }
 0x213   : > { %1740 = vrot.lane.b32.xlu0 %v1147_v1, %s4070_s27  ;;  %vm729_vm9 = vcmp.ge.f32.partialorder %v679_v58, 0.0  ;;  %v761_v17 = vmul.f32 0.01, %v679_v58  ;;  %v689_v23 = vadd.f32 %v3993_v53, %v3795_v60  ;;  %v683_v40 = vpop.f32.mrb[13].mxu1  ;;  %v4832_v60 = vld [vmem:[#allocation2 + $0xf0] sm:$0xff] }
 0x214   : > { %v2103_v13 = vpop.permute.xlu1 %2102  ;;  %vm728_vm10 = vcmp.ge.f32.partialorder %v674_v56, 0.0  ;;  %v760_v48 = vmul.f32 0.01, %v674_v56  ;;  %v3798_v55 = vpop.f32.mrb[14].mxu1 }
 0x215   : > { %v4774_v19 = vpop.permute.xlu0 %1214  ;;  %v2424_v24 = vsel %vm2419_vm3, %v2391_v57, %v2103_v13  ;;  %v793_v49 = vsel %vm729_vm9, %v679_v58, %v761_v17  ;;  %v684_v13 = vadd.f32 %v3993_v53, %v683_v40  ;;  %vm731_vm11 = vcmp.ge.f32.partialorder %v689_v23, 0.0  ;;  %v693_v17 = vpop.f32.mrb[15].mxu1 }
 0x216   : > { %1482 = vrot.lane.b32.xlu1 %v4765_v32, %s4071_s11  ;;  %3823 = vmatprep.mubr.msk.f32.mxu1 %vm2468_vm4, %v2424_v24  ;;  %872 = vst.msk [vmem:[#allocation2 + $0x159] sm:$0xff] %vm798_vm1, %v793_v49  ;;  %v792_v12 = vsel %vm728_vm10, %v674_v56, %v760_v48  ;;  %v2230_v24 = vsel %vm2222_vm13, %v2197_v26, %v4664_v27  ;;  %v763_v59 = vmul.f32 0.01, %v689_v23 }
 0x217   : > { %1360 = vrot.lane.b32.xlu0 %v1147_v1, %s4066_s17  ;;  %3824 = vmatmul.mubr.msk.f32.gmra.mrb[20].mxu1 %vm2468_vm4, %v2425_v62  ;;  %871 = vst.msk [vmem:[#allocation2 + $0x151] sm:$0xff] %vm798_vm1, %v792_v12  ;;  %v928_v62 = vld [vmem:[#allocation2 + $0xe1] sm:$0xff]  ;;  %v2263_v58 = vsel %vm2255_vm12, %v2230_v24, %v4758_v11  ;;  %vm730_vm5 = vcmp.ge.f32.partialorder %v684_v13, 0.0  ;;  %v762_v15 = vmul.f32 0.01, %v684_v13  ;;  %v699_v52 = vadd.f32 %v3993_v53, %v3798_v55 }
 0x218   : > { %v4785_v31 = vpop.permute.xlu1 %1342  ;;  %v694_v48 = vadd.f32 %v3993_v53, %v693_v17  ;;  %v2295_v12 = vsel %vm380_vm0, %v2263_v58, %v4716_v41  ;;  %v1054_v11 = vld [vmem:[#allocation2 + $0xe2] sm:$0xff] }
 0x219   : > { %v4783_v25 = vpop.permute.xlu0 %1722  ;;  %v794_v27 = vsel %vm730_vm5, %v684_v13, %v762_v15  ;;  %vm733_vm6 = vcmp.ge.f32.partialorder %v699_v52, 0.0  ;;  %v765_v40 = vmul.f32 0.01, %v699_v52  ;;  %v2328_v24 = vsel %vm2320_vm14, %v2295_v12, %v4727_v21 }
 0x21a   : > { %1990 = vrot.lane.b32.xlu1 %v1114_v39, %s4072_s20  ;;  %873 = vst.msk [vmem:[#allocation2 + $0x169] sm:$0xff] %vm798_vm1, %v794_v27  ;;  %vm732_vm7 = vcmp.ge.f32.partialorder %v694_v48, 0.0  ;;  %v764_v53 = vmul.f32 0.01, %v694_v48  ;;  %v1119_v27 = vld [vmem:[#allocation2 + $0xf9] sm:$0xff] }
 0x21b   : > { %1864 = vrot.lane.b32.xlu0 %v4787_v51, %s4073_s22  ;;  %v797_v26 = vsel %vm733_vm6, %v699_v52, %v765_v40  ;;  %v1118_v52 = vld [vmem:[#allocation2 + $0xf1] sm:$0xff] }
 0x21c   : > { %v4794_v36 = vpop.permute.xlu1 %1600  ;;  %876 = vst.msk [vmem:[#allocation2 + $0x189] sm:$0xff] %vm798_vm1, %v797_v26 }
 0x21d   : > { %v4792_v44 = vpop.permute.xlu0 %1980 }
 0x21e   : > { %1610 = vrot.lane.b32.xlu1 %v1114_v39, %s4068_s25 }
 0x21f   : > { %1484 = vrot.lane.b32.xlu0 %v4787_v51, %s4071_s11 }
 0x220   : > { %v4801_v22 = vpop.permute.xlu1 %2108 }
 0x221   : > { %v4799_v33 = vpop.permute.xlu0 %1220 }
 0x222   : > { %2118 = vrot.lane.b32.xlu1 %v1146_v43, %s4069_s26 }
 0x223   : > { %1230 = vrot.lane.b32.xlu0 %v1114_v39, %s4067_s18  ;;  %v959_v39 = vld [vmem:[#allocation2 + $0xda] sm:$0xff] }
 0x224   : > { %v4810_v20 = vpop.permute.xlu1 %1850 }
 0x225   : > { %v4808_v1 = vpop.permute.xlu0 %1728 }
 0x226   : > { %1358 = vrot.lane.b32.xlu1 %v1146_v43, %s4066_s17 }
 0x227   : > { %1738 = vrot.lane.b32.xlu0 %v1146_v43, %s4070_s27  ;;  %v795_v43 = vsel %vm731_vm11, %v689_v23, %v763_v59  ;;  %v2196_v23 = vsel %vm798_vm1, %v4451_v14, %v4700_v54  ;;  %v796_v14 = vsel %vm732_vm7, %v694_v48, %v764_v53  ;;  %v2886_v54 = vld [vmem:[%s5730_s5] sm:$0xff]  ;;  %v1150_v48 = vld [vmem:[#allocation2 + $0xf2] sm:$0xff]  ;;  %v2199_v53 = vsel %vm798_vm1, %v4507_v42, %v4721_v16 }
 0x228   : > { %v4821_v57 = vpop.permute.xlu1 %1470  ;;  %874 = vst.msk [vmem:[#allocation2 + $0x171] sm:$0xff] %vm798_vm1, %v795_v43  ;;  %v2229_v41 = vsel %vm2222_vm13, %v2196_v23, %v4709_v46  ;;  %875 = vst.msk [vmem:[#allocation2 + $0x181] sm:$0xff] %vm798_vm1, %v796_v14  ;;  %3865 = vmatprep.subr.mxu0 %v2886_v54  ;;  %v1151_v23 = vld [vmem:[#allocation2 + $0xfa] sm:$0xff]  ;;  %v2198_v42 = vsel %vm798_vm1, %v4491_v37, %v4774_v19 }
 0x229   : > { %v4819_v28 = vpop.permute.xlu0 %1348  ;;  %v2262_v13 = vsel %vm2255_vm12, %v2229_v41, %v4738_v29  ;;  %3866 = vmatpush3.msra.mxu0 %v2886_v54  ;;  %v2231_v16 = vsel %vm2222_vm13, %v2198_v42, %v4785_v31 }
 0x22a   : > { %1362 = vrot.lane.b32.xlu1 %v959_v39, %s4066_s17  ;;  %v2294_v46 = vsel %vm380_vm0, %v2262_v13, %v4760_v47  ;;  %v2232_v13 = vsel %vm2222_vm13, %v2199_v53, %v4736_v35  ;;  %v2264_v35 = vsel %vm2255_vm12, %v2231_v16, %v4821_v57 }
 0x22b   : > { %1236 = vrot.lane.b32.xlu0 %v928_v62, %s4067_s18  ;;  %v2327_v21 = vsel %vm2320_vm14, %v2294_v46, %v4783_v25  ;;  %v4870_v25 = vld [vmem:[#allocation2 + $0xf8] sm:$0xff] }
 0x22c   : > { %v1979_v49 = vpop.permute.xlu1 %1978  ;;  %v2360_v29 = vsel %vm2353_vm15, %v2327_v21, %v4810_v20 }
 0x22d   : > { %v1853_v56 = vpop.permute.xlu0 %1852  ;;  %v2393_v58 = vsel %vm2386_vm2, %v2360_v29, %v1979_v49 }
 0x22e   : > { %1870 = vrot.lane.b32.xlu1 %v4832_v60, %s4073_s22  ;;  %v2361_v59 = vsel %vm2353_vm15, %v2328_v24, %v1853_v56 }
 0x22f   : > { %1744 = vrot.lane.b32.xlu0 %v1054_v11, %s4070_s27  ;;  %v2394_v47 = vsel %vm2386_vm2, %v2361_v59, %v4792_v44  ;;  %v4910_v59 = vld [vmem:[#allocation2 + $0x108] sm:$0xff] }
 0x230   : > { %v4847_v39 = vpop.permute.xlu1 %1598  ;;  %v2427_v44 = vsel %vm2419_vm3, %v2394_v47, %v4801_v22 }
 0x231   : > { %v1473_v62 = vpop.permute.xlu0 %1472  ;;  %v2296_v29 = vsel %vm380_vm0, %v2264_v35, %v4847_v39 }
 0x232   : > { %1490 = vrot.lane.b32.xlu1 %v4832_v60, %s4071_s11  ;;  %v2265_v24 = vsel %vm2255_vm12, %v2232_v13, %v1473_v62 }
 0x233   : > { %1364 = vrot.lane.b32.xlu0 %v1054_v11, %s4066_s17  ;;  %v2297_v46 = vsel %vm380_vm0, %v2265_v24, %v4794_v36  ;;  %v1153_v24 = vld [vmem:[#allocation2 + $0x112] sm:$0xff] }
 0x234   : > { %v2107_v55 = vpop.permute.xlu1 %2106  ;;  %v2330_v36 = vsel %vm2320_vm14, %v2297_v46, %v4808_v1 }
 0x235   : > { %v4867_v15 = vpop.permute.xlu0 %1218  ;;  %v2426_v43 = vsel %vm2419_vm3, %v2393_v58, %v2107_v55  ;;  %v4937_v55 = vld [vmem:[#allocation2 + $0x110] sm:$0xff] }
 0x236   : > { %1998 = vrot.lane.b32.xlu1 %v1118_v52, %s4072_s20  ;;  %3826 = vmatprep.mubr.msk.f32.mxu1 %vm2468_vm4, %v2426_v43  ;;  %v1120_v43 = vld [vmem:[#allocation2 + $0x109] sm:$0xff] }
 0x237   : > { %1872 = vrot.lane.b32.xlu0 %v4870_v25, %s4073_s22  ;;  %3827 = vmatmul.mubr.msk.f32.gmra.mrb[22].mxu1 %vm2468_vm4, %v2427_v44 }
 0x238   : > { %v4879_v17 = vpop.permute.xlu1 %1346 }
 0x239   : > { %v1727_v20 = vpop.permute.xlu0 %1726 }
 0x23a   : > { %1618 = vrot.lane.b32.xlu1 %v1118_v52, %s4068_s25  ;;  %v2329_v19 = vsel %vm2320_vm14, %v2296_v29, %v1727_v20 }
 0x23b   : > { %1492 = vrot.lane.b32.xlu0 %v4870_v25, %s4071_s11 }
 0x23c   : > { %v4884_v49 = vpop.permute.xlu1 %1604 }
 0x23d   : > { %v1985_v56 = vpop.permute.xlu0 %1984 }
 0x23e   : > { %2126 = vrot.lane.b32.xlu1 %v1150_v48, %s4069_s26 }
 0x23f   : > { %2000 = vrot.lane.b32.xlu0 %v1119_v27, %s4072_s20 }
 0x240   : > { %v2113_v12 = vpop.permute.xlu1 %2112 }
 0x241   : > { %v4888_v22 = vpop.permute.xlu0 %1224 }
 0x242   : > { %1620 = vrot.lane.b32.xlu1 %v1119_v27, %s4068_s25 }
 0x243   : > { %1238 = vrot.lane.b32.xlu0 %v1118_v52, %s4067_s18 }
 0x244   : > { %v1855_v40 = vpop.permute.xlu1 %1854 }
 0x245   : > { %v4892_v11 = vpop.permute.xlu0 %1732  ;;  %v2362_v31 = vsel %vm2353_vm15, %v2329_v19, %v1855_v40  ;;  %v1152_v40 = vld [vmem:[#allocation2 + $0x10a] sm:$0xff] }
 0x246   : > { %2128 = vrot.lane.b32.xlu1 %v1151_v23, %s4069_s26 }
 0x247   : > { %1746 = vrot.lane.b32.xlu0 %v1150_v48, %s4070_s27 }
 0x248   : > { %v4901_v26 = vpop.permute.xlu1 %1474 }
 0x249   : > { %v4899_v41 = vpop.permute.xlu0 %1352 }
 0x24a   : > { %1366 = vrot.lane.b32.xlu1 %v1150_v48, %s4066_s17  ;;  %v1121_v48 = vld [vmem:[#allocation2 + $0x111] sm:$0xff] }
 0x24b   : > { %1240 = vrot.lane.b32.xlu0 %v1119_v27, %s4067_s18 }
 0x24c   : > { %v1983_v54 = vpop.permute.xlu1 %1982 }
 0x24d   : > { %v1857_v14 = vpop.permute.xlu0 %1856  ;;  %v2395_v1 = vsel %vm2386_vm2, %v2362_v31, %v1983_v54 }
 0x24e   : > { %1874 = vrot.lane.b32.xlu1 %v4910_v59, %s4073_s22  ;;  %v2363_v37 = vsel %vm2353_vm15, %v2330_v36, %v1857_v14  ;;  %v2201_v14 = vsel %vm798_vm1, %v4567_v10, %v4799_v33  ;;  %v2200_v10 = vsel %vm798_vm1, %v4551_v5, %v4867_v15 }
 0x24f   : > { %1748 = vrot.lane.b32.xlu0 %v1151_v23, %s4070_s27  ;;  %v2396_v57 = vsel %vm2386_vm2, %v2363_v37, %v1985_v56  ;;  %v2234_v42 = vsel %vm2222_vm13, %v2201_v14, %v4819_v28  ;;  %v4976_v37 = vld [vmem:[#allocation2 + $0x120] sm:$0xff]  ;;  %v2233_v33 = vsel %vm2222_vm13, %v2200_v10, %v4879_v17 }
 0x250   : > { %v1603_v21 = vpop.permute.xlu1 %1602  ;;  %v2429_v52 = vsel %vm2419_vm3, %v2396_v57, %v2113_v12  ;;  %v2266_v28 = vsel %vm2255_vm12, %v2233_v33, %v4901_v26 }
 0x251   : > { %v1477_v62 = vpop.permute.xlu0 %1476  ;;  %v2298_v31 = vsel %vm380_vm0, %v2266_v28, %v1603_v21 }
 0x252   : > { %1494 = vrot.lane.b32.xlu1 %v4910_v59, %s4071_s11  ;;  %v2267_v16 = vsel %vm2255_vm12, %v2234_v42, %v1477_v62 }
 0x253   : > { %1368 = vrot.lane.b32.xlu0 %v1151_v23, %s4066_s17  ;;  %v2299_v29 = vsel %vm380_vm0, %v2267_v16, %v4884_v49  ;;  %v1155_v16 = vld [vmem:[#allocation2 + $0x12a] sm:$0xff] }
 0x254   : > { %v2111_v58 = vpop.permute.xlu1 %2110  ;;  %v2332_v49 = vsel %vm2320_vm14, %v2299_v29, %v4892_v11 }
 0x255   : > { %v4934_v47 = vpop.permute.xlu0 %1222  ;;  %v2428_v39 = vsel %vm2419_vm3, %v2395_v1, %v2111_v58  ;;  %v5002_v58 = vld [vmem:[#allocation2 + $0x128] sm:$0xff] }
 0x256   : > { %2002 = vrot.lane.b32.xlu1 %v1120_v43, %s4072_s20  ;;  %3829 = vmatprep.mubr.msk.f32.mxu1 %vm2468_vm4, %v2428_v39  ;;  %v1122_v39 = vld [vmem:[#allocation2 + $0x121] sm:$0xff] }
 0x257   : > { %1876 = vrot.lane.b32.xlu0 %v4937_v55, %s4073_s22  ;;  %3830 = vmatmul.mubr.msk.f32.gmra.mrb[24].mxu1 %vm2468_vm4, %v2429_v52 }
 0x258   : > { %v4945_v20 = vpop.permute.xlu1 %1350 }
 0x259   : > { %v1731_v44 = vpop.permute.xlu0 %1730 }
 0x25a   : > { %1622 = vrot.lane.b32.xlu1 %v1120_v43, %s4068_s25  ;;  %v2331_v15 = vsel %vm2320_vm14, %v2298_v31, %v1731_v44 }
 0x25b   : > { %1496 = vrot.lane.b32.xlu0 %v4937_v55, %s4071_s11 }
 0x25c   : > { %v4950_v27 = vpop.permute.xlu1 %1608 }
 0x25d   : > { %v1989_v56 = vpop.permute.xlu0 %1988 }
 0x25e   : > { %2130 = vrot.lane.b32.xlu1 %v1152_v40, %s4069_s26 }
 0x25f   : > { %2004 = vrot.lane.b32.xlu0 %v1121_v48, %s4072_s20 }
 0x260   : > { %v2117_v23 = vpop.permute.xlu1 %2116 }
 0x261   : > { %v4954_v12 = vpop.permute.xlu0 %1228 }
 0x262   : > { %1624 = vrot.lane.b32.xlu1 %v1121_v48, %s4068_s25 }
 0x263   : > { %1242 = vrot.lane.b32.xlu0 %v1120_v43, %s4067_s18 }
 0x264   : > { %v1859_v13 = vpop.permute.xlu1 %1858 }
 0x265   : > { %v4958_v53 = vpop.permute.xlu0 %1736  ;;  %v2364_v17 = vsel %vm2353_vm15, %v2331_v15, %v1859_v13  ;;  %v1154_v13 = vld [vmem:[#allocation2 + $0x122] sm:$0xff] }
 0x266   : > { %2132 = vrot.lane.b32.xlu1 %v1153_v24, %s4069_s26 }
 0x267   : > { %1750 = vrot.lane.b32.xlu0 %v1152_v40, %s4070_s27 }
 0x268   : > { %v4967_v46 = vpop.permute.xlu1 %1478 }
 0x269   : > { %v4965_v54 = vpop.permute.xlu0 %1356 }
 0x26a   : > { %1370 = vrot.lane.b32.xlu1 %v1152_v40, %s4066_s17  ;;  %v1123_v40 = vld [vmem:[#allocation2 + $0x129] sm:$0xff] }
 0x26b   : > { %1244 = vrot.lane.b32.xlu0 %v1121_v48, %s4067_s18 }
 0x26c   : > { %v1987_v36 = vpop.permute.xlu1 %1986 }
 0x26d   : > { %v1861_v35 = vpop.permute.xlu0 %1860  ;;  %v2397_v57 = vsel %vm2386_vm2, %v2364_v17, %v1987_v36 }
 0x26e   : > { %1878 = vrot.lane.b32.xlu1 %v4976_v37, %s4073_s22  ;;  %v2365_v5 = vsel %vm2353_vm15, %v2332_v49, %v1861_v35  ;;  %v2203_v35 = vsel %vm798_vm1, %v4639_v30, %v4888_v22  ;;  %v2202_v30 = vsel %vm798_vm1, %v4618_v18, %v4934_v47 }
 0x26f   : > { %1752 = vrot.lane.b32.xlu0 %v1153_v24, %s4070_s27  ;;  %v2398_v26 = vsel %vm2386_vm2, %v2365_v5, %v1989_v56  ;;  %v2236_v10 = vsel %vm2222_vm13, %v2203_v35, %v4899_v41  ;;  %v5033_v5 = vld [vmem:[#allocation2 + $0x138] sm:$0xff]  ;;  %v2235_v22 = vsel %vm2222_vm13, %v2202_v30, %v4945_v20  ;;  %v2205_v41 = vsel %vm798_vm1, %v4711_v2, %v4954_v12 }
 0x270   : > { %v1607_v19 = vpop.permute.xlu1 %1606  ;;  %v2431_v43 = vsel %vm2419_vm3, %v2398_v26, %v2117_v23 }
 0x271   : > { %v1481_v62 = vpop.permute.xlu0 %1480 }
 0x272   : > { %1498 = vrot.lane.b32.xlu1 %v4976_v37, %s4071_s11  ;;  %v2269_v33 = vsel %vm2255_vm12, %v2236_v10, %v1481_v62  ;;  %v2268_v62 = vsel %vm2255_vm12, %v2235_v22, %v4967_v46  ;;  %v1156_v10 = vld [vmem:[#allocation2 + $0x13a] sm:$0xff] }
 0x273   : > { %1372 = vrot.lane.b32.xlu0 %v1153_v24, %s4066_s17  ;;  %v2301_v31 = vsel %vm380_vm0, %v2269_v33, %v4950_v27  ;;  %v2238_v27 = vsel %vm2222_vm13, %v2205_v41, %v4965_v54  ;;  %v2300_v17 = vsel %vm380_vm0, %v2268_v62, %v1607_v19 }
 0x274   : > { %v2115_v1 = vpop.permute.xlu1 %2114  ;;  %v2334_v18 = vsel %vm2320_vm14, %v2301_v31, %v4958_v53  ;;  %v1157_v31 = vld [vmem:[#allocation2 + $0x142] sm:$0xff] }
 0x275   : > { %v4999_v11 = vpop.permute.xlu0 %1226  ;;  %v2430_v21 = vsel %vm2419_vm3, %v2397_v57, %v2115_v1 }
 0x276   : > { %2006 = vrot.lane.b32.xlu1 %v1122_v39, %s4072_s20  ;;  %3832 = vmatprep.mubr.msk.f32.mxu1 %vm2468_vm4, %v2430_v21  ;;  %v2204_v1 = vsel %vm798_vm1, %v4691_v45, %v4999_v11 }
 0x277   : > { %1880 = vrot.lane.b32.xlu0 %v5002_v58, %s4073_s22  ;;  %3833 = vmatmul.mubr.msk.f32.gmra.mrb[26].mxu1 %vm2468_vm4, %v2431_v43  ;;  %v5068_v43 = vld [vmem:[#allocation2 + $0x140] sm:$0xff] }
 0x278   : > { %v1355_v44 = vpop.permute.xlu1 %1354 }
 0x279   : > { %v1735_v52 = vpop.permute.xlu0 %1734 }
 0x27a   : > { %1626 = vrot.lane.b32.xlu1 %v1122_v39, %s4068_s25  ;;  %v2333_v57 = vsel %vm2320_vm14, %v2300_v17, %v1735_v52  ;;  %v1124_v52 = vld [vmem:[#allocation2 + $0x139] sm:$0xff] }
 0x27b   : > { %1500 = vrot.lane.b32.xlu0 %v5002_v58, %s4071_s11 }
 0x27c   : > { %v1613_v48 = vpop.permute.xlu1 %1612 }
 0x27d   : > { %v1993_v56 = vpop.permute.xlu0 %1992 }
 0x27e   : > { %2134 = vrot.lane.b32.xlu1 %v1154_v13, %s4069_s26 }
 0x27f   : > { %2008 = vrot.lane.b32.xlu0 %v1123_v40, %s4072_s20 }
 0x280   : > { %v2121_v23 = vpop.permute.xlu1 %2120 }
 0x281   : > { %v5015_v24 = vpop.permute.xlu0 %1232 }
 0x282   : > { %1628 = vrot.lane.b32.xlu1 %v1123_v40, %s4068_s25 }
 0x283   : > { %1246 = vrot.lane.b32.xlu0 %v1122_v39, %s4067_s18 }
 0x284   : > { %v1863_v42 = vpop.permute.xlu1 %1862 }
 0x285   : > { %v1741_v14 = vpop.permute.xlu0 %1740  ;;  %v2366_v12 = vsel %vm2353_vm15, %v2333_v57, %v1863_v42 }
 0x286   : > { %2136 = vrot.lane.b32.xlu1 %v1155_v16, %s4069_s26 }
 0x287   : > { %1754 = vrot.lane.b32.xlu0 %v1154_v13, %s4070_s27 }
 0x288   : > { %v1483_v29 = vpop.permute.xlu1 %1482 }
 0x289   : > { %v5024_v36 = vpop.permute.xlu0 %1360 }
 0x28a   : > { %1374 = vrot.lane.b32.xlu1 %v1154_v13, %s4066_s17 }
 0x28b   : > { %1248 = vrot.lane.b32.xlu0 %v1123_v40, %s4067_s18 }
 0x28c   : > { %v1991_v49 = vpop.permute.xlu1 %1990 }
 0x28d   : > { %v1865_v28 = vpop.permute.xlu0 %1864  ;;  %v2399_v54 = vsel %vm2386_vm2, %v2366_v12, %v1991_v49 }
 0x28e   : > { %1882 = vrot.lane.b32.xlu1 %v5033_v5, %s4073_s22  ;;  %v2367_v26 = vsel %vm2353_vm15, %v2334_v18, %v1865_v28 }
 0x28f   : > { %1756 = vrot.lane.b32.xlu0 %v1155_v16, %s4070_s27  ;;  %v2400_v53 = vsel %vm2386_vm2, %v2367_v26, %v1993_v56  ;;  %v5131_v26 = vld [vmem:[#allocation2 + $0x150] sm:$0xff] }
 0x290   : > { %v1611_v15 = vpop.permute.xlu1 %1610  ;;  %v2433_v45 = vsel %vm2419_vm3, %v2400_v53, %v2121_v23 }
 0x291   : > { %v1485_v47 = vpop.permute.xlu0 %1484 }
 0x292   : > { %v2271_v20 = vsel %vm2255_vm12, %v2238_v27, %v1485_v47  ;;  %1502 = vrot.lane.b32.xlu1 %v5033_v5, %s4071_s11  ;;  %v5119_v27 = vld [vmem:[%s5729_s4] ss:$0 sm:$0xff] }
 0x293   : > { %v2303_v2 = vsel %vm380_vm0, %v2271_v20, %v1613_v48  ;;  %1376 = vrot.lane.b32.xlu0 %v1155_v16, %s4066_s17  ;;  %v2237_v48 = vsel %vm2222_vm13, %v2204_v1, %v1355_v44  ;;  %v2207_v20 = vsel %vm798_vm1, %v4787_v51, %v5015_v24 }
 0x294   : > { %v2119_v19 = vpop.permute.xlu1 %2118  ;;  %v2336_v21 = vsel %vm2320_vm14, %v2303_v2, %v1741_v14  ;;  %v2270_v56 = vsel %vm2255_vm12, %v2237_v48, %v1483_v29  ;;  %v2240_v12 = vsel %vm2222_vm13, %v2207_v20, %v5024_v36 }
 0x295   : > { %v1231_v46 = vpop.permute.xlu0 %1230  ;;  %v2432_v39 = vsel %vm2419_vm3, %v2399_v54, %v2119_v19  ;;  %v2302_v11 = vsel %vm380_vm0, %v2270_v56, %v1611_v15  ;;  %v2369_v44 = vsel %vm2353_vm15, %v2336_v21, %v4541_v63 }
 0x296   : > { %2010 = vrot.lane.b32.xlu1 %v1124_v52, %s4072_s20  ;;  %3835 = vmatprep.mubr.msk.f32.mxu1 %vm2468_vm4, %v2432_v39  ;;  %v2402_v16 = vsel %vm2386_vm2, %v2369_v44, %v4521_v50  ;;  %v2206_v49 = vsel %vm798_vm1, %v4765_v32, %v1231_v46  ;;  %v5158_v39 = vld [vmem:[#allocation2 + $0x158] sm:$0xff] }
 0x297   : > { %1884 = vrot.lane.b32.xlu0 %v5068_v43, %s4073_s22  ;;  %3836 = vmatmul.mubr.msk.f32.gmra.mrb[28].mxu1 %vm2468_vm4, %v2433_v45 }
 0x298   : > { %v1359_v13 = vpop.permute.xlu1 %1358 }
 0x299   : > { %v1739_v40 = vpop.permute.xlu0 %1738  ;;  %v2239_v30 = vsel %vm2222_vm13, %v2206_v49, %v1359_v13 }
 0x29a   : > { %v2335_v14 = vsel %vm2320_vm14, %v2302_v11, %v1739_v40  ;;  %1630 = vrot.lane.b32.xlu1 %v1124_v52, %s4068_s25  ;;  %v2272_v41 = vsel %vm2255_vm12, %v2239_v30, %v4543_v0 }
 0x29b   : > { %v2368_v42 = vsel %vm2353_vm15, %v2335_v14, %v4537_v61  ;;  %1504 = vrot.lane.b32.xlu0 %v5068_v43, %s4071_s11  ;;  %v1125_v61 = vld [vmem:[#allocation2 + $0x141] sm:$0xff]  ;;  %v2304_v62 = vsel %vm380_vm0, %v2272_v41, %v4558_v7  ;;  %v1127_v14 = vld [vmem:[#allocation2 + $0x159] sm:$0xff] }
 0x29c   : > { %v2401_v23 = vsel %vm2386_vm2, %v2368_v42, %v4549_v4  ;;  %v5093_v29 = vpop.permute.xlu1 %1362  ;;  %v2435_v4 = vsel %vm2419_vm3, %v2402_v16, %v4496_v38  ;;  %v2337_v7 = vsel %vm2320_vm14, %v2304_v62, %v4563_v8  ;;  %v2273_v8 = vsel %vm2255_vm12, %v2240_v12, %v4547_v3  ;;  %v1126_v3 = vld [vmem:[#allocation2 + $0x151] sm:$0xff]  ;;  %v896_v12 = vld [vmem:[#allocation2 + $0xe0] sm:$0xff] }
 0x29d   : > { %v5091_v35 = vpop.permute.xlu0 %1236  ;;  %v2434_v63 = vsel %vm2419_vm3, %v2401_v23, %v4565_v9  ;;  %v1158_v42 = vld [vmem:[#allocation2 + $0x152] sm:$0xff] }
 0x29e   : > { %3838 = vmatprep.mubr.msk.f32.mxu1 %vm2468_vm4, %v2434_v63  ;;  %2138 = vrot.lane.b32.xlu1 %v1156_v10, %s4069_s26 }
 0x29f   : > { %2012 = vrot.lane.b32.xlu0 %v1125_v61, %s4072_s20  ;;  %3839 = vmatmul.mubr.msk.f32.gmra.mrb[30].mxu1 %vm2468_vm4, %v2435_v4 }
 0x2a0   : > { %v1871_v33 = vpop.permute.xlu1 %1870 }
 0x2a1   : > { %v1745_v50 = vpop.permute.xlu0 %1744  ;;  %v2370_v53 = vsel %vm2353_vm15, %v2337_v7, %v1871_v33  ;;  %v3994_v33 = vld [vmem:[#allocation2 + $0xd8] sm:$0xff] }
 0x2a2   : > { %1632 = vrot.lane.b32.xlu1 %v1125_v61, %s4068_s25  ;;  %v2208_v49 = vsel %vm798_vm1, %v3994_v33, %v4556_v6 }
 0x2a3   : > { %1250 = vrot.lane.b32.xlu0 %v1124_v52, %s4067_s18  ;;  %v2305_v52 = vsel %vm380_vm0, %v2273_v8, %v4487_v34  ;;  %v2241_v30 = vsel %vm2222_vm13, %v2208_v49, %v5093_v29  ;;  %v5228_v8 = vld [vmem:[#allocation2 + $0x170] sm:$0xff] }
 0x2a4   : > { %v5107_v28 = vpop.permute.xlu1 %1490  ;;  %v2338_v48 = vsel %vm2320_vm14, %v2305_v52, %v1745_v50  ;;  %v1128_v52 = vld [vmem:[#allocation2 + $0x169] sm:$0xff] }
 0x2a5   : > { %v5105_v9 = vpop.permute.xlu0 %1364 }
 0x2a6   : > { %2140 = vrot.lane.b32.xlu1 %v1157_v31, %s4069_s26 }
 0x2a7   : > { %1758 = vrot.lane.b32.xlu0 %v1156_v10, %s4070_s27 }
 0x2a8   : > { %v1999_v22 = vpop.permute.xlu1 %1998 }
 0x2a9   : > { %v1873_v38 = vpop.permute.xlu0 %1872  ;;  %v2403_v51 = vsel %vm2386_vm2, %v2370_v53, %v1999_v22 }
 0x2aa   : > { %1378 = vrot.lane.b32.xlu1 %v1156_v10, %s4066_s17  ;;  %v3819_v32 = vpop.f32.mrb[16].mxu1  ;;  %v2371_v56 = vsel %vm2353_vm15, %v2338_v48, %v1873_v38  ;;  %v1159_v10 = vld [vmem:[#allocation2 + $0x15a] sm:$0xff] }
 0x2ab   : > { %1252 = vrot.lane.b32.xlu0 %v1125_v61, %s4067_s18  ;;  %v2637_v18 = vadd.f32 %v3819_v32, %v5119_v27  ;;  %v2631_v47 = vpop.f32.mrb[17].mxu1  ;;  %v2274_v32 = vsel %vm2255_vm12, %v2241_v30, %v5107_v28 }
 0x2ac   : > { %v2632_v0 = vadd.f32 %v5119_v27, %v2631_v47  ;;  %v5129_v17 = vpop.permute.xlu1 %1618  ;;  %v5204_v47 = vld [vmem:[#allocation2 + $0x168] sm:$0xff] }
 0x2ad   : > { %v5126_v15 = vpop.permute.xlu0 %1492  ;;  %v2823_v57 = vmul.f32 0.01, %v2637_v18  ;;  %vm2791_vm8 = vcmp.ge.f32.partialorder %v2637_v18, 0.0  ;;  %v2306_v6 = vsel %vm380_vm0, %v2274_v32, %v5129_v17 }
 0x2ae   : > { %1886 = vrot.lane.b32.xlu1 %v5131_v26, %s4073_s22  ;;  %vm2790_vm9 = vcmp.ge.f32.partialorder %v2632_v0, 0.0  ;;  %v2822_v2 = vmul.f32 0.01, %v2632_v0 }
 0x2af   : > { %1760 = vrot.lane.b32.xlu0 %v1157_v31, %s4070_s27  ;;  %v2855_v19 = vsel %vm2791_vm8, %v2637_v18, %v2823_v57 }
 0x2b0   : > { %v2127_v24 = vpop.permute.xlu1 %2126  ;;  %v2854_v46 = vsel %vm2790_vm9, %v2632_v0, %v2822_v2 }
 0x2b1   : > { %v2001_v54 = vpop.permute.xlu0 %2000  ;;  %v2436_v1 = vsel %vm2419_vm3, %v2403_v51, %v2127_v24  ;;  %3867 = vmatprep.mubr.msk.f32.mxu0 %vm798_vm1, %v2854_v46 }
 0x2b2   : > { %3868 = vmatmul.mubr.msk.f32.vlgmr.msra.gmra.mrb[16].mxu0 %vm798_vm1, %v2855_v19  ;;  %1506 = vrot.lane.b32.xlu1 %v5131_v26, %s4071_s11  ;;  %v2404_v11 = vsel %vm2386_vm2, %v2371_v56, %v2001_v54  ;;  %v2209_v54 = vsel %vm798_vm1, %v896_v12, %v5091_v35 }
 0x2b3   : > { %1380 = vrot.lane.b32.xlu0 %v1157_v31, %s4066_s17  ;;  %3841 = vmatprep.mubr.msk.f32.mxu1 %vm2468_vm4, %v2436_v1  ;;  %v2242_v24 = vsel %vm2222_vm13, %v2209_v54, %v5105_v9 }
 0x2b4   : > { %v5156_v21 = vpop.permute.xlu1 %1620  ;;  %v2275_v19 = vsel %vm2255_vm12, %v2242_v24, %v5126_v15  ;;  %v1099_v24 = vld [vmem:[#allocation2 + $0x188] sm:$0xff] }
 0x2b5   : > { %v5154_v36 = vpop.permute.xlu0 %1238  ;;  %v2307_v35 = vsel %vm380_vm0, %v2275_v19, %v5156_v21 }
 0x2b6   : > { %2014 = vrot.lane.b32.xlu1 %v1126_v3, %s4072_s20  ;;  %v2210_v33 = vsel %vm798_vm1, %v4832_v60, %v5154_v36  ;;  %v1098_v36 = vld [vmem:[#allocation2 + $0x180] sm:$0xff] }
 0x2b7   : > { %1888 = vrot.lane.b32.xlu0 %v5158_v39, %s4073_s22 }
 0x2b8   : > { %v2129_v40 = vpop.permute.xlu1 %2128 }
 0x2b9   : > { %v1747_v45 = vpop.permute.xlu0 %1746  ;;  %v2437_v13 = vsel %vm2419_vm3, %v2404_v11, %v2129_v40  ;;  %v1129_v40 = vld [vmem:[#allocation2 + $0x171] sm:$0xff] }
 0x2ba   : > { %1634 = vrot.lane.b32.xlu1 %v1126_v3, %s4068_s25  ;;  %3842 = vmatmul.mubr.msk.f32.gmra.mrb[32].mxu1 %vm2468_vm4, %v2437_v13  ;;  %v2339_v29 = vsel %vm2320_vm14, %v2306_v6, %v1747_v45  ;;  %v1160_v13 = vld [vmem:[#allocation2 + $0x16a] sm:$0xff] }
 0x2bb   : > { %1508 = vrot.lane.b32.xlu0 %v5158_v39, %s4071_s11 }
 0x2bc   : > { %v5175_v44 = vpop.permute.xlu1 %1366 }
 0x2bd   : > { %v5173_v34 = vpop.permute.xlu0 %1240 }
 0x2be   : > { %2142 = vrot.lane.b32.xlu1 %v1158_v42, %s4069_s26 }
 0x2bf   : > { %2016 = vrot.lane.b32.xlu0 %v1127_v14, %s4072_s20 }
 0x2c0   : > { %v1875_v16 = vpop.permute.xlu1 %1874 }
 0x2c1   : > { %v1749_v23 = vpop.permute.xlu0 %1748  ;;  %v2372_v28 = vsel %vm2353_vm15, %v2339_v29, %v1875_v16 }
 0x2c2   : > { %1636 = vrot.lane.b32.xlu1 %v1127_v14, %s4068_s25  ;;  %v2340_v9 = vsel %vm2320_vm14, %v2307_v35, %v1749_v23 }
 0x2c3   : > { %1254 = vrot.lane.b32.xlu0 %v1126_v3, %s4067_s18 }
 0x2c4   : > { %v5183_v61 = vpop.permute.xlu1 %1494 }
 0x2c5   : > { %v5181_v63 = vpop.permute.xlu0 %1368 }
 0x2c6   : > { %2144 = vrot.lane.b32.xlu1 %v1159_v10, %s4069_s26 }
 0x2c7   : > { %1762 = vrot.lane.b32.xlu0 %v1158_v42, %s4070_s27 }
 0x2c8   : > { %v2003_v50 = vpop.permute.xlu1 %2002 }
 0x2c9   : > { %v1877_v4 = vpop.permute.xlu0 %1876  ;;  %v2405_v7 = vsel %vm2386_vm2, %v2372_v28, %v2003_v50 }
 0x2ca   : > { %1382 = vrot.lane.b32.xlu1 %v1158_v42, %s4066_s17  ;;  %v3822_v31 = vpop.f32.mrb[18].mxu1  ;;  %v2373_v3 = vsel %vm2353_vm15, %v2340_v9, %v1877_v4 }
 0x2cb   : > { %1256 = vrot.lane.b32.xlu0 %v1127_v14, %s4067_s18  ;;  %v2647_v38 = vadd.f32 %v3822_v31, %v5119_v27  ;;  %v2641_v22 = vpop.f32.mrb[19].mxu1  ;;  %v2243_v31 = vsel %vm2222_vm13, %v2210_v33, %v5175_v44 }
 0x2cc   : > { %v2642_v62 = vadd.f32 %v5119_v27, %v2641_v22  ;;  %v5199_v18 = vpop.permute.xlu1 %1622  ;;  %v2276_v32 = vsel %vm2255_vm12, %v2243_v31, %v5183_v61  ;;  %v1132_v31 = vld [vmem:[#allocation2 + $0x199] sm:$0xff] }
 0x2cd   : > { %v5194_v41 = vpop.permute.xlu0 %1496  ;;  %v2825_v0 = vmul.f32 0.01, %v2647_v38  ;;  %vm2793_vm11 = vcmp.ge.f32.partialorder %v2647_v38, 0.0  ;;  %v2308_v60 = vsel %vm380_vm0, %v2276_v32, %v5199_v18 }
 0x2ce   : > { %vm2792_vm10 = vcmp.ge.f32.partialorder %v2642_v62, 0.0  ;;  %v2824_v20 = vmul.f32 0.01, %v2642_v62  ;;  %1890 = vrot.lane.b32.xlu1 %v5204_v47, %s4073_s22 }
 0x2cf   : > { %1764 = vrot.lane.b32.xlu0 %v1159_v10, %s4070_s27  ;;  %v2857_v51 = vsel %vm2793_vm11, %v2647_v38, %v2825_v0 }
 0x2d0   : > { %v2131_v2 = vpop.permute.xlu1 %2130  ;;  %v2856_v17 = vsel %vm2792_vm10, %v2642_v62, %v2824_v20 }
 0x2d1   : > { %v2005_v57 = vpop.permute.xlu0 %2004  ;;  %v2438_v53 = vsel %vm2419_vm3, %v2405_v7, %v2131_v2  ;;  %3870 = vmatprep.mubr.msk.f32.mxu0 %vm798_vm1, %v2856_v17  ;;  %v2211_v2 = vsel %vm798_vm1, %v4870_v25, %v5173_v34  ;;  %v1130_v34 = vld [vmem:[#allocation2 + $0x181] sm:$0xff] }
 0x2d2   : > { %1510 = vrot.lane.b32.xlu1 %v5204_v47, %s4071_s11  ;;  %3844 = vmatprep.mubr.msk.f32.mxu1 %vm2468_vm4, %v2438_v53  ;;  %v2406_v15 = vsel %vm2386_vm2, %v2373_v3, %v2005_v57  ;;  %v2244_v12 = vsel %vm2222_vm13, %v2211_v2, %v5181_v63 }
 0x2d3   : > { %1384 = vrot.lane.b32.xlu0 %v1159_v10, %s4066_s17  ;;  %3871 = vmatmul.mubr.msk.f32.gmra.mrb[18].mxu0 %vm798_vm1, %v2857_v51  ;;  %v1161_v10 = vld [vmem:[#allocation2 + $0x172] sm:$0xff]  ;;  %v2277_v54 = vsel %vm2255_vm12, %v2244_v12, %v5194_v41 }
 0x2d4   : > { %v5226_v1 = vpop.permute.xlu1 %1624 }
 0x2d5   : > { %v5222_v46 = vpop.permute.xlu0 %1242  ;;  %v2309_v25 = vsel %vm380_vm0, %v2277_v54, %v5226_v1 }
 0x2d6   : > { %2018 = vrot.lane.b32.xlu1 %v1128_v52, %s4072_s20  ;;  %v2212_v33 = vsel %vm798_vm1, %v4910_v59, %v5222_v46 }
 0x2d7   : > { %1892 = vrot.lane.b32.xlu0 %v5228_v8, %s4073_s22 }
 0x2d8   : > { %v2133_v56 = vpop.permute.xlu1 %2132 }
 0x2d9   : > { %v1751_v48 = vpop.permute.xlu0 %1750  ;;  %v2439_v45 = vsel %vm2419_vm3, %v2406_v15, %v2133_v56  ;;  %v1162_v15 = vld [vmem:[#allocation2 + $0x182] sm:$0xff] }
 0x2da   : > { %1638 = vrot.lane.b32.xlu1 %v1128_v52, %s4068_s25  ;;  %3845 = vmatmul.mubr.msk.f32.gmra.mrb[34].mxu1 %vm2468_vm4, %v2439_v45  ;;  %v2341_v44 = vsel %vm2320_vm14, %v2308_v60, %v1751_v48  ;;  %v1131_v48 = vld [vmem:[#allocation2 + $0x189] sm:$0xff]  ;;  %v1133_v60 = vld [vmem:[#allocation2 + $0x1a1] sm:$0xff] }
 0x2db   : > { %1512 = vrot.lane.b32.xlu0 %v5228_v8, %s4071_s11 }
 0x2dc   : > { %v5245_v11 = vpop.permute.xlu1 %1370 }
 0x2dd   : > { %v5243_v21 = vpop.permute.xlu0 %1244 }
 0x2de   : > { %2146 = vrot.lane.b32.xlu1 %v1160_v13, %s4069_s26  ;;  %v2213_v2 = vsel %vm798_vm1, %v4937_v55, %v5243_v21 }
 0x2df   : > { %2020 = vrot.lane.b32.xlu0 %v1129_v40, %s4072_s20 }
 0x2e0   : > { %v1879_v42 = vpop.permute.xlu1 %1878 }
 0x2e1   : > { %v1753_v14 = vpop.permute.xlu0 %1752  ;;  %v2374_v20 = vsel %vm2353_vm15, %v2341_v44, %v1879_v42  ;;  %v1100_v42 = vld [vmem:[#allocation2 + $0x198] sm:$0xff] }
 0x2e2   : > { %1640 = vrot.lane.b32.xlu1 %v1129_v40, %s4068_s25  ;;  %v2342_v19 = vsel %vm2320_vm14, %v2309_v25, %v1753_v14  ;;  %v1163_v14 = vld [vmem:[#allocation2 + $0x18a] sm:$0xff] }
 0x2e3   : > { %1258 = vrot.lane.b32.xlu0 %v1128_v52, %s4067_s18 }
 0x2e4   : > { %v5253_v16 = vpop.permute.xlu1 %1498 }
 0x2e5   : > { %v5251_v23 = vpop.permute.xlu0 %1372 }
 0x2e6   : > { %2148 = vrot.lane.b32.xlu1 %v1161_v10, %s4069_s26  ;;  %v2246_v12 = vsel %vm2222_vm13, %v2213_v2, %v5251_v23 }
 0x2e7   : > { %1766 = vrot.lane.b32.xlu0 %v1160_v13, %s4070_s27 }
 0x2e8   : > { %v2007_v50 = vpop.permute.xlu1 %2006 }
 0x2e9   : > { %v1881_v4 = vpop.permute.xlu0 %1880  ;;  %v2407_v28 = vsel %vm2386_vm2, %v2374_v20, %v2007_v50  ;;  %v1164_v20 = vld [vmem:[#allocation2 + $0x19a] sm:$0xff] }
 0x2ea   : > { %1386 = vrot.lane.b32.xlu1 %v1160_v13, %s4066_s17  ;;  %v3825_v49 = vpop.f32.mrb[20].mxu1  ;;  %v2375_v63 = vsel %vm2353_vm15, %v2342_v19, %v1881_v4  ;;  %v1101_v4 = vld [vmem:[#allocation2 + $0x1a0] sm:$0xff] }
 0x2eb   : > { %1260 = vrot.lane.b32.xlu0 %v1129_v40, %s4067_s18  ;;  %v2657_v30 = vadd.f32 %v3825_v49, %v5119_v27  ;;  %v2651_v38 = vpop.f32.mrb[21].mxu1 }
 0x2ec   : > { %v2652_v62 = vadd.f32 %v5119_v27, %v2651_v38  ;;  %v5270_v6 = vpop.permute.xlu1 %1626 }
 0x2ed   : > { %v5265_v22 = vpop.permute.xlu0 %1500  ;;  %v2827_v29 = vmul.f32 0.01, %v2657_v30  ;;  %vm2795_vm6 = vcmp.ge.f32.partialorder %v2657_v30, 0.0 }
 0x2ee   : > { %vm2794_vm5 = vcmp.ge.f32.partialorder %v2652_v62, 0.0  ;;  %v2826_v0 = vmul.f32 0.01, %v2652_v62  ;;  %1894 = vrot.lane.b32.xlu1 %v1098_v36, %s4073_s22 }
 0x2ef   : > { %1768 = vrot.lane.b32.xlu0 %v1161_v10, %s4070_s27  ;;  %v2859_v17 = vsel %vm2795_vm6, %v2657_v30, %v2827_v29  ;;  %v2245_v30 = vsel %vm2222_vm13, %v2212_v33, %v5245_v11 }
 0x2f0   : > { %v2135_v57 = vpop.permute.xlu1 %2134  ;;  %v2858_v7 = vsel %vm2794_vm5, %v2652_v62, %v2826_v0 }
 0x2f1   : > { %v2009_v61 = vpop.permute.xlu0 %2008  ;;  %v2440_v18 = vsel %vm2419_vm3, %v2407_v28, %v2135_v57  ;;  %3873 = vmatprep.mubr.msk.f32.mxu0 %vm798_vm1, %v2858_v7  ;;  %v1165_v28 = vld [vmem:[#allocation2 + $0x1a2] sm:$0xff] }
 0x2f2   : > { %1514 = vrot.lane.b32.xlu1 %v1098_v36, %s4071_s11  ;;  %3847 = vmatprep.mubr.msk.f32.mxu1 %vm2468_vm4, %v2440_v18  ;;  %v2408_v52 = vsel %vm2386_vm2, %v2375_v63, %v2009_v61  ;;  %v2278_v36 = vsel %vm2255_vm12, %v2245_v30, %v5253_v16 }
 0x2f3   : > { %1388 = vrot.lane.b32.xlu0 %v1161_v10, %s4066_s17  ;;  %3874 = vmatmul.mubr.msk.f32.gmra.mrb[20].mxu0 %vm798_vm1, %v2859_v17  ;;  %v2310_v59 = vsel %vm380_vm0, %v2278_v36, %v5270_v6  ;;  %s3632_s17 = sshll.u32 %s5742_s9, 8 }
 0x2f4   : > { %v5294_v51 = vpop.permute.xlu1 %1628 }
 0x2f5   : > { %v5290_v53 = vpop.permute.xlu0 %1246 }
 0x2f6   : > { %2022 = vrot.lane.b32.xlu1 %v1130_v34, %s4072_s20 }
 0x2f7   : > { %1896 = vrot.lane.b32.xlu0 %v1099_v24, %s4073_s22 }
 0x2f8   : > { %v2137_v9 = vpop.permute.xlu1 %2136 }
 0x2f9   : > { %v1755_v35 = vpop.permute.xlu0 %1754  ;;  %v2441_v41 = vsel %vm2419_vm3, %v2408_v52, %v2137_v9 }
 0x2fa   : > { %1642 = vrot.lane.b32.xlu1 %v1130_v34, %s4068_s25  ;;  %3848 = vmatmul.mubr.msk.f32.gmra.mrb[36].mxu1 %vm2468_vm4, %v2441_v41  ;;  %v2343_v46 = vsel %vm2320_vm14, %v2310_v59, %v1755_v35 }
 0x2fb   : > { %1516 = vrot.lane.b32.xlu0 %v1099_v24, %s4071_s11  ;;  %v2279_v24 = vsel %vm2255_vm12, %v2246_v12, %v5265_v22  ;;  %s5507_s11 = scalar_lea.vmem %s5732_s7, %s3632_s17 }
 0x2fc   : > { %v5309_v3 = vpop.permute.xlu1 %1374  ;;  %v2311_v34 = vsel %vm380_vm0, %v2279_v24, %v5294_v51 }
 0x2fd   : > { %v5307_v1 = vpop.permute.xlu0 %1248 }
 0x2fe   : > { %2150 = vrot.lane.b32.xlu1 %v1162_v15, %s4069_s26 }
 0x2ff   : > { %2024 = vrot.lane.b32.xlu0 %v1131_v48, %s4072_s20 }
 0x300   : > { %v1883_v45 = vpop.permute.xlu1 %1882 }
 0x301   : > { %v1757_v56 = vpop.permute.xlu0 %1756  ;;  %v2376_v61 = vsel %vm2353_vm15, %v2343_v46, %v1883_v45  ;;  %v2214_v45 = vsel %vm798_vm1, %v4976_v37, %v5290_v53 }
 0x302   : > { %1770 = vrot.lane.b32.xlu1 %v1162_v15, %s4070_s27  ;;  %v2344_v55 = vsel %vm2320_vm14, %v2311_v34, %v1757_v56 }
 0x303   : > { %1644 = vrot.lane.b32.xlu0 %v1131_v48, %s4068_s25 }
 0x304   : > { %v5317_v13 = vpop.permute.xlu1 %1502 }
 0x305   : > { %v5315_v40 = vpop.permute.xlu0 %1376 }
 0x306   : > { %1772 = vrot.lane.b32.xlu1 %v1163_v14, %s4070_s27 }
 0x307   : > { %2152 = vrot.lane.b32.xlu0 %v1163_v14, %s4069_s26 }
 0x308   : > { %v2011_v50 = vpop.permute.xlu1 %2010 }
 0x309   : > { %v1885_v10 = vpop.permute.xlu0 %1884  ;;  %v2409_v57 = vsel %vm2386_vm2, %v2376_v61, %v2011_v50 }
 0x30a   : > { %1900 = vrot.lane.b32.xlu1 %v1101_v4, %s4073_s22  ;;  %v3828_v49 = vpop.f32.mrb[22].mxu1  ;;  %v2377_v21 = vsel %vm2353_vm15, %v2344_v55, %v1885_v10 }
 0x30b   : > { %1898 = vrot.lane.b32.xlu0 %v1100_v42, %s4073_s22  ;;  %v2667_v38 = vadd.f32 %v3828_v49, %v5119_v27  ;;  %v2661_v32 = vpop.f32.mrb[23].mxu1  ;;  %v2247_v42 = vsel %vm2222_vm13, %v2214_v45, %v5309_v3 }
 0x30c   : > { %v2662_v44 = vadd.f32 %v5119_v27, %v2661_v32  ;;  %v1631_v29 = vpop.permute.xlu1 %1630  ;;  %v2280_v33 = vsel %vm2255_vm12, %v2247_v42, %v5317_v13 }
 0x30d   : > { %v5329_v62 = vpop.permute.xlu0 %1504  ;;  %v2829_v11 = vmul.f32 0.01, %v2667_v38  ;;  %vm2797_vm8 = vcmp.ge.f32.partialorder %v2667_v38, 0.0  ;;  %v2312_v30 = vsel %vm380_vm0, %v2280_v33, %v1631_v29  ;;  %v2215_v29 = vsel %vm798_vm1, %v5002_v58, %v5307_v1 }
 0x30e   : > { %vm2796_vm7 = vcmp.ge.f32.partialorder %v2662_v44, 0.0  ;;  %v2828_v0 = vmul.f32 0.01, %v2662_v44  ;;  %2028 = vrot.lane.b32.xlu1 %v1133_v60, %s4072_s20  ;;  %v2248_v46 = vsel %vm2222_vm13, %v2215_v29, %v5315_v40 }
 0x30f   : > { %2026 = vrot.lane.b32.xlu0 %v1132_v31, %s4072_s20  ;;  %v2861_v17 = vsel %vm2797_vm8, %v2667_v38, %v2829_v11 }
 0x310   : > { %v2139_v7 = vpop.permute.xlu1 %2138  ;;  %v2860_v18 = vsel %vm2796_vm7, %v2662_v44, %v2828_v0  ;;  %v2281_v0 = vsel %vm2255_vm12, %v2248_v46, %v5329_v62 }
 0x311   : > { %v2013_v16 = vpop.permute.xlu0 %2012  ;;  %v2442_v6 = vsel %vm2419_vm3, %v2409_v57, %v2139_v7  ;;  %3876 = vmatprep.mubr.msk.f32.mxu0 %vm798_vm1, %v2860_v18 }
 0x312   : > { %2156 = vrot.lane.b32.xlu1 %v1165_v28, %s4069_s26  ;;  %3850 = vmatprep.mubr.msk.f32.mxu1 %vm2468_vm4, %v2442_v6  ;;  %v2410_v63 = vsel %vm2386_vm2, %v2377_v21, %v2013_v16 }
 0x313   : > { %2154 = vrot.lane.b32.xlu0 %v1164_v20, %s4069_s26  ;;  %3877 = vmatmul.mubr.msk.f32.gmra.mrb[22].mxu0 %vm798_vm1, %v2861_v17 }
 0x314   : > { %v1633_v25 = vpop.permute.xlu1 %1632 }
 0x315   : > { %v5352_v54 = vpop.permute.xlu0 %1250  ;;  %v2313_v61 = vsel %vm380_vm0, %v2281_v0, %v1633_v25 }
 0x316   : > { %v2216_v25 = vsel %vm798_vm1, %v5033_v5, %v5352_v54 }
 0x318   : > { %v2141_v35 = vpop.permute.xlu1 %2140 }
 0x319   : > { %v1759_v19 = vpop.permute.xlu0 %1758  ;;  %v2443_v23 = vsel %vm2419_vm3, %v2410_v63, %v2141_v35 }
 0x31a   : > { %3851 = vmatmul.mubr.msk.f32.gmra.mrb[38].mxu1 %vm2468_vm4, %v2443_v23  ;;  %v2345_v37 = vsel %vm2320_vm14, %v2312_v30, %v1759_v19 }
 0x31c   : > { %v1379_v9 = vpop.permute.xlu1 %1378 }
 0x31d   : > { %v5363_v52 = vpop.permute.xlu0 %1252  ;;  %v2249_v55 = vsel %vm2222_vm13, %v2216_v25, %v1379_v9 }
 0x320   : > { %v1887_v41 = vpop.permute.xlu1 %1886 }
 0x321   : > { %v1761_v22 = vpop.permute.xlu0 %1760  ;;  %v2378_v3 = vsel %vm2353_vm15, %v2345_v37, %v1887_v41 }
 0x322   : > { %v2346_v16 = vsel %vm2320_vm14, %v2313_v61, %v1761_v22 }
 0x324   : > { %v1507_v51 = vpop.permute.xlu1 %1506 }
 0x325   : > { %v5365_v48 = vpop.permute.xlu0 %1380  ;;  %v2282_v35 = vsel %vm2255_vm12, %v2249_v55, %v1507_v51 }
 0x328   : > { %v2015_v56 = vpop.permute.xlu1 %2014 }
 0x329   : > { %v1889_v15 = vpop.permute.xlu0 %1888  ;;  %v2411_v60 = vsel %vm2386_vm2, %v2378_v3, %v2015_v56 }
 0x32a   : > { %v3831_v14 = vpop.f32.mrb[24].mxu1  ;;  %v2379_v28 = vsel %vm2353_vm15, %v2346_v16, %v1889_v15 }
 0x32b   : > { %v2677_v10 = vadd.f32 %v3831_v14, %v5119_v27  ;;  %v2671_v4 = vpop.f32.mrb[25].mxu1 }
 0x32c   : > { %v2672_v49 = vadd.f32 %v5119_v27, %v2671_v4  ;;  %v1635_v31 = vpop.permute.xlu1 %1634  ;;  %v2217_v4 = vsel %vm798_vm1, %v5068_v43, %v5363_v52 }
 0x32d   : > { %v5373_v50 = vpop.permute.xlu0 %1508  ;;  %v2831_v38 = vmul.f32 0.01, %v2677_v10  ;;  %vm2799_vm9 = vcmp.ge.f32.partialorder %v2677_v10, 0.0  ;;  %v2314_v41 = vsel %vm380_vm0, %v2282_v35, %v1635_v31  ;;  %v2250_v33 = vsel %vm2222_vm13, %v2217_v4, %v5365_v48 }
 0x32e   : > { %vm2798_vm10 = vcmp.ge.f32.partialorder %v2672_v49, 0.0  ;;  %v2830_v53 = vmul.f32 0.01, %v2672_v49  ;;  %v2283_v31 = vsel %vm2255_vm12, %v2250_v33, %v5373_v50 }
 0x32f   : > { %v2863_v59 = vsel %vm2799_vm9, %v2677_v10, %v2831_v38 }
 0x330   : > { %v2143_v36 = vpop.permute.xlu1 %2142  ;;  %v2862_v44 = vsel %vm2798_vm10, %v2672_v49, %v2830_v53 }
 0x331   : > { %v2017_v32 = vpop.permute.xlu0 %2016  ;;  %v2444_v13 = vsel %vm2419_vm3, %v2411_v60, %v2143_v36  ;;  %3879 = vmatprep.mubr.msk.f32.mxu0 %vm798_vm1, %v2862_v44 }
 0x332   : > { %3853 = vmatprep.mubr.msk.f32.mxu1 %vm2468_vm4, %v2444_v13  ;;  %3880 = vmatmul.mubr.msk.f32.gmra.mrb[24].mxu0 %vm798_vm1, %v2863_v59  ;;  %v2412_v1 = vsel %vm2386_vm2, %v2379_v28, %v2017_v32 }
 0x334   : > { %v1637_v20 = vpop.permute.xlu1 %1636 }
 0x335   : > { %v5391_v11 = vpop.permute.xlu0 %1254  ;;  %v2315_v38 = vsel %vm380_vm0, %v2283_v31, %v1637_v20 }
 0x336   : > { %v2218_v46 = vsel %vm798_vm1, %v5131_v26, %v5391_v11 }
 0x338   : > { %v2145_v57 = vpop.permute.xlu1 %2144 }
 0x339   : > { %v1763_v58 = vpop.permute.xlu0 %1762  ;;  %v2445_v7 = vsel %vm2419_vm3, %v2412_v1, %v2145_v57 }
 0x33a   : > { %3854 = vmatmul.mubr.msk.f32.gmra.mrb[40].mxu1 %vm2468_vm4, %v2445_v7  ;;  %v2347_v56 = vsel %vm2320_vm14, %v2314_v41, %v1763_v58 }
 0x33c   : > { %v1383_v18 = vpop.permute.xlu1 %1382 }
 0x33d   : > { %v5401_v40 = vpop.permute.xlu0 %1256  ;;  %v2251_v20 = vsel %vm2222_vm13, %v2218_v46, %v1383_v18 }
 0x340   : > { %v1891_v62 = vpop.permute.xlu1 %1890 }
 0x341   : > { %v1765_v6 = vpop.permute.xlu0 %1764  ;;  %v2380_v54 = vsel %vm2353_vm15, %v2347_v56, %v1891_v62 }
 0x342   : > { %v2348_v37 = vsel %vm2320_vm14, %v2315_v38, %v1765_v6 }
 0x344   : > { %v1511_v17 = vpop.permute.xlu1 %1510 }
 0x345   : > { %v5403_v2 = vpop.permute.xlu0 %1384  ;;  %v2284_v58 = vsel %vm2255_vm12, %v2251_v20, %v1511_v17  ;;  %v2219_v17 = vsel %vm798_vm1, %v5158_v39, %v5401_v40 }
 0x348   : > { %v2019_v24 = vpop.permute.xlu1 %2018 }
 0x349   : > { %v1893_v12 = vpop.permute.xlu0 %1892  ;;  %v2413_v45 = vsel %vm2386_vm2, %v2380_v54, %v2019_v24 }
 0x34a   : > { %v3834_v34 = vpop.f32.mrb[26].mxu1  ;;  %v2381_v53 = vsel %vm2353_vm15, %v2348_v37, %v1893_v12 }
 0x34b   : > { %v2687_v21 = vadd.f32 %v3834_v34, %v5119_v27  ;;  %v2681_v19 = vpop.f32.mrb[27].mxu1 }
 0x34c   : > { %v2682_v23 = vadd.f32 %v5119_v27, %v2681_v19  ;;  %v1639_v22 = vpop.permute.xlu1 %1638  ;;  %v2252_v19 = vsel %vm2222_vm13, %v2219_v17, %v5403_v2 }
 0x34d   : > { %v5410_v63 = vpop.permute.xlu0 %1512  ;;  %v2833_v15 = vmul.f32 0.01, %v2687_v21  ;;  %vm2801_vm11 = vcmp.ge.f32.partialorder %v2687_v21, 0.0  ;;  %v2316_v7 = vsel %vm380_vm0, %v2284_v58, %v1639_v22 }
 0x34e   : > { %vm2800_vm5 = vcmp.ge.f32.partialorder %v2682_v23, 0.0  ;;  %v2832_v5 = vmul.f32 0.01, %v2682_v23  ;;  %v2285_v22 = vsel %vm2255_vm12, %v2252_v19, %v5410_v63 }
 0x34f   : > { %v2865_v10 = vsel %vm2801_vm11, %v2687_v21, %v2833_v15 }
 0x350   : > { %v2147_v14 = vpop.permute.xlu1 %2146  ;;  %v2864_v42 = vsel %vm2800_vm5, %v2682_v23, %v2832_v5 }
 0x351   : > { %v2021_v9 = vpop.permute.xlu0 %2020  ;;  %v2446_v51 = vsel %vm2419_vm3, %v2413_v45, %v2147_v14  ;;  %3882 = vmatprep.mubr.msk.f32.mxu0 %vm798_vm1, %v2864_v42 }
 0x352   : > { %3856 = vmatprep.mubr.msk.f32.mxu1 %vm2468_vm4, %v2446_v51  ;;  %3883 = vmatmul.mubr.msk.f32.gmra.mrb[26].mxu0 %vm798_vm1, %v2865_v10  ;;  %v2414_v52 = vsel %vm2386_vm2, %v2381_v53, %v2021_v9 }
 0x354   : > { %v1641_v30 = vpop.permute.xlu1 %1640 }
 0x355   : > { %v5427_v49 = vpop.permute.xlu0 %1258  ;;  %v2317_v41 = vsel %vm380_vm0, %v2285_v22, %v1641_v30 }
 0x356   : > { %v2220_v33 = vsel %vm798_vm1, %v5204_v47, %v5427_v49 }
 0x358   : > { %v2149_v3 = vpop.permute.xlu1 %2148 }
 0x359   : > { %v1767_v43 = vpop.permute.xlu0 %1766  ;;  %v2447_v32 = vsel %vm2419_vm3, %v2414_v52, %v2149_v3 }
 0x35a   : > { %3857 = vmatmul.mubr.msk.f32.gmra.mrb[42].mxu1 %vm2468_vm4, %v2447_v32  ;;  %v2349_v62 = vsel %vm2320_vm14, %v2316_v7, %v1767_v43 }
 0x35c   : > { %v5439_v60 = vpop.permute.xlu1 %1386 }
 0x35d   : > { %v5437_v48 = vpop.permute.xlu0 %1260  ;;  %v2253_v30 = vsel %vm2222_vm13, %v2220_v33, %v5439_v60 }
 0x35e   : > { %v2221_v31 = vsel %vm798_vm1, %v5228_v8, %v5437_v48 }
 0x360   : > { %v1895_v36 = vpop.permute.xlu1 %1894 }
 0x361   : > { %v1769_v50 = vpop.permute.xlu0 %1768  ;;  %v2382_v11 = vsel %vm2353_vm15, %v2349_v62, %v1895_v36  ;;  %v5499_v36 = vld [vmem:[%s5731_s6] ss:$0 sm:$0xff] }
 0x362   : > { %v2350_v2 = vsel %vm2320_vm14, %v2317_v41, %v1769_v50 }
 0x364   : > { %v1515_v13 = vpop.permute.xlu1 %1514 }
 0x365   : > { %v1389_v44 = vpop.permute.xlu0 %1388  ;;  %v2286_v37 = vsel %vm2255_vm12, %v2253_v30, %v1515_v13 }
 0x366   : > { %v2254_v38 = vsel %vm2222_vm13, %v2221_v31, %v1389_v44 }
 0x368   : > { %v2023_v29 = vpop.permute.xlu1 %2022 }
 0x369   : > { %v1897_v59 = vpop.permute.xlu0 %1896  ;;  %v2415_v12 = vsel %vm2386_vm2, %v2382_v11, %v2023_v29 }
 0x36a   : > { %v3837_v0 = vpop.f32.mrb[28].mxu1  ;;  %v2383_v54 = vsel %vm2353_vm15, %v2350_v2, %v1897_v59 }
 0x36b   : > { %v2697_v61 = vadd.f32 %v3837_v0, %v5119_v27  ;;  %v2691_v16 = vpop.f32.mrb[29].mxu1 }
 0x36c   : > { %v2692_v1 = vadd.f32 %v5119_v27, %v2691_v16  ;;  %v1643_v57 = vpop.permute.xlu1 %1642 }
 0x36d   : > { %v1517_v28 = vpop.permute.xlu0 %1516  ;;  %v2835_v6 = vmul.f32 0.01, %v2697_v61  ;;  %vm2803_vm6 = vcmp.ge.f32.partialorder %v2697_v61, 0.0  ;;  %v2318_v52 = vsel %vm380_vm0, %v2286_v37, %v1643_v57 }
 0x36e   : > { %vm2802_vm7 = vcmp.ge.f32.partialorder %v2692_v1, 0.0  ;;  %v2834_v26 = vmul.f32 0.01, %v2692_v1  ;;  %v2287_v43 = vsel %vm2255_vm12, %v2254_v38, %v1517_v28 }
 0x36f   : > { %v2867_v21 = vsel %vm2803_vm6, %v2697_v61, %v2835_v6 }
 0x370   : > { %v2151_v24 = vpop.permute.xlu1 %2150  ;;  %v2866_v25 = vsel %vm2802_vm7, %v2692_v1, %v2834_v26 }
 0x371   : > { %v2025_v18 = vpop.permute.xlu0 %2024  ;;  %v2448_v34 = vsel %vm2419_vm3, %v2415_v12, %v2151_v24  ;;  %3885 = vmatprep.mubr.msk.f32.mxu0 %vm798_vm1, %v2866_v25 }
 0x372   : > { %v3840_v55 = vpop.f32.mrb[30].mxu1  ;;  %3859 = vmatprep.mubr.msk.f32.mxu1 %vm2468_vm4, %v2448_v34  ;;  %3886 = vmatmul.mubr.msk.f32.gmra.mrb[28].mxu0 %vm798_vm1, %v2867_v21  ;;  %v2416_v9 = vsel %vm2386_vm2, %v2383_v54, %v2025_v18 }
 0x373   : > { %v2707_v35 = vadd.f32 %v3840_v55, %v5119_v27  ;;  %v2701_v23 = vpop.f32.mrb[31].mxu1 }
 0x374   : > { %v2702_v39 = vadd.f32 %v5119_v27, %v2701_v23  ;;  %v1771_v56 = vpop.permute.xlu1 %1770 }
 0x375   : > { %v1645_v40 = vpop.permute.xlu0 %1644  ;;  %v2837_v15 = vmul.f32 0.01, %v2707_v35  ;;  %vm2805_vm8 = vcmp.ge.f32.partialorder %v2707_v35, 0.0  ;;  %v2351_v8 = vsel %vm2320_vm14, %v2318_v52, %v1771_v56 }
 0x376   : > { %vm2804_vm9 = vcmp.ge.f32.partialorder %v2702_v39, 0.0  ;;  %v2836_v5 = vmul.f32 0.01, %v2702_v39  ;;  %v2319_v49 = vsel %vm380_vm0, %v2287_v43, %v1645_v40 }
 0x377   : > { %v2869_v51 = vsel %vm2805_vm8, %v2707_v35, %v2837_v15 }
 0x378   : > { %v2868_v63 = vsel %vm2804_vm9, %v2702_v39, %v2836_v5  ;;  %v1773_v42 = vpop.permute.xlu1 %1772 }
 0x379   : > { %v2153_v45 = vpop.permute.xlu0 %2152  ;;  %3888 = vmatprep.mubr.msk.f32.mxu0 %vm798_vm1, %v2868_v63  ;;  %v2352_v3 = vsel %vm2320_vm14, %v2319_v49, %v1773_v42 }
 0x37a   : > { %v2449_v14 = vsel %vm2419_vm3, %v2416_v9, %v2153_v45  ;;  %3889 = vmatmul.mubr.msk.f32.gmra.mrb[30].mxu0 %vm798_vm1, %v2869_v51 }
 0x37b   : > { %3860 = vmatmul.mubr.msk.f32.gmra.mrb[44].mxu1 %vm2468_vm4, %v2449_v14 }
 0x37c   : > { %v1901_v4 = vpop.permute.xlu1 %1900 }
 0x37d   : > { %v1899_v10 = vpop.permute.xlu0 %1898  ;;  %v2385_v48 = vsel %vm2353_vm15, %v2352_v3, %v1901_v4 }
 0x37e   : > { %v2384_v32 = vsel %vm2353_vm15, %v2351_v8, %v1899_v10 }
 0x380   : > { %v2029_v47 = vpop.permute.xlu1 %2028 }
 0x381   : > { %v2027_v53 = vpop.permute.xlu0 %2026  ;;  %v2418_v44 = vsel %vm2386_vm2, %v2385_v48, %v2029_v47 }
 0x382   : > { %v2417_v60 = vsel %vm2386_vm2, %v2384_v32, %v2027_v53 }
 0x384   : > { %v2157_v59 = vpop.permute.xlu1 %2156 }
 0x385   : > { %v2155_v50 = vpop.permute.xlu0 %2154  ;;  %v2451_v29 = vsel %vm2419_vm3, %v2418_v44, %v2157_v59  ;;  %v3869_v46 = vpop.f32.mrb[16].mxu0 }
 0x386   : > { %v2450_v13 = vsel %vm2419_vm3, %v2417_v60, %v2155_v50  ;;  %v3062_v0 = vadd.f32 %v3869_v46, %v5499_v36  ;;  %v3056_v20 = vpop.f32.mrb[17].mxu0 }
 0x387   : > { %3862 = vmatprep.mubr.msk.f32.mxu1 %vm2468_vm4, %v2450_v13  ;;  %v3057_v61 = vadd.f32 %v5499_v36, %v3056_v20 }
 0x388   : > { %3863 = vmatmul.mubr.msk.f32.gmra.mrb[46].mxu1 %vm2468_vm4, %v2451_v29  ;;  %3216 = vst.msk [vmem:[%s5507_s11 + $0x8] sm:$0xff] %vm380_vm0, %v3062_v0  ;;  %v3248_v16 = vsel %vm380_vm0, %v3062_v0, 0.0  ;;  %v3317_v28 = vmul.f32 %v3062_v0, %v3062_v0 }
 0x389   : > { %3215 = vst.msk [vmem:[%s5507_s11] sm:$0xff] %vm380_vm0, %v3057_v61  ;;  %v3247_v58 = vsel %vm380_vm0, %v3057_v61, 0.0  ;;  %v3316_v1 = vmul.f32 %v3057_v61, %v3057_v61 }
 0x38a   : > { %v3349_v57 = vsel %vm380_vm0, %v3317_v28, 0.0  ;;  %v3249_v7 = vadd.f32 %v3248_v16, %v3247_v58 }
 0x38b   : > { %v3348_v6 = vsel %vm380_vm0, %v3316_v1, 0.0 }
 0x38c   : > { %v3350_v62 = vadd.f32 %v3349_v57, %v3348_v6 }
 0x38d   : > { %v3843_v26 = vpop.f32.mrb[32].mxu1 }
 0x38e   : > { %v2717_v11 = vadd.f32 %v3843_v26, %v5119_v27  ;;  %v2711_v18 = vpop.f32.mrb[33].mxu1 }
 0x38f   : > { %v2712_v12 = vadd.f32 %v5119_v27, %v2711_v18 }
 0x390   : > { %v2839_v24 = vmul.f32 0.01, %v2717_v11  ;;  %vm2807_vm12 = vcmp.ge.f32.partialorder %v2717_v11, 0.0 }
 0x391   : > { %vm2806_vm13 = vcmp.ge.f32.partialorder %v2712_v12, 0.0  ;;  %v2838_v25 = vmul.f32 0.01, %v2712_v12 }
 0x392   : > { %v2871_v34 = vsel %vm2807_vm12, %v2717_v11, %v2839_v24 }
 0x393   : > { %v2870_v17 = vsel %vm2806_vm13, %v2712_v12, %v2838_v25  ;;  %v5566_v12 = vld [vmem:[%s5729_s4] ss:$0 sm:$0xff] }
 0x394   : > { %3891 = vmatprep.mubr.msk.f32.mxu0 %vm798_vm1, %v2870_v17 }
 0x395   : > { %3892 = vmatmul.mubr.msk.f32.gmra.mrb[32].mxu0 %vm798_vm1, %v2871_v34 }
 0x3a6   : > { %v3872_v55 = vpop.f32.mrb[18].mxu0 }
 0x3a7   : > { %v3072_v21 = vadd.f32 %v3872_v55, %v5499_v36  ;;  %v3066_v19 = vpop.f32.mrb[19].mxu0 }
 0x3a8   : > { %v3067_v35 = vadd.f32 %v5499_v36, %v3066_v19 }
 0x3a9   : > { %3218 = vst.msk [vmem:[%s5507_s11 + $0x18] sm:$0xff] %vm380_vm0, %v3072_v21  ;;  %v3319_v23 = vmul.f32 %v3072_v21, %v3072_v21  ;;  %v3252_v41 = vsel %vm380_vm0, %v3072_v21, 0.0 }
 0x3aa   : > { %3217 = vst.msk [vmem:[%s5507_s11 + $0x10] sm:$0xff] %vm380_vm0, %v3067_v35  ;;  %v3250_v22 = vsel %vm380_vm0, %v3067_v35, 0.0  ;;  %v3318_v39 = vmul.f32 %v3067_v35, %v3067_v35 }
 0x3ab   : > { %v3251_v40 = vadd.f32 %v3250_v22, %v3249_v7  ;;  %v3353_v54 = vsel %vm380_vm0, %v3319_v23, 0.0 }
 0x3ac   : > { %v3351_v15 = vsel %vm380_vm0, %v3318_v39, 0.0 }
 0x3ad   : > { %v3352_v56 = vadd.f32 %v3351_v15, %v3350_v62  ;;  %v3846_v2 = vpop.f32.mrb[34].mxu1  ;;  %v3253_v5 = vadd.f32 %v3252_v41, %v3251_v40 }
 0x3ae   : > { %v2727_v9 = vadd.f32 %v3846_v2, %v5119_v27  ;;  %v2721_v45 = vpop.f32.mrb[35].mxu1 }
 0x3af   : > { %v2722_v63 = vadd.f32 %v5119_v27, %v2721_v45  ;;  %v3354_v14 = vadd.f32 %v3353_v54, %v3352_v56 }
 0x3b0   : > { %v2841_v42 = vmul.f32 0.01, %v2727_v9  ;;  %vm2809_vm14 = vcmp.ge.f32.partialorder %v2727_v9, 0.0 }
 0x3b1   : > { %vm2808_vm15 = vcmp.ge.f32.partialorder %v2722_v63, 0.0  ;;  %v2840_v51 = vmul.f32 0.01, %v2722_v63 }
 0x3b2   : > { %v2873_v4 = vsel %vm2809_vm14, %v2727_v9, %v2841_v42 }
 0x3b3   : > { %v2872_v10 = vsel %vm2808_vm15, %v2722_v63, %v2840_v51 }
 0x3b4   : > { %3894 = vmatprep.mubr.msk.f32.mxu0 %vm798_vm1, %v2872_v10 }
 0x3b5   : > { %3895 = vmatmul.mubr.msk.f32.gmra.mrb[34].mxu0 %vm798_vm1, %v2873_v4 }
 0x3c6   : > { %v3875_v33 = vpop.f32.mrb[20].mxu0 }
 0x3c7   : > { %v3082_v31 = vadd.f32 %v3875_v33, %v5499_v36  ;;  %v3076_v30 = vpop.f32.mrb[21].mxu0 }
 0x3c8   : > { %v3077_v38 = vadd.f32 %v5499_v36, %v3076_v30 }
 0x3c9   : > { %3220 = vst.msk [vmem:[%s5507_s11 + $0x28] sm:$0xff] %vm380_vm0, %v3082_v31  ;;  %v3321_v37 = vmul.f32 %v3082_v31, %v3082_v31  ;;  %v3256_v47 = vsel %vm380_vm0, %v3082_v31, 0.0 }
 0x3ca   : > { %3219 = vst.msk [vmem:[%s5507_s11 + $0x20] sm:$0xff] %vm380_vm0, %v3077_v38  ;;  %v3254_v53 = vsel %vm380_vm0, %v3077_v38, 0.0  ;;  %v3320_v43 = vmul.f32 %v3077_v38, %v3077_v38 }
 0x3cb   : > { %v3255_v52 = vadd.f32 %v3254_v53, %v3253_v5  ;;  %v3357_v48 = vsel %vm380_vm0, %v3321_v37, 0.0 }
 0x3cc   : > { %v3355_v49 = vsel %vm380_vm0, %v3320_v43, 0.0 }
 0x3cd   : > { %v3356_v8 = vadd.f32 %v3355_v49, %v3354_v14  ;;  %v3849_v3 = vpop.f32.mrb[36].mxu1  ;;  %v3257_v32 = vadd.f32 %v3256_v47, %v3255_v52 }
 0x3ce   : > { %v2737_v60 = vadd.f32 %v3849_v3, %v5119_v27  ;;  %v2731_v50 = vpop.f32.mrb[37].mxu1 }
 0x3cf   : > { %v2732_v44 = vadd.f32 %v5119_v27, %v2731_v50  ;;  %v3358_v13 = vadd.f32 %v3357_v48, %v3356_v8 }
 0x3d0   : > { %v2843_v59 = vmul.f32 0.01, %v2737_v60  ;;  %vm2811_vm2 = vcmp.ge.f32.partialorder %v2737_v60, 0.0 }
 0x3d1   : > { %vm2810_vm3 = vcmp.ge.f32.partialorder %v2732_v44, 0.0  ;;  %v2842_v29 = vmul.f32 0.01, %v2732_v44 }
 0x3d2   : > { %v2875_v0 = vsel %vm2811_vm2, %v2737_v60, %v2843_v59 }
 0x3d3   : > { %v2874_v46 = vsel %vm2810_vm3, %v2732_v44, %v2842_v29 }
 0x3d4   : > { %3897 = vmatprep.mubr.msk.f32.mxu0 %vm798_vm1, %v2874_v46 }
 0x3d5   : > { %3898 = vmatmul.mubr.msk.f32.gmra.mrb[36].mxu0 %vm798_vm1, %v2875_v0 }
 0x3e6   : > { %v3878_v20 = vpop.f32.mrb[22].mxu0 }
 0x3e7   : > { %v3092_v61 = vadd.f32 %v3878_v20, %v5499_v36  ;;  %v3086_v16 = vpop.f32.mrb[23].mxu0 }
 0x3e8   : > { %v3087_v28 = vadd.f32 %v5499_v36, %v3086_v16 }
 0x3e9   : > { %3222 = vst.msk [vmem:[%s5507_s11 + $0x38] sm:$0xff] %vm380_vm0, %v3092_v61  ;;  %v3323_v27 = vmul.f32 %v3092_v61, %v3092_v61  ;;  %v3260_v7 = vsel %vm380_vm0, %v3092_v61, 0.0 }
 0x3ea   : > { %3221 = vst.msk [vmem:[%s5507_s11 + $0x30] sm:$0xff] %vm380_vm0, %v3087_v28  ;;  %v3258_v58 = vsel %vm380_vm0, %v3087_v28, 0.0  ;;  %v3322_v1 = vmul.f32 %v3087_v28, %v3087_v28 }
 0x3eb   : > { %v3259_v57 = vadd.f32 %v3258_v58, %v3257_v32  ;;  %v3361_v18 = vsel %vm380_vm0, %v3323_v27, 0.0 }
 0x3ec   : > { %v3359_v6 = vsel %vm380_vm0, %v3322_v1, 0.0 }
 0x3ed   : > { %v3360_v62 = vadd.f32 %v3359_v6, %v3358_v13  ;;  %v3852_v26 = vpop.f32.mrb[38].mxu1  ;;  %v3261_v11 = vadd.f32 %v3260_v7, %v3259_v57 }
 0x3ee   : > { %v2747_v24 = vadd.f32 %v5566_v12, %v3852_v26  ;;  %v2741_v25 = vpop.f32.mrb[39].mxu1 }
 0x3ef   : > { %v2742_v17 = vadd.f32 %v5566_v12, %v2741_v25  ;;  %v3362_v34 = vadd.f32 %v3361_v18, %v3360_v62 }
 0x3f0   : > { %v2845_v55 = vmul.f32 0.01, %v2747_v24  ;;  %vm2813_vm4 = vcmp.ge.f32.partialorder %v2747_v24, 0.0 }
 0x3f1   : > { %vm2812_vm10 = vcmp.ge.f32.partialorder %v2742_v17, 0.0  ;;  %v2844_v21 = vmul.f32 0.01, %v2742_v17 }
 0x3f2   : > { %v2877_v35 = vsel %vm2813_vm4, %v2747_v24, %v2845_v55 }
 0x3f3   : > { %v2876_v19 = vsel %vm2812_vm10, %v2742_v17, %v2844_v21 }
 0x3f4   : > { %3900 = vmatprep.mubr.msk.f32.mxu0 %vm798_vm1, %v2876_v19 }
 0x3f5   : > { %3901 = vmatmul.mubr.msk.f32.gmra.mrb[38].mxu0 %vm798_vm1, %v2877_v35 }
 0x405   : > { %v3881_v23 = vpop.f32.mrb[24].mxu0 }
 0x406   : > { %v3102_v22 = vadd.f32 %v3881_v23, %v5499_v36  ;;  %v3096_v39 = vpop.f32.mrb[25].mxu0 }
 0x407   : > { %v3097_v40 = vadd.f32 %v5499_v36, %v3096_v39 }
 0x408   : > { %3224 = vst.msk [vmem:[%s5507_s11 + $0x48] sm:$0xff] %vm380_vm0, %v3102_v22  ;;  %v3325_v41 = vmul.f32 %v3102_v22, %v3102_v22  ;;  %v3264_v5 = vsel %vm380_vm0, %v3102_v22, 0.0 }
 0x409   : > { %3223 = vst.msk [vmem:[%s5507_s11 + $0x40] sm:$0xff] %vm380_vm0, %v3097_v40  ;;  %v3262_v15 = vsel %vm380_vm0, %v3097_v40, 0.0  ;;  %v3324_v56 = vmul.f32 %v3097_v40, %v3097_v40 }
 0x40a   : > { %v3263_v2 = vadd.f32 %v3262_v15, %v3261_v11  ;;  %v3365_v63 = vsel %vm380_vm0, %v3325_v41, 0.0 }
 0x40b   : > { %v3363_v54 = vsel %vm380_vm0, %v3324_v56, 0.0 }
 0x40c   : > { %v3364_v9 = vadd.f32 %v3363_v54, %v3362_v34  ;;  %v3265_v45 = vadd.f32 %v3264_v5, %v3263_v2 }
 0x40d   : > { %v3855_v14 = vpop.f32.mrb[40].mxu1 }
 0x40e   : > { %v2757_v42 = vadd.f32 %v5566_v12, %v3855_v14  ;;  %v2751_v51 = vpop.f32.mrb[41].mxu1  ;;  %v3366_v10 = vadd.f32 %v3365_v63, %v3364_v9 }
 0x40f   : > { %v2752_v4 = vadd.f32 %v5566_v12, %v2751_v51 }
 0x410   : > { %v2847_v33 = vmul.f32 0.01, %v2757_v42  ;;  %vm2815_vm11 = vcmp.ge.f32.partialorder %v2757_v42, 0.0 }
 0x411   : > { %vm2814_vm5 = vcmp.ge.f32.partialorder %v2752_v4, 0.0  ;;  %v2846_v31 = vmul.f32 0.01, %v2752_v4 }
 0x412   : > { %v2879_v38 = vsel %vm2815_vm11, %v2757_v42, %v2847_v33 }
 0x413   : > { %v2878_v30 = vsel %vm2814_vm5, %v2752_v4, %v2846_v31 }
 0x414   : > { %3903 = vmatprep.mubr.msk.f32.mxu0 %vm798_vm1, %v2878_v30 }
 0x415   : > { %3904 = vmatmul.mubr.msk.f32.gmra.mrb[40].mxu0 %vm798_vm1, %v2879_v38 }
 0x425   : > { %v3884_v37 = vpop.f32.mrb[26].mxu0 }
 0x426   : > { %v3112_v53 = vadd.f32 %v3884_v37, %v5499_v36  ;;  %v3106_v43 = vpop.f32.mrb[27].mxu0 }
 0x427   : > { %v3107_v52 = vadd.f32 %v5499_v36, %v3106_v43 }
 0x428   : > { %3226 = vst.msk [vmem:[%s5507_s11 + $0x58] sm:$0xff] %vm380_vm0, %v3112_v53  ;;  %v3327_v47 = vmul.f32 %v3112_v53, %v3112_v53  ;;  %v3268_v32 = vsel %vm380_vm0, %v3112_v53, 0.0 }
 0x429   : > { %3225 = vst.msk [vmem:[%s5507_s11 + $0x50] sm:$0xff] %vm380_vm0, %v3107_v52  ;;  %v3266_v49 = vsel %vm380_vm0, %v3107_v52, 0.0  ;;  %v3326_v8 = vmul.f32 %v3107_v52, %v3107_v52 }
 0x42a   : > { %v3267_v3 = vadd.f32 %v3266_v49, %v3265_v45  ;;  %v3369_v44 = vsel %vm380_vm0, %v3327_v47, 0.0 }
 0x42b   : > { %v3367_v48 = vsel %vm380_vm0, %v3326_v8, 0.0 }
 0x42c   : > { %v3368_v60 = vadd.f32 %v3367_v48, %v3366_v10  ;;  %v3269_v50 = vadd.f32 %v3268_v32, %v3267_v3 }
 0x42d   : > { %v3858_v13 = vpop.f32.mrb[42].mxu1 }
 0x42e   : > { %v2767_v59 = vadd.f32 %v5566_v12, %v3858_v13  ;;  %v2761_v29 = vpop.f32.mrb[43].mxu1  ;;  %v3370_v46 = vadd.f32 %v3369_v44, %v3368_v60 }
 0x42f   : > { %v2762_v0 = vadd.f32 %v5566_v12, %v2761_v29 }
 0x430   : > { %v2849_v20 = vmul.f32 0.01, %v2767_v59  ;;  %vm2817_vm6 = vcmp.ge.f32.partialorder %v2767_v59, 0.0 }
 0x431   : > { %vm2816_vm7 = vcmp.ge.f32.partialorder %v2762_v0, 0.0  ;;  %v2848_v61 = vmul.f32 0.01, %v2762_v0 }
 0x432   : > { %v2881_v28 = vsel %vm2817_vm6, %v2767_v59, %v2849_v20 }
 0x433   : > { %v2880_v16 = vsel %vm2816_vm7, %v2762_v0, %v2848_v61 }
 0x434   : > { %3906 = vmatprep.mubr.msk.f32.mxu0 %vm798_vm1, %v2880_v16 }
 0x435   : > { %3907 = vmatmul.mubr.msk.f32.gmra.mrb[42].mxu0 %vm798_vm1, %v2881_v28 }
 0x445   : > { %v3887_v27 = vpop.f32.mrb[28].mxu0 }
 0x446   : > { %v3122_v58 = vadd.f32 %v3887_v27, %v5499_v36  ;;  %v3116_v1 = vpop.f32.mrb[29].mxu0 }
 0x447   : > { %v3117_v57 = vadd.f32 %v5499_v36, %v3116_v1 }
 0x448   : > { %3228 = vst.msk [vmem:[%s5507_s11 + $0x68] sm:$0xff] %vm380_vm0, %v3122_v58  ;;  %v3329_v7 = vmul.f32 %v3122_v58, %v3122_v58  ;;  %v3272_v11 = vsel %vm380_vm0, %v3122_v58, 0.0 }
 0x449   : > { %3227 = vst.msk [vmem:[%s5507_s11 + $0x60] sm:$0xff] %vm380_vm0, %v3117_v57  ;;  %v3270_v6 = vsel %vm380_vm0, %v3117_v57, 0.0  ;;  %v3328_v62 = vmul.f32 %v3117_v57, %v3117_v57 }
 0x44a   : > { %v3271_v26 = vadd.f32 %v3270_v6, %v3269_v50  ;;  %v3373_v55 = vsel %vm380_vm0, %v3329_v7, 0.0 }
 0x44b   : > { %v3371_v18 = vsel %vm380_vm0, %v3328_v62, 0.0 }
 0x44c   : > { %v3372_v24 = vadd.f32 %v3371_v18, %v3370_v46  ;;  %v3273_v34 = vadd.f32 %v3272_v11, %v3271_v26 }
 0x44d   : > { %v3890_v25 = vpop.f32.mrb[30].mxu0 }
 0x44e   : > { %v3861_v17 = vpop.f32.mrb[44].mxu1  ;;  %v3132_v21 = vadd.f32 %v3890_v25, %v5499_v36  ;;  %v3126_v35 = vpop.f32.mrb[31].mxu0  ;;  %v3374_v39 = vadd.f32 %v3373_v55, %v3372_v24 }
 0x44f   : > { %v2777_v19 = vadd.f32 %v5566_v12, %v3861_v17  ;;  %v2771_v23 = vpop.f32.mrb[45].mxu1  ;;  %v3127_v22 = vadd.f32 %v5499_v36, %v3126_v35 }
 0x450   : > { %v2772_v40 = vadd.f32 %v5566_v12, %v2771_v23  ;;  %3230 = vst.msk [vmem:[%s5507_s11 + $0x78] sm:$0xff] %vm380_vm0, %v3132_v21  ;;  %v3331_v41 = vmul.f32 %v3132_v21, %v3132_v21  ;;  %v3276_v9 = vsel %vm380_vm0, %v3132_v21, 0.0 }
 0x451   : > { %vm2819_vm8 = vcmp.ge.f32.partialorder %v2777_v19, 0.0  ;;  %v2851_v15 = vmul.f32 0.01, %v2777_v19  ;;  %3229 = vst.msk [vmem:[%s5507_s11 + $0x70] sm:$0xff] %vm380_vm0, %v3127_v22  ;;  %v3274_v56 = vsel %vm380_vm0, %v3127_v22, 0.0  ;;  %v3330_v2 = vmul.f32 %v3127_v22, %v3127_v22 }
 0x452   : > { %vm2818_vm9 = vcmp.ge.f32.partialorder %v2772_v40, 0.0  ;;  %v2850_v5 = vmul.f32 0.01, %v2772_v40  ;;  %v3275_v54 = vadd.f32 %v3274_v56, %v3273_v34  ;;  %v3377_v10 = vsel %vm380_vm0, %v3331_v41, 0.0 }
 0x453   : > { %v3375_v45 = vsel %vm380_vm0, %v3330_v2, 0.0  ;;  %v2883_v42 = vsel %vm2819_vm8, %v2777_v19, %v2851_v15 }
 0x454   : > { %v2882_v63 = vsel %vm2818_vm9, %v2772_v40, %v2850_v5  ;;  %v3376_v14 = vadd.f32 %v3375_v45, %v3374_v39  ;;  %v3277_v51 = vadd.f32 %v3276_v9, %v3275_v54 }
 0x455   : > { %3909 = vmatprep.mubr.msk.f32.mxu0 %vm798_vm1, %v2882_v63 }
 0x456   : > { %3910 = vmatmul.mubr.msk.f32.gmra.mrb[44].mxu0 %vm798_vm1, %v2883_v42  ;;  %v3378_v4 = vadd.f32 %v3377_v10, %v3376_v14 }
 0x45b   : > { %v3864_v33 = vpop.f32.mrb[46].mxu1 }
 0x45c   : > { %v2787_v31 = vadd.f32 %v5566_v12, %v3864_v33  ;;  %v2781_v30 = vpop.f32.mrb[47].mxu1 }
 0x45d   : > { %v2782_v38 = vadd.f32 %v5566_v12, %v2781_v30 }
 0x45e   : > { %v2853_v37 = vmul.f32 0.01, %v2787_v31  ;;  %vm2821_vm12 = vcmp.ge.f32.partialorder %v2787_v31, 0.0 }
 0x45f   : > { %vm2820_vm13 = vcmp.ge.f32.partialorder %v2782_v38, 0.0  ;;  %v2852_v53 = vmul.f32 0.01, %v2782_v38 }
 0x460   : > { %v2885_v52 = vsel %vm2821_vm12, %v2787_v31, %v2853_v37 }
 0x461   : > { %v2884_v43 = vsel %vm2820_vm13, %v2782_v38, %v2852_v53 }
 0x462   : > { %3912 = vmatprep.mubr.msk.f32.mxu0 %vm798_vm1, %v2884_v43 }
 0x463   : > { %3913 = vmatmul.mubr.msk.f32.gmra.mrb[46].mxu0 %vm798_vm1, %v2885_v52  ;;  %vm3417_vm1 = vcmask 1040384  }
 0x468   : > { %v3893_v47 = vpop.f32.mrb[32].mxu0 }
 0x469   : > { %v3142_v49 = vadd.f32 %v3893_v47, %v5499_v36  ;;  %v3136_v8 = vpop.f32.mrb[33].mxu0 }
 0x46a   : > { %v3137_v3 = vadd.f32 %v5499_v36, %v3136_v8 }
 0x46b   : > { %3232 = vst.msk [vmem:[%s5507_s11 + $0x88] sm:$0xff] %vm380_vm0, %v3142_v49  ;;  %v3333_v12 = vmul.f32 %v3142_v49, %v3142_v49  ;;  %v3280_v50 = vsel %vm380_vm0, %v3142_v49, 0.0 }
 0x46c   : > { %3231 = vst.msk [vmem:[%s5507_s11 + $0x80] sm:$0xff] %vm380_vm0, %v3137_v3  ;;  %v3278_v32 = vsel %vm380_vm0, %v3137_v3, 0.0  ;;  %v3332_v48 = vmul.f32 %v3137_v3, %v3137_v3 }
 0x46d   : > { %v3279_v60 = vadd.f32 %v3278_v32, %v3277_v51  ;;  %v3381_v29 = vsel %vm380_vm0, %v3333_v12, 0.0 }
 0x46e   : > { %v3379_v44 = vsel %vm380_vm0, %v3332_v48, 0.0 }
 0x46f   : > { %v3380_v13 = vadd.f32 %v3379_v44, %v3378_v4  ;;  %v3281_v59 = vadd.f32 %v3280_v50, %v3279_v60 }
 0x471   : > { %v3382_v46 = vadd.f32 %v3381_v29, %v3380_v13 }
 0x488   : > { %v3896_v0 = vpop.f32.mrb[34].mxu0 }
 0x489   : > { %v3152_v20 = vadd.f32 %v3896_v0, %v5499_v36  ;;  %v3146_v61 = vpop.f32.mrb[35].mxu0 }
 0x48a   : > { %v3147_v16 = vadd.f32 %v5499_v36, %v3146_v61 }
 0x48b   : > { %3234 = vst.msk [vmem:[%s5507_s11 + $0x98] sm:$0xff] %vm380_vm0, %v3152_v20  ;;  %v3335_v28 = vmul.f32 %v3152_v20, %v3152_v20  ;;  %v3284_v57 = vsel %vm380_vm0, %v3152_v20, 0.0 }
 0x48c   : > { %3233 = vst.msk [vmem:[%s5507_s11 + $0x90] sm:$0xff] %vm380_vm0, %v3147_v16  ;;  %v3282_v27 = vsel %vm380_vm0, %v3147_v16, 0.0  ;;  %v3334_v58 = vmul.f32 %v3147_v16, %v3147_v16 }
 0x48d   : > { %v3283_v1 = vadd.f32 %v3282_v27, %v3281_v59  ;;  %v3385_v26 = vsel %vm380_vm0, %v3335_v28, 0.0 }
 0x48e   : > { %v3383_v7 = vsel %vm380_vm0, %v3334_v58, 0.0 }
 0x48f   : > { %v3384_v6 = vadd.f32 %v3383_v7, %v3382_v46  ;;  %v3285_v62 = vadd.f32 %v3284_v57, %v3283_v1 }
 0x491   : > { %v3386_v11 = vadd.f32 %v3385_v26, %v3384_v6 }
 0x4a8   : > { %v3899_v18 = vpop.f32.mrb[36].mxu0 }
 0x4a9   : > { %v3162_v24 = vadd.f32 %v3899_v18, %v5499_v36  ;;  %v3156_v25 = vpop.f32.mrb[37].mxu0 }
 0x4aa   : > { %v3157_v17 = vadd.f32 %v5499_v36, %v3156_v25 }
 0x4ab   : > { %3236 = vst.msk [vmem:[%s5507_s11 + $0xa8] sm:$0xff] %vm380_vm0, %v3162_v24  ;;  %v3337_v34 = vmul.f32 %v3162_v24, %v3162_v24  ;;  %v3288_v35 = vsel %vm380_vm0, %v3162_v24, 0.0 }
 0x4ac   : > { %3235 = vst.msk [vmem:[%s5507_s11 + $0xa0] sm:$0xff] %vm380_vm0, %v3157_v17  ;;  %v3286_v55 = vsel %vm380_vm0, %v3157_v17, 0.0  ;;  %v3336_v21 = vmul.f32 %v3157_v17, %v3157_v17 }
 0x4ad   : > { %v3287_v19 = vadd.f32 %v3286_v55, %v3285_v62  ;;  %v3389_v40 = vsel %vm380_vm0, %v3337_v34, 0.0 }
 0x4ae   : > { %v3387_v23 = vsel %vm380_vm0, %v3336_v21, 0.0 }
 0x4af   : > { %v3388_v22 = vadd.f32 %v3387_v23, %v3386_v11  ;;  %v3289_v39 = vadd.f32 %v3288_v35, %v3287_v19 }
 0x4b1   : > { %v3390_v41 = vadd.f32 %v3389_v40, %v3388_v22 }
 0x4c8   : > { %v3902_v15 = vpop.f32.mrb[38].mxu0 }
 0x4c9   : > { %v3172_v56 = vadd.f32 %v3902_v15, %v5499_v36  ;;  %v3166_v2 = vpop.f32.mrb[39].mxu0 }
 0x4ca   : > { %v3167_v5 = vadd.f32 %v5499_v36, %v3166_v2 }
 0x4cb   : > { %3238 = vst.msk [vmem:[%s5507_s11 + $0xb8] sm:$0xff] %vm380_vm0, %v3172_v56  ;;  %v3339_v54 = vmul.f32 %v3172_v56, %v3172_v56  ;;  %v3292_v14 = vsel %vm380_vm0, %v3172_v56, 0.0 }
 0x4cc   : > { %3237 = vst.msk [vmem:[%s5507_s11 + $0xb0] sm:$0xff] %vm380_vm0, %v3167_v5  ;;  %v3290_v9 = vsel %vm380_vm0, %v3167_v5, 0.0  ;;  %v3338_v45 = vmul.f32 %v3167_v5, %v3167_v5 }
 0x4cd   : > { %v3291_v63 = vadd.f32 %v3290_v9, %v3289_v39  ;;  %v3393_v4 = vsel %vm380_vm0, %v3339_v54, 0.0 }
 0x4ce   : > { %v3391_v42 = vsel %vm380_vm0, %v3338_v45, 0.0 }
 0x4cf   : > { %v3392_v51 = vadd.f32 %v3391_v42, %v3390_v41  ;;  %v3293_v10 = vadd.f32 %v3292_v14, %v3291_v63 }
 0x4d1   : > { %v3394_v33 = vadd.f32 %v3393_v4, %v3392_v51 }
 0x4e8   : > { %v3905_v31 = vpop.f32.mrb[40].mxu0 }
 0x4e9   : > { %v3182_v30 = vadd.f32 %v3905_v31, %v5499_v36  ;;  %v3176_v38 = vpop.f32.mrb[41].mxu0 }
 0x4ea   : > { %v3177_v37 = vadd.f32 %v5499_v36, %v3176_v38 }
 0x4eb   : > { %3240 = vst.msk [vmem:[%s5507_s11 + $0xc8] sm:$0xff] %vm380_vm0, %v3182_v30  ;;  %v3341_v53 = vmul.f32 %v3182_v30, %v3182_v30  ;;  %v3296_v49 = vsel %vm380_vm0, %v3182_v30, 0.0 }
 0x4ec   : > { %3239 = vst.msk [vmem:[%s5507_s11 + $0xc0] sm:$0xff] %vm380_vm0, %v3177_v37  ;;  %v3294_v43 = vsel %vm380_vm0, %v3177_v37, 0.0  ;;  %v3340_v52 = vmul.f32 %v3177_v37, %v3177_v37 }
 0x4ed   : > { %v3295_v47 = vadd.f32 %v3294_v43, %v3293_v10  ;;  %v3397_v32 = vsel %vm380_vm0, %v3341_v53, 0.0 }
 0x4ee   : > { %v3395_v8 = vsel %vm380_vm0, %v3340_v52, 0.0 }
 0x4ef   : > { %v3396_v3 = vadd.f32 %v3395_v8, %v3394_v33  ;;  %v3297_v12 = vadd.f32 %v3296_v49, %v3295_v47 }
 0x4f1   : > { %v3398_v48 = vadd.f32 %v3397_v32, %v3396_v3 }
 0x508   : > { %v3908_v60 = vpop.f32.mrb[42].mxu0 }
 0x509   : > { %v3192_v50 = vadd.f32 %v3908_v60, %v5499_v36  ;;  %v3186_v44 = vpop.f32.mrb[43].mxu0 }
 0x50a   : > { %v3187_v13 = vadd.f32 %v5499_v36, %v3186_v44 }
 0x50b   : > { %3242 = vst.msk [vmem:[%s5507_s11 + $0xd8] sm:$0xff] %vm380_vm0, %v3192_v50  ;;  %v3343_v59 = vmul.f32 %v3192_v50, %v3192_v50  ;;  %v3300_v20 = vsel %vm380_vm0, %v3192_v50, 0.0 }
 0x50c   : > { %3241 = vst.msk [vmem:[%s5507_s11 + $0xd0] sm:$0xff] %vm380_vm0, %v3187_v13  ;;  %v3298_v29 = vsel %vm380_vm0, %v3187_v13, 0.0  ;;  %v3342_v46 = vmul.f32 %v3187_v13, %v3187_v13 }
 0x50d   : > { %v3299_v0 = vadd.f32 %v3298_v29, %v3297_v12  ;;  %v3401_v27 = vsel %vm380_vm0, %v3343_v59, 0.0 }
 0x50e   : > { %v3399_v61 = vsel %vm380_vm0, %v3342_v46, 0.0 }
 0x50f   : > { %v3400_v16 = vadd.f32 %v3399_v61, %v3398_v48  ;;  %v3301_v28 = vadd.f32 %v3300_v20, %v3299_v0 }
 0x511   : > { %v3402_v58 = vadd.f32 %v3401_v27, %v3400_v16 }
 0x529   : > { %v3911_v1 = vpop.f32.mrb[44].mxu0 }
 0x52a   : > { %v3202_v57 = vadd.f32 %v3911_v1, %v5499_v36  ;;  %v3196_v7 = vpop.f32.mrb[45].mxu0 }
 0x52b   : > { %v3197_v6 = vadd.f32 %v5499_v36, %v3196_v7 }
 0x52c   : > { %3244 = vst.msk [vmem:[%s5507_s11 + $0xe8] sm:$0xff] %vm380_vm0, %v3202_v57  ;;  %v3345_v62 = vmul.f32 %v3202_v57, %v3202_v57  ;;  %v3304_v24 = vsel %vm380_vm0, %v3202_v57, 0.0 }
 0x52d   : > { %3243 = vst.msk [vmem:[%s5507_s11 + $0xe0] sm:$0xff] %vm380_vm0, %v3197_v6  ;;  %v3302_v26 = vsel %vm380_vm0, %v3197_v6, 0.0  ;;  %v3344_v11 = vmul.f32 %v3197_v6, %v3197_v6 }
 0x52e   : > { %v3303_v18 = vadd.f32 %v3302_v26, %v3301_v28  ;;  %v3405_v55 = vsel %vm380_vm0, %v3345_v62, 0.0 }
 0x52f   : > { %v3403_v25 = vsel %vm380_vm0, %v3344_v11, 0.0 }
 0x530   : > { %v3404_v17 = vadd.f32 %v3403_v25, %v3402_v58  ;;  %v3305_v34 = vadd.f32 %v3304_v24, %v3303_v18 }
 0x532   : > { %v3406_v21 = vadd.f32 %v3405_v55, %v3404_v17 }
 0x536   : > { %v3914_v19 = vpop.f32.mrb[46].mxu0 }
 0x537   : > { %v3212_v35 = vadd.f32 %v3914_v19, %v5499_v36  ;;  %v3206_v23 = vpop.f32.mrb[47].mxu0 }
 0x538   : > { %v3207_v22 = vadd.f32 %v5499_v36, %v3206_v23 }
 0x539   : > { %3246 = vst.msk [vmem:[%s5507_s11 + $0xf8] sm:$0xff] %vm380_vm0, %v3212_v35  ;;  %v3347_v39 = vmul.f32 %v3212_v35, %v3212_v35  ;;  %v3308_v56 = vsel %vm380_vm0, %v3212_v35, 0.0 }
 0x53a   : > { %3245 = vst.msk [vmem:[%s5507_s11 + $0xf0] sm:$0xff] %vm380_vm0, %v3207_v22  ;;  %v3306_v40 = vsel %vm380_vm0, %v3207_v22, 0.0  ;;  %v3346_v41 = vmul.f32 %v3207_v22, %v3207_v22 }
 0x53b   : > { %v3307_v15 = vadd.f32 %v3306_v40, %v3305_v34  ;;  %v3409_v9 = vsel %vm380_vm0, %v3347_v39, 0.0 }
 0x53c   : > { %v3407_v2 = vsel %vm380_vm0, %v3346_v41, 0.0  ;;  %vm3419_vm0 = vcmask 254976  }
 0x53d   : > { %v3309_v5 = vadd.f32 %v3308_v56, %v3307_v15  ;;  %v3408_v54 = vadd.f32 %v3407_v2, %v3406_v21 }
 0x53f   : > { %v3310_v45 = vrot.slane %v3309_v5, 4  ;;  %v3410_v36 = vadd.f32 %v3409_v9, %v3408_v54 }
 0x541   : > { %v3311_v63 = vadd.f32 %v3310_v45, %v3309_v5  ;;  %v3411_v14 = vrot.slane %v3410_v36, 4 }
 0x543   : > { %v3312_v42 = vrot.slane %v3311_v63, 2  ;;  %v3412_v51 = vadd.f32 %v3411_v14, %v3410_v36 }
 0x545   : > { %v3313_v10 = vadd.f32 %v3312_v42, %v3311_v63  ;;  %v3413_v4 = vrot.slane %v3412_v51, 2 }
 0x547   : > { %v3314_v33 = vrot.slane %v3313_v10, 1  ;;  %v3414_v31 = vadd.f32 %v3413_v4, %v3412_v51 }
 0x549   : > { %v3415_v30 = vrot.slane %v3414_v31, 1  ;;  %v3315_v38 = vadd.f32 %v3314_v33, %v3313_v10 }
 0x54b   : > { %v3416_v37 = vadd.f32 %v3415_v30, %v3414_v31 }
 0x54d   : > { %v3418_v53 = vsel %vm3417_vm1, %v3315_v38, %v3416_v37 }
 0x54e   : > { %3420 = vst.msk [vmem:[%s336_s12] sm:$0x3] %vm3419_vm0, %v3418_v53 }
 0x54f PF: > { %p19_p8 = scmp.ge.s32.totalorder %s4141_s10, 4   ;;  %s5737_s27 = smov %s4052_s28 }
 0x550   : > { %s5738_s28 = smov %s4056_s29  ;;  %s5739_s29 = smov %s4151_s13 }
 0x551   : > { %s5740_s30 = smov %s4141_s10  ;;  %21 = sbr.rel (!%p19_p8) target bundleno = 3 (0x3), region = 103 }
 0x558   :  { %3456 = vsyncpa [#allocation4], 1 }
 0x559   :  { %3458 = vsyncpa [#allocation4 + $0x1], 1 }

</bundles_post_ra>
